<compile_context>
chip_gen: v7x
topology: tpu7x:2x2x1
jax: 0.10.0
libtpu: 0.0.40
codegen_flags: <defaults>
</compile_context>

<pallas_src>
import jax
import jax.numpy as jnp
from jax import lax
from jax.experimental import pallas as pl
from jax.experimental.pallas import tpu as pltpu

Z_DIM = 100
Z_PAD = 128               # 100 -> 128 lane-aligned z rows of W1
NUM_CLASSES = 10
CLS_PAD = 16              # one-hot / folded-embedding contraction dim
IN_PAD = Z_PAD + CLS_PAD  # 144-row stacked first-layer weight
H1, H2, H3 = 256, 512, 1024
OUT_DIM = 784
OUT_PAD = 896             # w4/b4 padded to 7*128 columns for dense MXU N passes


def _round_up(x, m):
    return (x + m - 1) // m * m


def _leaky_relu(x, slope=0.2):
    # slope in (0,1): max(x, slope*x) == LeakyReLU(x); single VPU op per vreg.
    return jnp.maximum(x, slope * x)


def generator_mlp_kernel(z_ref, lab_ref,
                         w1_ref, b1_ref,
                         w2_ref, b2_ref,
                         w3_ref, b3_ref,
                         w4_ref, b4_ref,
                         out_ref):
    tb = z_ref.shape[0]

    z = z_ref[...]                                           # (tb, 128) bf16
    lab = lab_ref[...]                                       # (tb, 1)   int32

    # Fused embedding lookup: one-hot(labels) contracted against the folded
    # (emb @ W1[100:110]) rows that live at rows 128..137 of the stacked W1.
    onehot = (lab == lax.broadcasted_iota(jnp.int32, (tb, CLS_PAD), 1)
              ).astype(jnp.bfloat16)                         # (tb, 16) bf16
    x = jnp.concatenate([z, onehot], axis=1)                 # (tb, 144) bf16

    h = jnp.dot(x, w1_ref[...],
                preferred_element_type=jnp.float32) + b1_ref[...]
    h = _leaky_relu(h)

    h = jnp.dot(h.astype(jnp.bfloat16), w2_ref[...],
                preferred_element_type=jnp.float32) + b2_ref[...]
    h = _leaky_relu(h)

    h = jnp.dot(h.astype(jnp.bfloat16), w3_ref[...],
                preferred_element_type=jnp.float32) + b3_ref[...]
    h = _leaky_relu(h)

    h = jnp.dot(h.astype(jnp.bfloat16), w4_ref[...],
                preferred_element_type=jnp.float32) + b4_ref[...]   # (tb, 896)
    # Drop the 112 padded lanes before tanh/store; output block is 784 wide.
    out_ref[...] = jnp.tanh(h[:, :OUT_DIM])                  # (tb, 784) f32


def prepare_kernel_params(params):
    """Pad / fold / cast the torch-shaped f32 params for the kernel."""
    w1 = params["w1"]                                        # (110, 256) f32

    # Stacked first-layer weight: rows 0..99 = z rows of W1 (padded to 128),
    # rows 128..137 = folded embedding (emb @ W1[100:110]) (padded to 144).
    w1e_small = params["emb"] @ w1[Z_DIM:Z_DIM + NUM_CLASSES]          # (10, 256)
    w1s = jnp.zeros((IN_PAD, H1), jnp.float32)
    w1s = w1s.at[:Z_DIM].set(w1[:Z_DIM])
    w1s = w1s.at[Z_PAD:Z_PAD + NUM_CLASSES].set(w1e_small)

    # Output layer: pad 784 -> 896 columns (zeros; compute-only, never stored).
    w4p = jnp.zeros((H3, OUT_PAD), jnp.float32).at[:, :OUT_DIM].set(params["w4"])
    b4p = jnp.zeros((1, OUT_PAD), jnp.float32).at[:, :OUT_DIM].set(params["b4"])

    bf16 = jnp.bfloat16
    return {
        "w1": w1s.astype(bf16), "b1": params["b1"],
        "w2": params["w2"].astype(bf16), "b2": params["b2"],
        "w3": params["w3"].astype(bf16), "b3": params["b3"],
        "w4": w4p.astype(bf16), "b4": b4p,
    }


def generator_forward(z, labels, kparams, *, batch_tile=512):
    """z: (B, 100) f32, labels: (B,) int. Returns (B, 28, 28) f32.

    batch_tile=512 is a good default on v5e/v6e/v7x (weights are fetched once,
    so bigger tiles just amortize per-step overhead and RHS pushes).  The tile
    is rounded to a multiple of 16 (bf16 sublanes) and halved when the whole
    batch would fit in a single tile so the grid has >= 2 "parallel" steps for
    v7x's two TensorCores.
    """
    B = z.shape[0]
    z = z.reshape(B, Z_DIM)

    tb = min(batch_tile, _round_up(B, 16))
    # Guarantee >= 2 grid tiles when practical (v7x megacore sharding).
    if _round_up(B, tb) // tb == 1 and tb >= 32:
        tb = _round_up((tb + 1) // 2, 16)
    B_pad = _round_up(B, tb)

    # Lane/sublane-aligned bf16 z; padded rows/lanes are zero.
    zp = jnp.zeros((B_pad, Z_PAD), jnp.bfloat16).at[:B, :Z_DIM].set(
        z.astype(jnp.bfloat16))
    lab = jnp.zeros((B_pad, 1), jnp.int32).at[:B, 0].set(labels.astype(jnp.int32))

    def rep(shape):
        # Grid-invariant (replicated) block: fetched once, reused every step.
        return pl.BlockSpec(shape, lambda i: (0,) * len(shape))

    flops_per_row = 2 * (IN_PAD * H1 + H1 * H2 + H2 * H3 + H3 * OUT_PAD)
    weight_bytes = (2 * (IN_PAD * H1 + H1 * H2 + H2 * H3 + H3 * OUT_PAD)
                    + 4 * (H1 + H2 + H3 + OUT_PAD))
    cost = pl.CostEstimate(
        flops=B_pad * flops_per_row,
        transcendentals=B_pad * OUT_DIM,
        bytes_accessed=weight_bytes + B_pad * (Z_PAD * 2 + 4) + B_pad * OUT_DIM * 4,
    )

    out = pl.pallas_call(
        generator_mlp_kernel,
        out_shape=jax.ShapeDtypeStruct((B_pad, OUT_DIM), jnp.float32),
        grid=(B_pad // tb,),
        in_specs=[
            pl.BlockSpec((tb, Z_PAD), lambda i: (i, 0)),     # z tile
            pl.BlockSpec((tb, 1), lambda i: (i, 0)),         # labels tile
            rep((IN_PAD, H1)), rep((1, H1)),
            rep((H1, H2)), rep((1, H2)),
            rep((H2, H3)), rep((1, H3)),
            rep((H3, OUT_PAD)), rep((1, OUT_PAD)),
        ],
        out_specs=pl.BlockSpec((tb, OUT_DIM), lambda i: (i, 0)),
        compiler_params=pltpu.CompilerParams(
            dimension_semantics=("parallel",)),
        cost_estimate=cost,
    )(zp, lab,
      kparams["w1"], kparams["b1"],
      kparams["w2"], kparams["b2"],
      kparams["w3"], kparams["b3"],
      kparams["w4"], kparams["b4"])

    # No lane re-pack needed; only drop padded batch rows (no-op when B==B_pad).
    return out[:B].reshape(B, 28, 28)


def init_params(key):
    """Deterministic synthetic f32 parameters matching the PyTorch module shapes."""
    ks = jax.random.split(key, 9)
    IN_DIM = Z_DIM + NUM_CLASSES  # 110

    def linear(kw, fan_in, fan_out):
        bound = 1.0 / jnp.sqrt(fan_in)
        return jax.random.uniform(kw, (fan_in, fan_out), jnp.float32, -bound, bound)

    return {
        "emb": jax.random.normal(ks[0], (NUM_CLASSES, NUM_CLASSES), jnp.float32),
        "w1": linear(ks[1], IN_DIM, H1),
        "b1": jax.random.uniform(ks[2], (1, H1), jnp.float32, -0.05, 0.05),
        "w2": linear(ks[3], H1, H2),
        "b2": jax.random.uniform(ks[4], (1, H2), jnp.float32, -0.05, 0.05),
        "w3": linear(ks[5], H2, H3),
        "b3": jax.random.uniform(ks[6], (1, H3), jnp.float32, -0.05, 0.05),
        "w4": linear(ks[7], H3, OUT_DIM),
        "b4": jax.random.uniform(ks[8], (1, OUT_DIM), jnp.float32, -0.05, 0.05),
    }


def reference_forward(z, labels, params):
    """Pure-JAX f32 reference mirroring the PyTorch module exactly."""
    B = z.shape[0]
    c = params["emb"][labels]
    x = jnp.concatenate([z.reshape(B, Z_DIM), c], axis=1)

    def lrelu(v):
        return jnp.where(v >= 0, v, 0.2 * v)

    h = lrelu(x @ params["w1"] + params["b1"])
    h = lrelu(h @ params["w2"] + params["b2"])
    h = lrelu(h @ params["w3"] + params["b3"])
    h = jnp.tanh(h @ params["w4"] + params["b4"])
    return h.reshape(B, 28, 28)


if __name__ == "__main__":
    key = jax.random.PRNGKey(0)
    kp, kz, kl = jax.random.split(key, 3)

    params = init_params(kp)
    kparams = prepare_kernel_params(params)

    # bf16 weights/activations with f32 accumulation vs f32 reference.
    ATOL = 2.5e-2

    # Small single-tile batch (B=8 -> tb=16, grid=(1,)).
    B = 8
    z = jax.random.normal(kz, (B, Z_DIM), jnp.float32)
    labels = jax.random.randint(kl, (B,), 0, NUM_CLASSES, jnp.int32)
    out = jax.block_until_ready(generator_forward(z, labels, kparams))
    ref = reference_forward(z, labels, params)
    assert out.shape == (B, 28, 28)
    assert jnp.allclose(out, ref, atol=ATOL, rtol=0.0), float(
        jnp.max(jnp.abs(out - ref)))

    # Batch that exercises the multi-tile / padded-row path (B=40 -> tb=32, grid=(2,)).
    B2 = 40
    kz2, kl2 = jax.random.split(jax.random.PRNGKey(1), 2)
    z2 = jax.random.normal(kz2, (B2, Z_DIM), jnp.float32)
    labels2 = jax.random.randint(kl2, (B2,), 0, NUM_CLASSES, jnp.int32)
    out2 = jax.block_until_ready(generator_forward(z2, labels2, kparams))
    ref2 = reference_forward(z2, labels2, params)
    assert out2.shape == (B2, 28, 28)
    assert jnp.allclose(out2, ref2, atol=ATOL, rtol=0.0), float(
        jnp.max(jnp.abs(out2 - ref2)))

    print("KERNEL_OK")
</pallas_src>

<mosaic_0001>
module attributes {stable_mosaic.version = 11 : i64} {
  func.func @generator_mlp_kernel(%arg0: i32, %arg1: memref<16x128xbf16, #tpu.memory_space<vmem>>, %arg2: memref<16x1xi32, #tpu.memory_space<vmem>>, %arg3: memref<144x256xbf16, #tpu.memory_space<vmem>>, %arg4: memref<1x256xf32, #tpu.memory_space<vmem>>, %arg5: memref<256x512xbf16, #tpu.memory_space<vmem>>, %arg6: memref<1x512xf32, #tpu.memory_space<vmem>>, %arg7: memref<512x1024xbf16, #tpu.memory_space<vmem>>, %arg8: memref<1x1024xf32, #tpu.memory_space<vmem>>, %arg9: memref<1024x896xbf16, #tpu.memory_space<vmem>>, %arg10: memref<1x896xf32, #tpu.memory_space<vmem>>, %arg11: memref<16x784xf32, #tpu.memory_space<vmem>>) attributes {dimension_semantics = [#tpu.dimension_semantics<parallel>], iteration_bounds = array<i64: 1>, scalar_prefetch = 0 : i64, scratch_operands = 0 : i64, tpu.core_type = #tpu.core_type<tc>, window_params = [{transform_indices = @transform_0, window_bounds = array<i64: 16, 128>}, {transform_indices = @transform_1, window_bounds = array<i64: 16, 1>}, {pipeline_mode = #tpu.pipeline_mode<synchronous>, transform_indices = @transform_2, window_bounds = array<i64: 144, 256>}, {pipeline_mode = #tpu.pipeline_mode<synchronous>, transform_indices = @transform_3, window_bounds = array<i64: 1, 256>}, {pipeline_mode = #tpu.pipeline_mode<synchronous>, transform_indices = @transform_4, window_bounds = array<i64: 256, 512>}, {pipeline_mode = #tpu.pipeline_mode<synchronous>, transform_indices = @transform_5, window_bounds = array<i64: 1, 512>}, {pipeline_mode = #tpu.pipeline_mode<synchronous>, transform_indices = @transform_6, window_bounds = array<i64: 512, 1024>}, {pipeline_mode = #tpu.pipeline_mode<synchronous>, transform_indices = @transform_7, window_bounds = array<i64: 1, 1024>}, {pipeline_mode = #tpu.pipeline_mode<synchronous>, transform_indices = @transform_8, window_bounds = array<i64: 1024, 896>}, {pipeline_mode = #tpu.pipeline_mode<synchronous>, transform_indices = @transform_9, window_bounds = array<i64: 1, 896>}, {transform_indices = @transform_10, window_bounds = array<i64: 16, 784>}]} {
    %c0 = arith.constant 0 : index
    %c0_0 = arith.constant 0 : index
    %0 = vector.load %arg1[%c0, %c0_0] : memref<16x128xbf16, #tpu.memory_space<vmem>>, vector<16x128xbf16>
    %c0_1 = arith.constant 0 : index
    %c0_2 = arith.constant 0 : index
    %1 = vector.load %arg2[%c0_1, %c0_2] : memref<16x1xi32, #tpu.memory_space<vmem>>, vector<16x1xi32>
    %2 = tpu.iota {dimensions = array<i32: 1>} : vector<16x16xi32>
    %3 = vector.broadcast %1 : vector<16x1xi32> to vector<16x16xi32>
    %4 = arith.cmpi eq, %3, %2 : vector<16x16xi32>
    %5 = arith.extui %4 : vector<16x16xi1> to vector<16x16xi32>
    %6 = arith.sitofp %5 : vector<16x16xi32> to vector<16x16xf32>
    %7 = arith.truncf %6 : vector<16x16xf32> to vector<16x16xbf16>
    %8 = tpu.concatenate %0, %7 in 1 : vector<16x128xbf16>, vector<16x16xbf16> -> vector<16x144xbf16>
    %c0_3 = arith.constant 0 : index
    %c0_4 = arith.constant 0 : index
    %9 = vector.load %arg3[%c0_3, %c0_4] : memref<144x256xbf16, #tpu.memory_space<vmem>>, vector<144x256xbf16>
    %cst = arith.constant dense<0.000000e+00> : vector<16x256xf32>
    %10 = tpu.matmul %8, %9, %cst {dimension_numbers = #tpu.dot_dimension_numbers<[1], [0], [0], [1], [0, 0, 1, 1], [], []>} : vector<16x144xbf16>, vector<144x256xbf16>, vector<16x256xf32> -> vector<16x256xf32>
    %c0_5 = arith.constant 0 : index
    %c0_6 = arith.constant 0 : index
    %11 = vector.load %arg4[%c0_5, %c0_6] : memref<1x256xf32, #tpu.memory_space<vmem>>, vector<1x256xf32>
    %12 = vector.broadcast %11 : vector<1x256xf32> to vector<16x256xf32>
    %13 = arith.addf %10, %12 : vector<16x256xf32>
    %cst_7 = arith.constant 2.000000e-01 : f32
    %14 = vector.broadcast %cst_7 : f32 to vector<16x256xf32>
    %15 = arith.mulf %14, %13 : vector<16x256xf32>
    %16 = arith.maximumf %13, %15 : vector<16x256xf32>
    %17 = arith.truncf %16 : vector<16x256xf32> to vector<16x256xbf16>
    %c0_8 = arith.constant 0 : index
    %c0_9 = arith.constant 0 : index
    %18 = vector.load %arg5[%c0_8, %c0_9] : memref<256x512xbf16, #tpu.memory_space<vmem>>, vector<256x512xbf16>
    %cst_10 = arith.constant dense<0.000000e+00> : vector<16x512xf32>
    %19 = tpu.matmul %17, %18, %cst_10 {dimension_numbers = #tpu.dot_dimension_numbers<[1], [0], [0], [1], [0, 0, 1, 1], [], []>} : vector<16x256xbf16>, vector<256x512xbf16>, vector<16x512xf32> -> vector<16x512xf32>
    %c0_11 = arith.constant 0 : index
    %c0_12 = arith.constant 0 : index
    %20 = vector.load %arg6[%c0_11, %c0_12] : memref<1x512xf32, #tpu.memory_space<vmem>>, vector<1x512xf32>
    %21 = vector.broadcast %20 : vector<1x512xf32> to vector<16x512xf32>
    %22 = arith.addf %19, %21 : vector<16x512xf32>
    %cst_13 = arith.constant 2.000000e-01 : f32
    %23 = vector.broadcast %cst_13 : f32 to vector<16x512xf32>
    %24 = arith.mulf %23, %22 : vector<16x512xf32>
    %25 = arith.maximumf %22, %24 : vector<16x512xf32>
    %26 = arith.truncf %25 : vector<16x512xf32> to vector<16x512xbf16>
    %c0_14 = arith.constant 0 : index
    %c0_15 = arith.constant 0 : index
    %27 = vector.load %arg7[%c0_14, %c0_15] : memref<512x1024xbf16, #tpu.memory_space<vmem>>, vector<512x1024xbf16>
    %cst_16 = arith.constant dense<0.000000e+00> : vector<16x1024xf32>
    %28 = tpu.matmul %26, %27, %cst_16 {dimension_numbers = #tpu.dot_dimension_numbers<[1], [0], [0], [1], [0, 0, 1, 1], [], []>} : vector<16x512xbf16>, vector<512x1024xbf16>, vector<16x1024xf32> -> vector<16x1024xf32>
    %c0_17 = arith.constant 0 : index
    %c0_18 = arith.constant 0 : index
    %29 = vector.load %arg8[%c0_17, %c0_18] : memref<1x1024xf32, #tpu.memory_space<vmem>>, vector<1x1024xf32>
    %30 = vector.broadcast %29 : vector<1x1024xf32> to vector<16x1024xf32>
    %31 = arith.addf %28, %30 : vector<16x1024xf32>
    %cst_19 = arith.constant 2.000000e-01 : f32
    %32 = vector.broadcast %cst_19 : f32 to vector<16x1024xf32>
    %33 = arith.mulf %32, %31 : vector<16x1024xf32>
    %34 = arith.maximumf %31, %33 : vector<16x1024xf32>
    %35 = arith.truncf %34 : vector<16x1024xf32> to vector<16x1024xbf16>
    %c0_20 = arith.constant 0 : index
    %c0_21 = arith.constant 0 : index
    %36 = vector.load %arg9[%c0_20, %c0_21] : memref<1024x896xbf16, #tpu.memory_space<vmem>>, vector<1024x896xbf16>
    %cst_22 = arith.constant dense<0.000000e+00> : vector<16x896xf32>
    %37 = tpu.matmul %35, %36, %cst_22 {dimension_numbers = #tpu.dot_dimension_numbers<[1], [0], [0], [1], [0, 0, 1, 1], [], []>} : vector<16x1024xbf16>, vector<1024x896xbf16>, vector<16x896xf32> -> vector<16x896xf32>
    %c0_23 = arith.constant 0 : index
    %c0_24 = arith.constant 0 : index
    %38 = vector.load %arg10[%c0_23, %c0_24] : memref<1x896xf32, #tpu.memory_space<vmem>>, vector<1x896xf32>
    %39 = vector.broadcast %38 : vector<1x896xf32> to vector<16x896xf32>
    %40 = arith.addf %37, %39 : vector<16x896xf32>
    %41 = vector.extract_strided_slice %40 {offsets = [0, 0], sizes = [16, 784], strides = [1, 1]} : vector<16x896xf32> to vector<16x784xf32>
    %42 = math.tanh %41 : vector<16x784xf32>
    %c0_25 = arith.constant 0 : index
    %c0_26 = arith.constant 0 : index
    %43 = vector.load %arg11[%c0_25, %c0_26] : memref<16x784xf32, #tpu.memory_space<vmem>>, vector<16x784xf32>
    tpu.vector_store %arg11[%c0_25, %c0_26], %42 {strides = array<i32>} : memref<16x784xf32, #tpu.memory_space<vmem>>, vector<16x784xf32>,
    return
  }
  func.func @transform_0(%arg0: i32) -> (i32, i32) {
    %c0_i32 = arith.constant 0 : i32
    %c0_i32_0 = arith.constant 0 : i32
    return %arg0, %c0_i32 : i32, i32
  }
  func.func @transform_1(%arg0: i32) -> (i32, i32) {
    %c0_i32 = arith.constant 0 : i32
    %c0_i32_0 = arith.constant 0 : i32
    return %arg0, %c0_i32 : i32, i32
  }
  func.func @transform_2(%arg0: i32) -> (i32, i32) {
    %c0_i32 = arith.constant 0 : i32
    %c0_i32_0 = arith.constant 0 : i32
    %c0_i32_1 = arith.constant 0 : i32
    return %c0_i32, %c0_i32_0 : i32, i32
  }
  func.func @transform_3(%arg0: i32) -> (i32, i32) {
    %c0_i32 = arith.constant 0 : i32
    %c0_i32_0 = arith.constant 0 : i32
    %c0_i32_1 = arith.constant 0 : i32
    return %c0_i32, %c0_i32_0 : i32, i32
  }
  func.func @transform_4(%arg0: i32) -> (i32, i32) {
    %c0_i32 = arith.constant 0 : i32
    %c0_i32_0 = arith.constant 0 : i32
    %c0_i32_1 = arith.constant 0 : i32
    return %c0_i32, %c0_i32_0 : i32, i32
  }
  func.func @transform_5(%arg0: i32) -> (i32, i32) {
    %c0_i32 = arith.constant 0 : i32
    %c0_i32_0 = arith.constant 0 : i32
    %c0_i32_1 = arith.constant 0 : i32
    return %c0_i32, %c0_i32_0 : i32, i32
  }
  func.func @transform_6(%arg0: i32) -> (i32, i32) {
    %c0_i32 = arith.constant 0 : i32
    %c0_i32_0 = arith.constant 0 : i32
    %c0_i32_1 = arith.constant 0 : i32
    return %c0_i32, %c0_i32_0 : i32, i32
  }
  func.func @transform_7(%arg0: i32) -> (i32, i32) {
    %c0_i32 = arith.constant 0 : i32
    %c0_i32_0 = arith.constant 0 : i32
    %c0_i32_1 = arith.constant 0 : i32
    return %c0_i32, %c0_i32_0 : i32, i32
  }
  func.func @transform_8(%arg0: i32) -> (i32, i32) {
    %c0_i32 = arith.constant 0 : i32
    %c0_i32_0 = arith.constant 0 : i32
    %c0_i32_1 = arith.constant 0 : i32
    return %c0_i32, %c0_i32_0 : i32, i32
  }
  func.func @transform_9(%arg0: i32) -> (i32, i32) {
    %c0_i32 = arith.constant 0 : i32
    %c0_i32_0 = arith.constant 0 : i32
    %c0_i32_1 = arith.constant 0 : i32
    return %c0_i32, %c0_i32_0 : i32, i32
  }
  func.func @transform_10(%arg0: i32) -> (i32, i32) {
    %c0_i32 = arith.constant 0 : i32
    %c0_i32_0 = arith.constant 0 : i32
    return %arg0, %c0_i32 : i32, i32
  }
}

</mosaic_0001>

<bundles_post_ra>
// kernel: tpu_custom_call.1
= control target key start
LH: loop header
LB: loop body
LE: loop exit
PB: predicated region body
PF: predicated region fallthrough
CT: control target
= control target key end

     0   :  { %15 = vsyncpa [#allocation3], 0  ;;  %s8799_s0 = inlined_call_operand.hbm [shape: bf16[16,128], index: 0, kind: input, shape index: {}]   ;;  %s8800_s1 = inlined_call_operand.vmem [shape: s32[16,1], index: 1, kind: input, shape index: {}]   ;;  %s8801_s2 = inlined_call_operand.hbm [shape: bf16[144,256], index: 2, kind: input, shape index: {}]   ;;  %s8802_s3 = inlined_call_operand.hbm [shape: f32[1,256], index: 3, kind: input, shape index: {}]   ;;  %s8803_s4 = inlined_call_operand.hbm [shape: bf16[256,512], index: 4, kind: input, shape index: {}]   ;;  %s8804_s5 = inlined_call_operand.hbm [shape: f32[1,512], index: 5, kind: input, shape index: {}]   ;;  %s8805_s6 = inlined_call_operand.hbm [shape: bf16[512,1024], index: 6, kind: input, shape index: {}]   ;;  %s8806_s7 = inlined_call_operand.hbm [shape: f32[1,1024], index: 7, kind: input, shape index: {}]   ;;  %s8807_s8 = inlined_call_operand.hbm [shape: bf16[1024,896], index: 8, kind: input, shape index: {}]   ;;  %s8808_s9 = inlined_call_operand.hbm [shape: f32[1,896], index: 9, kind: input, shape index: {}]   ;;  %s8809_s10 = inlined_call_operand.hbm [shape: f32[16,784], index: 10, kind: output, shape index: {}]  }
   0x1   :  { %16 = vsyncpa [#allocation6], 0 }
   0x2   :  { %17 = vsyncpa [#allocation9], 0 }
   0x3   :  { %18 = vsyncpa [#allocation12], 0 }
   0x4   :  { %19 = vsyncpa [#allocation15], 0 }
   0x5   :  { %20 = vsyncpa [#allocation4], 0  ;;  %s8416_s13 = smov [#allocation5]   ;;  %s8184_s17 = scalar_lea.hbm %s8801_s2, 2304 }
   0x6   :  { %s40_s14 = sshll.u32 %s8416_s13, 4  ;;  %p8185_p0 = scmp.ne.s32.totalorder %s8801_s2, %s8184_s17  ;;  %s41_s14 = int_to_ptr.vmem [resolvable:$true] %s40_s14 }
   0x7   :  { %p8188_p1 = scmp.lt.u32.totalorder %s8184_s17, %s8801_s2 }
   0x9   :  { %p8190_p2 = pnand %p8188_p1, %p8185_p0 }
   0xb   :  { %8193 = shalt.err (!%p8190_p2)
}
   0xc   :  { %s8194_s22 = scalar_lea.vmem %s41_s14, 2304  ;;  %p8199_p4 = scmp.lt.s32.totalorder %s41_s14, %s41_s14 }
   0xd   :  { %p8195_p3 = scmp.ne.s32.totalorder %s41_s14, %s8194_s22  ;;  %p8200_p5 = scmp.lt.s32.totalorder %s8194_s22, %s8194_s22 }
   0xf   :  { %p8201_p6 = por %p8200_p5, %p8199_p4 }
  0x11   :  { %p8202_p7 = pnand %p8201_p6, %p8195_p3 }
  0x13   :  { %8205 = shalt.err (!%p8202_p7)
}
  0x14   :  { %s8417_s23 = smov 128   ;;  %s8418_s24 = smov 8  }
  0x15   :  { %46 = dma.hbm_to_vmem [thread:$0]  %s8801_s2, 2304, %s41_s14, [#allocation6], %s8417_s23, %s8417_s23, %s8418_s24  }
  0x16   :  { %s8419_s27 = smov [#allocation8]   ;;  %s8206_s11 = scalar_lea.hbm %s8803_s4, 8192 }
  0x17   :  { %s62_s28 = sshll.u32 %s8419_s27, 4  ;;  %p8207_p8 = scmp.ne.s32.totalorder %s8803_s4, %s8206_s11  ;;  %s63_s28 = int_to_ptr.vmem [resolvable:$true] %s62_s28 }
  0x18   :  { %p8210_p9 = scmp.lt.u32.totalorder %s8206_s11, %s8803_s4 }
  0x1a   :  { %p8212_p10 = pnand %p8210_p9, %p8207_p8 }
  0x1c   :  { %8215 = shalt.err (!%p8212_p10)
}
  0x1d   :  { %s8216_s17 = scalar_lea.vmem %s63_s28, 8192  ;;  %p8221_p12 = scmp.lt.s32.totalorder %s63_s28, %s63_s28 }
  0x1e   :  { %p8217_p11 = scmp.ne.s32.totalorder %s63_s28, %s8216_s17  ;;  %p8222_p13 = scmp.lt.s32.totalorder %s8216_s17, %s8216_s17 }
  0x20   :  { %p8223_p0 = por %p8222_p13, %p8221_p12 }
  0x22   :  { %p8224_p1 = pnand %p8223_p0, %p8217_p11 }
  0x24   :  { %8227 = shalt.err (!%p8224_p1)
}
  0x25   :  { %s8420_s2 = smov 256   ;;  %s8421_s14 = smov 16  }
  0x26   :  { %68 = dma.hbm_to_vmem [thread:$0]  %s8803_s4, 8192, %s63_s28, [#allocation9], %s8420_s2, %s8420_s2, %s8421_s14  }
  0x27   :  { %s8422_s20 = smov [#allocation11]   ;;  %s8228_s24 = scalar_lea.hbm %s8805_s6, 32768 }
  0x28   :  { %s84_s21 = sshll.u32 %s8422_s20, 4  ;;  %p8229_p2 = scmp.ne.s32.totalorder %s8805_s6, %s8228_s24  ;;  %s85_s21 = int_to_ptr.vmem [resolvable:$true] %s84_s21 }
  0x29   :  { %p8232_p3 = scmp.lt.u32.totalorder %s8228_s24, %s8805_s6 }
  0x2b   :  { %p8234_p4 = pnand %p8232_p3, %p8229_p2 }
  0x2d   :  { %8237 = shalt.err (!%p8234_p4)
}
  0x2e   :  { %s8238_s30 = scalar_lea.vmem %s85_s21, 32768  ;;  %p8243_p6 = scmp.lt.s32.totalorder %s85_s21, %s85_s21 }
  0x2f   :  { %p8239_p5 = scmp.ne.s32.totalorder %s85_s21, %s8238_s30  ;;  %p8244_p7 = scmp.lt.s32.totalorder %s8238_s30, %s8238_s30 }
  0x31   :  { %p8245_p8 = por %p8244_p7, %p8243_p6 }
  0x33   :  { %p8246_p9 = pnand %p8245_p8, %p8239_p5 }
  0x35   :  { %8249 = shalt.err (!%p8246_p9)
}
  0x36   :  { %s8423_s4 = smov 512   ;;  %s8424_s28 = smov 32  }
  0x37   :  { %90 = dma.hbm_to_vmem [thread:$0]  %s8805_s6, 32768, %s85_s21, [#allocation12], %s8423_s4, %s8423_s4, %s8424_s28  }
  0x38   :  { %s8425_s13 = smov [#allocation14]   ;;  %s8250_s2 = scalar_lea.hbm %s8807_s8, 57344 }
  0x39   :  { %s106_s15 = sshll.u32 %s8425_s13, 4  ;;  %p8251_p10 = scmp.ne.s32.totalorder %s8807_s8, %s8250_s2  ;;  %s107_s15 = int_to_ptr.vmem [resolvable:$true] %s106_s15 }
  0x3a   :  { %p8254_p11 = scmp.lt.u32.totalorder %s8250_s2, %s8807_s8 }
  0x3c   :  { %p8256_p12 = pnand %p8254_p11, %p8251_p10 }
  0x3e   :  { %8259 = shalt.err (!%p8256_p12)
}
  0x3f   :  { %s8260_s22 = scalar_lea.vmem %s107_s15, 57344  ;;  %p8265_p0 = scmp.lt.s32.totalorder %s107_s15, %s107_s15 }
  0x40   :  { %p8261_p13 = scmp.ne.s32.totalorder %s107_s15, %s8260_s22  ;;  %p8266_p1 = scmp.lt.s32.totalorder %s8260_s22, %s8260_s22 }
  0x42   :  { %p8267_p2 = por %p8266_p1, %p8265_p0 }
  0x44   :  { %p8268_p3 = pnand %p8267_p2, %p8261_p13 }
  0x46   :  { %8271 = shalt.err (!%p8268_p3)
}
  0x47   :  { %s8426_s6 = smov 448   ;;  %s8427_s21 = smov 28  }
  0x48   :  { %112 = dma.hbm_to_vmem [thread:$0]  %s8807_s8, 57344, %s107_s15, [#allocation15], %s8426_s6, %s8426_s6, %s8427_s21  }
  0x49   :  { %s8428_s25 = smov [#allocation2]   ;;  %s8272_s30 = scalar_lea.hbm %s8799_s0, 128 }
  0x4a   :  { %s26_s26 = sshll.u32 %s8428_s25, 4  ;;  %p8273_p4 = scmp.ne.s32.totalorder %s8799_s0, %s8272_s30  ;;  %s27_s26 = int_to_ptr.vmem [resolvable:$true] %s26_s26 }
  0x4b   :  { %p8276_p5 = scmp.lt.u32.totalorder %s8272_s30, %s8799_s0 }
  0x4d   :  { %p8278_p6 = pnand %p8276_p5, %p8273_p4 }
  0x4f   :  { %8281 = shalt.err (!%p8278_p6)
}
  0x50   :  { %s8282_s13 = scalar_lea.vmem %s27_s26, 128  ;;  %p8287_p8 = scmp.lt.s32.totalorder %s27_s26, %s27_s26 }
  0x51   :  { %p8283_p7 = scmp.ne.s32.totalorder %s27_s26, %s8282_s13  ;;  %p8288_p9 = scmp.lt.s32.totalorder %s8282_s13, %s8282_s13 }
  0x53   :  { %p8289_p10 = por %p8288_p9, %p8287_p8 }
  0x55   :  { %p8290_p11 = pnand %p8289_p10, %p8283_p7 }
  0x57   :  { %8293 = shalt.err (!%p8290_p11)
}
  0x58   :  { %s8429_s8 = smov 64   ;;  %s8430_s15 = smov 4  }
  0x59   :  { %32 = dma.hbm_to_vmem [thread:$0]  %s8799_s0, 128, %s27_s26, [#allocation3], %s8429_s8, %s8429_s8, %s8430_s15  }
  0x5a   :  { %s8431_s2 = smov [#allocation7]   ;;  %s8432_s18 = smov [#allocation10]  }
  0x5b   :  { %s53_s14 = sshll.u32 %s8431_s2, 4  ;;  %s75_s19 = sshll.u32 %s8432_s18, 4  ;;  %s54_s14 = int_to_ptr.vmem [resolvable:$true] %s53_s14  ;;  %s76_s19 = int_to_ptr.vmem [resolvable:$true] %s75_s19 }
  0x5c   :  { %s8294_s6 = scalar_lea.hbm %s8802_s3, 32 }
  0x5d   :  { %p8295_p12 = scmp.ne.s32.totalorder %s8802_s3, %s8294_s6  ;;  %p8298_p13 = scmp.lt.u32.totalorder %s8294_s6, %s8802_s3 }
  0x5f   :  { %p8300_p0 = pnand %p8298_p13, %p8295_p12 }
  0x61   :  { %8303 = shalt.err (!%p8300_p0)
}
  0x62   :  { %s8304_s0 = scalar_lea.vmem %s54_s14, 32  ;;  %p8309_p2 = scmp.lt.s32.totalorder %s54_s14, %s54_s14 }
  0x63   :  { %p8305_p1 = scmp.ne.s32.totalorder %s54_s14, %s8304_s0  ;;  %p8310_p3 = scmp.lt.s32.totalorder %s8304_s0, %s8304_s0 }
  0x65   :  { %p8311_p4 = por %p8310_p3, %p8309_p2 }
  0x67   :  { %p8312_p5 = pnand %p8311_p4, %p8305_p1 }
  0x69   :  { %8315 = shalt.err (!%p8312_p5)
}
  0x6a   :  { %56 = dma.hbm_to_vmem [thread:$0]  %s8802_s3, 32, %s54_s14, [#allocation6]  }
  0x6b   :  { %s8316_s4 = scalar_lea.hbm %s8804_s5, 64 }
  0x6c   :  { %p8317_p6 = scmp.ne.s32.totalorder %s8804_s5, %s8316_s4  ;;  %p8320_p7 = scmp.lt.u32.totalorder %s8316_s4, %s8804_s5 }
  0x6e   :  { %p8322_p8 = pnand %p8320_p7, %p8317_p6 }
  0x70   :  { %8325 = shalt.err (!%p8322_p8)
}
  0x71   :  { %s8326_s8 = scalar_lea.vmem %s76_s19, 64  ;;  %p8331_p10 = scmp.lt.s32.totalorder %s76_s19, %s76_s19 }
  0x72   :  { %p8327_p9 = scmp.ne.s32.totalorder %s76_s19, %s8326_s8  ;;  %p8332_p11 = scmp.lt.s32.totalorder %s8326_s8, %s8326_s8 }
  0x74   :  { %p8333_p12 = por %p8332_p11, %p8331_p10 }
  0x76   :  { %p8334_p13 = pnand %p8333_p12, %p8327_p9 }
  0x78   :  { %8337 = shalt.err (!%p8334_p13)
}
  0x79   :  { %78 = dma.hbm_to_vmem [thread:$0]  %s8804_s5, 64, %s76_s19, [#allocation9]  }
  0x7a   :  { %s8433_s16 = smov [#allocation13]   ;;  %s8434_s2 = smov [#allocation16]  }
  0x7b   :  { %s97_s17 = sshll.u32 %s8433_s16, 4  ;;  %s119_s14 = sshll.u32 %s8434_s2, 4  ;;  %s98_s17 = int_to_ptr.vmem [resolvable:$true] %s97_s17  ;;  %s120_s14 = int_to_ptr.vmem [resolvable:$true] %s119_s14 }
  0x7c   :  { %s8338_s22 = scalar_lea.hbm %s8806_s7, 128 }
  0x7d   :  { %p8339_p0 = scmp.ne.s32.totalorder %s8806_s7, %s8338_s22  ;;  %p8342_p1 = scmp.lt.u32.totalorder %s8338_s22, %s8806_s7 }
  0x7f   :  { %p8344_p2 = pnand %p8342_p1, %p8339_p0 }
  0x81   :  { %8347 = shalt.err (!%p8344_p2)
}
  0x82   :  { %s8348_s5 = scalar_lea.vmem %s98_s17, 128  ;;  %p8353_p4 = scmp.lt.s32.totalorder %s98_s17, %s98_s17 }
  0x83   :  { %p8349_p3 = scmp.ne.s32.totalorder %s98_s17, %s8348_s5  ;;  %p8354_p5 = scmp.lt.s32.totalorder %s8348_s5, %s8348_s5 }
  0x85   :  { %p8355_p6 = por %p8354_p5, %p8353_p4 }
  0x87   :  { %p8356_p7 = pnand %p8355_p6, %p8349_p3 }
  0x89   :  { %8359 = shalt.err (!%p8356_p7)
}
  0x8a   :  { %100 = dma.hbm_to_vmem [thread:$0]  %s8806_s7, 128, %s98_s17, [#allocation12]  }
  0x8b   :  { %s8360_s27 = scalar_lea.hbm %s8808_s9, 112 }
  0x8c   :  { %p8361_p8 = scmp.ne.s32.totalorder %s8808_s9, %s8360_s27  ;;  %p8364_p9 = scmp.lt.u32.totalorder %s8360_s27, %s8808_s9 }
  0x8e   :  { %p8366_p10 = pnand %p8364_p9, %p8361_p8 }
  0x90   :  { %8369 = shalt.err (!%p8366_p10)
}
  0x91   :  { %s8370_s11 = scalar_lea.vmem %s120_s14, 112  ;;  %s8374_s12 = scalar_lea.vmem %s120_s14, 128 }
  0x92   :  { %p8371_p11 = scmp.ne.s32.totalorder %s120_s14, %s8370_s11  ;;  %p8375_p12 = scmp.lt.s32.totalorder %s120_s14, %s120_s14 }
  0x93   :  { %p8376_p13 = scmp.lt.s32.totalorder %s8374_s12, %s8370_s11 }
  0x95   :  { %p8377_p0 = por %p8376_p13, %p8375_p12 }
  0x97   :  { %p8378_p1 = pnand %p8377_p0, %p8371_p11 }
  0x99   :  { %8381 = shalt.err (!%p8378_p1)
}
  0x9a   :  { %122 = dma.hbm_to_vmem [thread:$0]  %s8808_s9, 112, %s120_s14, [#allocation15]  }
  0x9b   :  { %8404 = dma.done.wait [#allocation3], 128  }
  0x9c   :  { %8405 = vsyncadd [#allocation3], 4294967168 }
  0x9d   :  { %8406 = dma.done.wait [#allocation6], 2336  }
  0x9e   :  { %8407 = vsyncadd [#allocation6], 4294964960 }
  0x9f   :  { %8408 = dma.done.wait [#allocation9], 8256  }
  0xa0   :  { %8409 = vsyncadd [#allocation9], 4294959040 }
  0xa1   :  { %8410 = dma.done.wait [#allocation12], 32896  }
  0xa2   :  { %8411 = vsyncadd [#allocation12], 4294934400 }
  0xa3   :  { %8412 = dma.done.wait [#allocation15], 57456  }
  0xa4   :  { %8413 = vsyncadd [#allocation15], 4294909840  ;;  %v8435_v0 = vmov 0   ;;  %v153_v1 = vld [vmem:[%s8800_s1] sm:$0xff]  ;;  %v154_v2 = vld [vmem:[%s8800_s1 + $0x8] sm:$0xff]  ;;  %v155_v22 = vlaneseq  ;;  %v8436_v27 = vmov 0.0  }
  0xa5   :  { %7391 = vset.pattern.permute.xlu0 %v8435_v0  ;;  %v7392_v3 = vld [vmem:[#allocation5 + $0x4] ss:$8 sps:$4 sm:$0xff]   ;;  %v7394_v4 = vld [vmem:[#allocation5] ss:$8 sps:$4 sm:$0xff]   ;;  %v7395_v5 = vld [vmem:[#allocation5 + $0x14] ss:$8 sps:$4 sm:$0xff]  }
  0xa6   :  { %158 = vperm.xlu0 %7391, %v153_v1   ;;  %300 = vmatprep.subr.bf16.mxu0 %v7392_v3  ;;  %v7397_v6 = vld [vmem:[#allocation5 + $0x10] ss:$8 sps:$4 sm:$0xff]   ;;  %v7398_v7 = vld [vmem:[#allocation5 + $0x24] ss:$8 sps:$4 sm:$0xff]   ;;  %v7400_v8 = vld [vmem:[#allocation5 + $0x20] ss:$8 sps:$4 sm:$0xff]  }
  0xa7   :  { %301 = vmatpush1.bf16.msra.mxu0 %v7394_v4  ;;  %v7401_v9 = vld [vmem:[#allocation5 + $0x34] ss:$8 sps:$4 sm:$0xff]   ;;  %v7403_v10 = vld [vmem:[#allocation5 + $0x30] ss:$8 sps:$4 sm:$0xff]   ;;  %v7404_v11 = vld [vmem:[#allocation5 + $0x44] ss:$8 sps:$4 sm:$0xff]  }
  0xa8   :  { %302 = vmatprep.subr.bf16.mxu0 %v7395_v5  ;;  %v7406_v12 = vld [vmem:[#allocation5 + $0x40] ss:$8 sps:$4 sm:$0xff]   ;;  %v7407_v13 = vld [vmem:[#allocation5 + $0x54] ss:$8 sps:$4 sm:$0xff]   ;;  %v7409_v14 = vld [vmem:[#allocation5 + $0x50] ss:$8 sps:$4 sm:$0xff]  }
  0xa9   :  { %v7410_v15 = vld [vmem:[#allocation5 + $0x64] ss:$8 sps:$4 sm:$0xff]   ;;  %v7412_v16 = vld [vmem:[#allocation5 + $0x60] ss:$8 sps:$4 sm:$0xff]   ;;  %v7413_v17 = vld [vmem:[#allocation5 + $0x74] ss:$8 sps:$4 sm:$0xff]  }
  0xaa   :  { %161 = vperm.xlu0 %7391, %v154_v2   ;;  %v7415_v18 = vld [vmem:[#allocation5 + $0x70] ss:$8 sps:$4 sm:$0xff]   ;;  %v7416_v19 = vld [vmem:[#allocation5 + $0x84] ss:$8 sps:$4 sm:$0xff]   ;;  %v7418_v20 = vld [vmem:[#allocation5 + $0x80] ss:$8 sps:$4 sm:$0xff]  }
  0xab   :  { %303 = vmatpush1.bf16.msra.mxu0 %v7397_v6  ;;  %v7422_v21 = vld [vmem:[#allocation8 + $0x4] ss:$16 sps:$4 sm:$0xff]   ;;  %v156_v23 = vand.u32 127, %v155_v22  ;;  %vm296_vm2 = vcmask 130048   ;;  %v7420_v29 = vld [vmem:[#allocation8] ss:$16 sps:$4 sm:$0xff]  }
  0xac   :  { %304 = vmatprep.subr.bf16.mxu0 %v7398_v7  ;;  %v7419_v26 = vld [vmem:[#allocation2] sm:$0xff]   ;;  %v7423_v33 = vld [vmem:[#allocation8 + $0x20] ss:$16 sps:$4 sm:$0xff]   ;;  %s8437_s1 = smov [#allocation17]  }
  0xad   :  { %v7425_v31 = vld [vmem:[#allocation8 + $0x24] ss:$16 sps:$4 sm:$0xff]   ;;  %v7426_v35 = vld [vmem:[#allocation8 + $0x40] ss:$16 sps:$4 sm:$0xff]   ;;  %v7470_v62 = vld [vmem:[#allocation8 + $0xc] ss:$16 sps:$4 sm:$0xff]  }
  0xae   :  { %v7428_v34 = vld [vmem:[#allocation8 + $0x44] ss:$16 sps:$4 sm:$0xff]   ;;  %v7429_v37 = vld [vmem:[#allocation8 + $0x60] ss:$16 sps:$4 sm:$0xff]   ;;  %s6393_s9 = sshll.u32 %s8437_s1, 4  ;;  %s6394_s9 = int_to_ptr.vmem [resolvable:$true] %s6393_s9 }
  0xaf   :  { %305 = vmatpush1.bf16.msra.mxu0 %v7400_v8  ;;  %v7431_v36 = vld [vmem:[#allocation8 + $0x64] ss:$16 sps:$4 sm:$0xff]   ;;  %v7432_v39 = vld [vmem:[#allocation8 + $0x80] ss:$16 sps:$4 sm:$0xff]   ;;  %s8382_s17 = scalar_lea.vmem %s6394_s9, 1792  ;;  %p8387_p3 = scmp.lt.s32.totalorder %s6394_s9, %s6394_s9 }
  0xb0   :  { %306 = vmatprep.subr.bf16.mxu0 %v7401_v9  ;;  %v7434_v38 = vld [vmem:[#allocation8 + $0x84] ss:$16 sps:$4 sm:$0xff]   ;;  %v7435_v41 = vld [vmem:[#allocation8 + $0xa0] ss:$16 sps:$4 sm:$0xff]   ;;  %p8383_p2 = scmp.ne.s32.totalorder %s6394_s9, %s8382_s17  ;;  %p8388_p4 = scmp.lt.s32.totalorder %s8382_s17, %s8382_s17 }
  0xb1   :  { %v7437_v40 = vld [vmem:[#allocation8 + $0xa4] ss:$16 sps:$4 sm:$0xff]   ;;  %v7438_v43 = vld [vmem:[#allocation8 + $0xc0] ss:$16 sps:$4 sm:$0xff]  }
  0xb2   :  { %v7440_v42 = vld [vmem:[#allocation8 + $0xc4] ss:$16 sps:$4 sm:$0xff]   ;;  %v7441_v45 = vld [vmem:[#allocation8 + $0xe0] ss:$16 sps:$4 sm:$0xff]   ;;  %p8389_p5 = por %p8388_p4, %p8387_p3 }
  0xb3   :  { %307 = vmatpush1.bf16.msra.mxu0 %v7403_v10  ;;  %v7443_v44 = vld [vmem:[#allocation8 + $0xe4] ss:$16 sps:$4 sm:$0xff]   ;;  %v7444_v47 = vld [vmem:[#allocation8 + $0x100] ss:$16 sps:$4 sm:$0xff]  }
  0xb4   :  { %308 = vmatprep.subr.bf16.mxu0 %v7404_v11  ;;  %v7446_v46 = vld [vmem:[#allocation8 + $0x104] ss:$16 sps:$4 sm:$0xff]   ;;  %v7447_v49 = vld [vmem:[#allocation8 + $0x120] ss:$16 sps:$4 sm:$0xff]   ;;  %p8390_p6 = pnand %p8389_p5, %p8383_p2 }
  0xb5   :  { %v7449_v48 = vld [vmem:[#allocation8 + $0x124] ss:$16 sps:$4 sm:$0xff]   ;;  %v7450_v51 = vld [vmem:[#allocation8 + $0x140] ss:$16 sps:$4 sm:$0xff]  }
  0xb6   :  { %v7452_v50 = vld [vmem:[#allocation8 + $0x144] ss:$16 sps:$4 sm:$0xff]   ;;  %v7453_v53 = vld [vmem:[#allocation8 + $0x160] ss:$16 sps:$4 sm:$0xff]  }
  0xb7   :  { %309 = vmatpush1.bf16.msra.mxu0 %v7406_v12  ;;  %v7455_v52 = vld [vmem:[#allocation8 + $0x164] ss:$16 sps:$4 sm:$0xff]   ;;  %v7456_v55 = vld [vmem:[#allocation8 + $0x180] ss:$16 sps:$4 sm:$0xff]  }
  0xb8   :  { %310 = vmatprep.subr.bf16.mxu0 %v7407_v13  ;;  %v7458_v54 = vld [vmem:[#allocation8 + $0x184] ss:$16 sps:$4 sm:$0xff]   ;;  %v7459_v57 = vld [vmem:[#allocation8 + $0x1a0] ss:$16 sps:$4 sm:$0xff]  }
  0xb9   :  { %v7461_v56 = vld [vmem:[#allocation8 + $0x1a4] ss:$16 sps:$4 sm:$0xff]   ;;  %v7462_v59 = vld [vmem:[#allocation8 + $0x1c0] ss:$16 sps:$4 sm:$0xff]  }
  0xba   :  { %v7464_v58 = vld [vmem:[#allocation8 + $0x1c4] ss:$16 sps:$4 sm:$0xff]   ;;  %v7465_v61 = vld [vmem:[#allocation8 + $0x1e0] ss:$16 sps:$4 sm:$0xff]  }
  0xbb   :  { %311 = vmatpush1.bf16.msra.mxu0 %v7409_v14  ;;  %v7467_v60 = vld [vmem:[#allocation8 + $0x1e4] ss:$16 sps:$4 sm:$0xff]  }
  0xbc   :  { %312 = vmatprep.subr.bf16.mxu0 %v7410_v15  ;;  %v865_v63 = vld [vmem:[#allocation11] sm:$0xff] }
  0xbd   :  { %v869_v0 = vld [vmem:[#allocation11 + $0x20] sm:$0xff] }
  0xbe   :  { %v6496_v1 = vcombine.high %v865_v63, %v869_v0  ;;  %v6495_v2 = vcombine.low %v865_v63, %v869_v0  ;;  %v873_v3 = vld [vmem:[#allocation11 + $0x40] sm:$0xff] }
  0xbf   :  { %313 = vmatpush1.bf16.msra.mxu0 %v7412_v16  ;;  %v877_v4 = vld [vmem:[#allocation11 + $0x60] sm:$0xff] }
  0xc0   :  { %314 = vmatprep.subr.bf16.mxu0 %v7413_v17  ;;  %v6504_v5 = vcombine.high %v873_v3, %v877_v4  ;;  %2443 = vmatprep.subr.bf16.mxu1 %v6496_v1  ;;  %v6503_v6 = vcombine.low %v873_v3, %v877_v4  ;;  %v881_v7 = vld [vmem:[#allocation11 + $0x80] sm:$0xff] }
  0xc1   :  { %2444 = vmatpush1.bf16.msra.mxu1 %v6495_v2  ;;  %v885_v8 = vld [vmem:[#allocation11 + $0xa0] sm:$0xff] }
  0xc2   :  { %2445 = vmatprep.subr.bf16.mxu1 %v6504_v5  ;;  %v6512_v9 = vcombine.high %v881_v7, %v885_v8  ;;  %v6511_v10 = vcombine.low %v881_v7, %v885_v8  ;;  %v889_v11 = vld [vmem:[#allocation11 + $0xc0] sm:$0xff] }
  0xc3   :  { %315 = vmatpush1.bf16.msra.mxu0 %v7415_v18  ;;  %v893_v12 = vld [vmem:[#allocation11 + $0xe0] sm:$0xff] }
  0xc4   :  { %316 = vmatprep.subr.bf16.mxu0 %v7416_v19  ;;  %v6520_v13 = vcombine.high %v889_v11, %v893_v12  ;;  %v6519_v14 = vcombine.low %v889_v11, %v893_v12  ;;  %v897_v15 = vld [vmem:[#allocation11 + $0x100] sm:$0xff]  ;;  %v7473_v12 = vld [vmem:[#allocation8 + $0x2c] ss:$16 sps:$4 sm:$0xff]  }
  0xc5   :  { %2446 = vmatpush1.bf16.msra.mxu1 %v6503_v6  ;;  %v901_v16 = vld [vmem:[#allocation11 + $0x120] sm:$0xff] }
  0xc6   :  { %2447 = vmatprep.subr.bf16.mxu1 %v6512_v9  ;;  %v6528_v17 = vcombine.high %v897_v15, %v901_v16  ;;  %v6527_v18 = vcombine.low %v897_v15, %v901_v16  ;;  %v905_v19 = vld [vmem:[#allocation11 + $0x140] sm:$0xff]  ;;  %v7479_v16 = vld [vmem:[#allocation8 + $0x6c] ss:$16 sps:$4 sm:$0xff]  }
  0xc7   :  { %317 = vmatpush1.bf16.msra.mxu0 %v7418_v20  ;;  %v909_v20 = vld [vmem:[#allocation11 + $0x160] sm:$0xff] }
  0xc8   :  { %759 = vmatprep.subr.bf16.mxu0 %v7422_v21  ;;  %v6536_v21 = vcombine.high %v905_v19, %v909_v20  ;;  %v7468_v11 = vld [vmem:[#allocation8 + $0x8] ss:$16 sps:$4 sm:$0xff]  }
  0xc9   :  { %2448 = vmatpush1.bf16.msra.mxu1 %v6511_v10  ;;  %v7474_v15 = vld [vmem:[#allocation8 + $0x48] ss:$16 sps:$4 sm:$0xff]  }
  0xca   :  { %2449 = vmatprep.subr.bf16.mxu1 %v6520_v13  ;;  %v7471_v13 = vld [vmem:[#allocation8 + $0x28] ss:$16 sps:$4 sm:$0xff]  }
  0xcd   :  { %2450 = vmatpush1.bf16.msra.mxu1 %v6519_v14  ;;  %v7476_v14 = vld [vmem:[#allocation8 + $0x4c] ss:$16 sps:$4 sm:$0xff]  }
  0xce   :  { %2451 = vmatprep.subr.bf16.mxu1 %v6528_v17  ;;  %v7477_v17 = vld [vmem:[#allocation8 + $0x68] ss:$16 sps:$4 sm:$0xff]  }
  0xd1   :  { %2452 = vmatpush1.bf16.msra.mxu1 %v6527_v18  ;;  %v7482_v18 = vld [vmem:[#allocation8 + $0x8c] ss:$16 sps:$4 sm:$0xff]  }
  0xd2   :  { %2453 = vmatprep.subr.bf16.mxu1 %v6536_v21  ;;  %v7483_v21 = vld [vmem:[#allocation8 + $0xa8] ss:$16 sps:$4 sm:$0xff]  }
 0x125   :  { %v159_v24 = vpop.permute.xlu0 %158 }
 0x126   :  { %vm163_vm0 = vcmp.eq.s32.totalorder %v159_v24, %v156_v23  ;;  %v913_v24 = vld [vmem:[#allocation11 + $0x180] sm:$0xff] }
 0x127   :  { %v6409_v28 = vsel %vm163_vm0, 1.0, %v8436_v27 }
 0x129   :  { %v162_v25 = vpop.permute.xlu0 %161 }
 0x12a   :  { %vm164_vm1 = vcmp.eq.s32.totalorder %v162_v25, %v156_v23  ;;  %v6535_v23 = vcombine.low %v905_v19, %v909_v20  ;;  %v917_v25 = vld [vmem:[#allocation11 + $0x1a0] sm:$0xff]  ;;  %v7485_v20 = vld [vmem:[#allocation8 + $0xac] ss:$16 sps:$4 sm:$0xff]  }
 0x12b   :  { %v6410_v30 = vsel %vm164_vm1, 1.0, %v8436_v27  ;;  %v6543_v27 = vcombine.low %v913_v24, %v917_v25  ;;  %v7480_v19 = vld [vmem:[#allocation8 + $0x88] ss:$16 sps:$4 sm:$0xff]  }
 0x12c   :  { %v169_v32 = vpack.c.bf16 %v6410_v30, %v6409_v28  ;;  %2454 = vmatpush1.bf16.msra.mxu1 %v6535_v23  ;;  %v921_v28 = vld [vmem:[#allocation11 + $0x1c0] sm:$0xff]  ;;  %v7488_v23 = vld [vmem:[#allocation8 + $0xcc] ss:$16 sps:$4 sm:$0xff]  }
 0x12e   :  { %6430 = vmatprep.mubr.msk.bf16.mxu0 %vm296_vm2, %v169_v32  ;;  %v929_v32 = vld [vmem:[#allocation11 + $0x200] sm:$0xff] }
 0x12f   :  { %333 = vmatmul.mubr.bf16.vlgmr.msra.gmra.mrb[0].mxu0 %v7419_v26  ;;  %v6544_v26 = vcombine.high %v913_v24, %v917_v25  ;;  %v7486_v24 = vld [vmem:[#allocation8 + $0xc8] ss:$16 sps:$4 sm:$0xff]   ;;  %v7491_v25 = vld [vmem:[#allocation8 + $0xec] ss:$16 sps:$4 sm:$0xff]  }
 0x130   :  { %760 = vmatpush1.bf16.msra.mxu0 %v7420_v29  ;;  %v925_v29 = vld [vmem:[#allocation11 + $0x1e0] sm:$0xff] }
 0x131   :  { %761 = vmatprep.subr.bf16.mxu0 %v7425_v31  ;;  %2455 = vmatprep.subr.bf16.mxu1 %v6544_v26  ;;  %v6552_v30 = vcombine.high %v921_v28, %v925_v29  ;;  %v6551_v31 = vcombine.low %v921_v28, %v925_v29  ;;  %v7489_v26 = vld [vmem:[#allocation8 + $0xe8] ss:$16 sps:$4 sm:$0xff]   ;;  %v7497_v29 = vld [vmem:[#allocation8 + $0x12c] ss:$16 sps:$4 sm:$0xff]  }
 0x132   :  { %2456 = vmatpush1.bf16.msra.mxu1 %v6543_v27  ;;  %v7494_v27 = vld [vmem:[#allocation8 + $0x10c] ss:$16 sps:$4 sm:$0xff]   ;;  %v7492_v28 = vld [vmem:[#allocation8 + $0x108] ss:$16 sps:$4 sm:$0xff]  }
 0x133   :  { %2457 = vmatprep.subr.bf16.mxu1 %v6552_v30  ;;  %v7495_v30 = vld [vmem:[#allocation8 + $0x128] ss:$16 sps:$4 sm:$0xff]  }
 0x134   :  { %762 = vmatpush1.bf16.msra.mxu0 %v7423_v33  ;;  %v933_v33 = vld [vmem:[#allocation11 + $0x220] sm:$0xff] }
 0x135   :  { %763 = vmatprep.subr.bf16.mxu0 %v7428_v34  ;;  %v6560_v34 = vcombine.high %v929_v32, %v933_v33 }
 0x136   :  { %2458 = vmatpush1.bf16.msra.mxu1 %v6551_v31  ;;  %v7500_v31 = vld [vmem:[#allocation8 + $0x14c] ss:$16 sps:$4 sm:$0xff]  }
 0x137   :  { %2459 = vmatprep.subr.bf16.mxu1 %v6560_v34  ;;  %v7501_v34 = vld [vmem:[#allocation8 + $0x168] ss:$16 sps:$4 sm:$0xff]  }
 0x138   :  { %764 = vmatpush1.bf16.msra.mxu0 %v7426_v35  ;;  %v6559_v35 = vcombine.low %v929_v32, %v933_v33  ;;  %v7498_v32 = vld [vmem:[#allocation8 + $0x148] ss:$16 sps:$4 sm:$0xff]   ;;  %v7503_v33 = vld [vmem:[#allocation8 + $0x16c] ss:$16 sps:$4 sm:$0xff]  }
 0x139   :  { %765 = vmatprep.subr.bf16.mxu0 %v7431_v36  ;;  %v937_v36 = vld [vmem:[#allocation11 + $0x240] sm:$0xff] }
 0x13a   :  { %2460 = vmatpush1.bf16.msra.mxu1 %v6559_v35  ;;  %v7506_v35 = vld [vmem:[#allocation8 + $0x18c] ss:$16 sps:$4 sm:$0xff]  }
 0x13c   :  { %766 = vmatpush1.bf16.msra.mxu0 %v7429_v37  ;;  %v941_v37 = vld [vmem:[#allocation11 + $0x260] sm:$0xff] }
 0x13d   :  { %767 = vmatprep.subr.bf16.mxu0 %v7434_v38  ;;  %v6568_v38 = vcombine.high %v937_v36, %v941_v37 }
 0x13f   :  { %2461 = vmatprep.subr.bf16.mxu1 %v6568_v38  ;;  %v7507_v38 = vld [vmem:[#allocation8 + $0x1a8] ss:$16 sps:$4 sm:$0xff]  }
 0x140   :  { %768 = vmatpush1.bf16.msra.mxu0 %v7432_v39  ;;  %v6567_v39 = vcombine.low %v937_v36, %v941_v37  ;;  %v7504_v36 = vld [vmem:[#allocation8 + $0x188] ss:$16 sps:$4 sm:$0xff]   ;;  %v7509_v37 = vld [vmem:[#allocation8 + $0x1ac] ss:$16 sps:$4 sm:$0xff]  }
 0x141   :  { %769 = vmatprep.subr.bf16.mxu0 %v7437_v40  ;;  %v945_v40 = vld [vmem:[#allocation11 + $0x280] sm:$0xff] }
 0x142   :  { %2462 = vmatpush1.bf16.msra.mxu1 %v6567_v39  ;;  %v7512_v39 = vld [vmem:[#allocation8 + $0x1cc] ss:$16 sps:$4 sm:$0xff]  }
 0x144   :  { %770 = vmatpush1.bf16.msra.mxu0 %v7435_v41  ;;  %v949_v41 = vld [vmem:[#allocation11 + $0x2a0] sm:$0xff] }
 0x145   :  { %771 = vmatprep.subr.bf16.mxu0 %v7440_v42  ;;  %v6576_v42 = vcombine.high %v945_v40, %v949_v41 }
 0x147   :  { %2463 = vmatprep.subr.bf16.mxu1 %v6576_v42  ;;  %v866_v42 = vld [vmem:[#allocation11 + $0x8] sm:$0xff] }
 0x148   :  { %772 = vmatpush1.bf16.msra.mxu0 %v7438_v43  ;;  %v8612_v43 = vshrl.u32 %v155_v22, 7 }
 0x149   :  { %773 = vmatprep.subr.bf16.mxu0 %v7443_v44  ;;  %v6575_v44 = vcombine.low %v945_v40, %v949_v41  ;;  %v7510_v40 = vld [vmem:[#allocation8 + $0x1c8] ss:$16 sps:$4 sm:$0xff]   ;;  %v7515_v41 = vld [vmem:[#allocation8 + $0x1ec] ss:$16 sps:$4 sm:$0xff]  }
 0x14b   :  { %2464 = vmatpush1.bf16.msra.mxu1 %v6575_v44  ;;  %v870_v44 = vld [vmem:[#allocation11 + $0x28] sm:$0xff] }
 0x14c   :  { %774 = vmatpush1.bf16.msra.mxu0 %v7441_v45  ;;  %v953_v45 = vld [vmem:[#allocation11 + $0x2c0] sm:$0xff] }
 0x14d   :  { %775 = vmatprep.subr.bf16.mxu0 %v7446_v46  ;;  %v957_v46 = vld [vmem:[#allocation11 + $0x2e0] sm:$0xff] }
 0x150   :  { %776 = vmatpush1.bf16.msra.mxu0 %v7444_v47  ;;  %v6584_v47 = vcombine.high %v953_v45, %v957_v46 }
 0x151   :  { %777 = vmatprep.subr.bf16.mxu0 %v7449_v48  ;;  %v8615_v48 = vsub.s32 0, %v8612_v43 }
 0x152   :  { %2465 = vmatprep.subr.bf16.mxu1 %v6584_v47  ;;  %v874_v47 = vld [vmem:[#allocation11 + $0x48] sm:$0xff] }
 0x154   :  { %778 = vmatpush1.bf16.msra.mxu0 %v7447_v49  ;;  %v6583_v49 = vcombine.low %v953_v45, %v957_v46  ;;  %v7513_v45 = vld [vmem:[#allocation8 + $0x1e8] ss:$16 sps:$4 sm:$0xff]   ;;  %v6498_v46 = vcombine.high %v866_v42, %v870_v44 }
 0x155   :  { %779 = vmatprep.subr.bf16.mxu0 %v7452_v50  ;;  %v194_v50 = vld [vmem:[#allocation7] sm:$0x3] }
 0x156   :  { %2466 = vmatpush1.bf16.msra.mxu1 %v6583_v49  ;;  %v878_v49 = vld [vmem:[#allocation11 + $0x68] sm:$0xff] }
 0x158   :  { %780 = vmatpush1.bf16.msra.mxu0 %v7450_v51  ;;  %v8618_v51 = vsub.s32 1, %v8612_v43 }
 0x159   :  { %781 = vmatprep.subr.bf16.mxu0 %v7455_v52  ;;  %v961_v52 = vld [vmem:[#allocation11 + $0x300] sm:$0xff] }
 0x15c   :  { %782 = vmatpush1.bf16.msra.mxu0 %v7453_v53  ;;  %v965_v53 = vld [vmem:[#allocation11 + $0x320] sm:$0xff] }
 0x15d   :  { %783 = vmatprep.subr.bf16.mxu0 %v7458_v54  ;;  %v6592_v22 = vcombine.high %v961_v52, %v965_v53  ;;  %v199_v54 = vrot.slane %v194_v50, %v8615_v48 }
 0x15f   :  { %2467 = vmatprep.subr.bf16.mxu1 %v6592_v22  ;;  %v886_v22 = vld [vmem:[#allocation11 + $0xa8] sm:$0xff] }
 0x160   :  { %784 = vmatpush1.bf16.msra.mxu0 %v7456_v55  ;;  %v6591_v55 = vcombine.low %v961_v52, %v965_v53  ;;  %v6506_v52 = vcombine.high %v874_v47, %v878_v49  ;;  %v882_v53 = vld [vmem:[#allocation11 + $0x88] sm:$0xff] }
 0x161   :  { %785 = vmatprep.subr.bf16.mxu0 %v7461_v56  ;;  %v203_v56 = vrot.slane %v194_v50, %v8618_v51  ;;  %v6497_v50 = vcombine.low %v866_v42, %v870_v44 }
 0x162   :  { %2468 = vmatpush1.bf16.msra.mxu1 %v6591_v55  ;;  %v6514_v55 = vcombine.high %v882_v53, %v886_v22 }
 0x164   :  { %786 = vmatpush1.bf16.msra.mxu0 %v7459_v57 }
 0x165   :  { %787 = vmatprep.subr.bf16.mxu0 %v7464_v58 }
 0x168   :  { %788 = vmatpush1.bf16.msra.mxu0 %v7462_v59 }
 0x169   :  { %789 = vmatprep.subr.bf16.mxu0 %v7467_v60 }
 0x16c   :  { %790 = vmatpush1.bf16.msra.mxu0 %v7465_v61 }
 0x16d   :  { %802 = vmatprep.subr.bf16.mxu0 %v7470_v62 }
 0x202   :  { %v334_v57 = vpop.f32.mrb[0].mxu0 }
 0x203   :  { %v335_v58 = vadd.f32 %v334_v57, %v199_v54  ;;  %v336_v59 = vpop.f32.mrb[1].mxu0  ;;  %v894_v57 = vld [vmem:[#allocation11 + $0xe8] sm:$0xff] }
 0x204   :  { %v337_v60 = vadd.f32 %v336_v59, %v203_v56  ;;  %v338_v61 = vpop.f32.mrb[2].mxu0 }
 0x205   :  { %v343_v62 = vmul.f32 0.2, %v335_v58  ;;  %v339_v63 = vadd.f32 %v338_v61, %v199_v54  ;;  %v340_v0 = vpop.f32.mrb[3].mxu0  ;;  %v6505_v54 = vcombine.low %v874_v47, %v878_v49  ;;  %v902_v61 = vld [vmem:[#allocation11 + $0x128] sm:$0xff] }
 0x206   :  { %v344_v1 = vmul.f32 0.2, %v337_v60  ;;  %v341_v2 = vadd.f32 %v340_v0, %v203_v56  ;;  %v890_v56 = vld [vmem:[#allocation11 + $0xc8] sm:$0xff] }
 0x207   :  { %v345_v3 = vmul.f32 0.2, %v339_v63  ;;  %v347_v5 = vmax.f32 %v335_v58, %v343_v62  ;;  %v6513_v58 = vcombine.low %v882_v53, %v886_v22  ;;  %v6522_v59 = vcombine.high %v890_v56, %v894_v57  ;;  %v906_v0 = vld [vmem:[#allocation11 + $0x148] sm:$0xff] }
 0x208   :  { %v346_v4 = vmul.f32 0.2, %v341_v2  ;;  %v348_v7 = vmax.f32 %v337_v60, %v344_v1  ;;  %v898_v60 = vld [vmem:[#allocation11 + $0x108] sm:$0xff]  ;;  %v6521_v62 = vcombine.low %v890_v56, %v894_v57 }
 0x209   :  { %v349_v6 = vmax.f32 %v339_v63, %v345_v3  ;;  %v6530_v63 = vcombine.high %v898_v60, %v902_v61  ;;  %v910_v1 = vld [vmem:[#allocation11 + $0x168] sm:$0xff] }
 0x20a   :  { %v350_v8 = vmax.f32 %v341_v2, %v346_v4  ;;  %v6529_v2 = vcombine.low %v898_v60, %v902_v61  ;;  %v6538_v3 = vcombine.high %v906_v0, %v910_v1  ;;  %v914_v4 = vld [vmem:[#allocation11 + $0x188] sm:$0xff] }
 0x20b   :  { %v8622_v9 = vpack.c.bf16 %v349_v6, %v347_v5  ;;  %v918_v5 = vld [vmem:[#allocation11 + $0x1a8] sm:$0xff]  ;;  %v6537_v6 = vcombine.low %v906_v0, %v910_v1 }
 0x20c   :  { %v352_v10 = vpack.c.bf16 %v350_v8, %v348_v7  ;;  %v969_v7 = vld [vmem:[#allocation11 + $0x340] sm:$0xff] }
 0x20d   :  { %v973_v8 = vld [vmem:[#allocation11 + $0x360] sm:$0xff] }
 0x20e   :  { %791 = vmatprep.mubr.bf16.mxu0 %v352_v10 }
 0x20f   :  { %792 = vmatmul.mubr.bf16.vlgmr.msra.gmra.mrb[4].mxu0 %v8622_v9 }
 0x210   :  { %803 = vmatpush1.bf16.msra.mxu0 %v7468_v11  ;;  %834 = vmatprep.mubr.bf16.mxu0 %v352_v10  ;;  %v6600_v10 = vcombine.high %v969_v7, %v973_v8  ;;  %v922_v11 = vld [vmem:[#allocation11 + $0x1c8] sm:$0xff] }
 0x211   :  { %804 = vmatprep.subr.bf16.mxu0 %v7473_v12  ;;  %v926_v12 = vld [vmem:[#allocation11 + $0x1e8] sm:$0xff] }
 0x212   :  { %2469 = vmatprep.subr.bf16.mxu1 %v6600_v10 }
 0x214   :  { %805 = vmatpush1.bf16.msra.mxu0 %v7471_v13  ;;  %v6599_v13 = vcombine.low %v969_v7, %v973_v8 }
 0x215   :  { %806 = vmatprep.subr.bf16.mxu0 %v7476_v14  ;;  %v6545_v14 = vcombine.low %v914_v4, %v918_v5 }
 0x216   :  { %2470 = vmatpush1.bf16.msra.mxu1 %v6599_v13 }
 0x218   :  { %807 = vmatpush1.bf16.msra.mxu0 %v7474_v15  ;;  %v977_v15 = vld [vmem:[#allocation11 + $0x380] sm:$0xff] }
 0x219   :  { %808 = vmatprep.subr.bf16.mxu0 %v7479_v16  ;;  %v981_v16 = vld [vmem:[#allocation11 + $0x3a0] sm:$0xff] }
 0x21c   :  { %809 = vmatpush1.bf16.msra.mxu0 %v7477_v17  ;;  %v6554_v17 = vcombine.high %v922_v11, %v926_v12 }
 0x21d   :  { %810 = vmatprep.subr.bf16.mxu0 %v7482_v18  ;;  %v6608_v18 = vcombine.high %v977_v15, %v981_v16 }
 0x21f   :  { %2471 = vmatprep.subr.bf16.mxu1 %v6608_v18 }
 0x220   :  { %811 = vmatpush1.bf16.msra.mxu0 %v7480_v19  ;;  %v930_v19 = vld [vmem:[#allocation11 + $0x208] sm:$0xff] }
 0x221   :  { %812 = vmatprep.subr.bf16.mxu0 %v7485_v20  ;;  %v934_v20 = vld [vmem:[#allocation11 + $0x228] sm:$0xff] }
 0x224   :  { %813 = vmatpush1.bf16.msra.mxu0 %v7483_v21  ;;  %v6607_v21 = vcombine.low %v977_v15, %v981_v16 }
 0x225   :  { %814 = vmatprep.subr.bf16.mxu0 %v7488_v23  ;;  %v6553_v23 = vcombine.low %v922_v11, %v926_v12 }
 0x226   :  { %2472 = vmatpush1.bf16.msra.mxu1 %v6607_v21  ;;  %v1001_v21 = vld [vmem:[#allocation11 + $0x440] sm:$0xff] }
 0x228   :  { %815 = vmatpush1.bf16.msra.mxu0 %v7486_v24  ;;  %v985_v24 = vld [vmem:[#allocation11 + $0x3c0] sm:$0xff] }
 0x229   :  { %816 = vmatprep.subr.bf16.mxu0 %v7491_v25  ;;  %v989_v25 = vld [vmem:[#allocation11 + $0x3e0] sm:$0xff] }
 0x22c   :  { %817 = vmatpush1.bf16.msra.mxu0 %v7489_v26  ;;  %v6562_v26 = vcombine.high %v930_v19, %v934_v20 }
 0x22d   :  { %818 = vmatprep.subr.bf16.mxu0 %v7494_v27  ;;  %v6616_v27 = vcombine.high %v985_v24, %v989_v25 }
 0x22f   :  { %2473 = vmatprep.subr.bf16.mxu1 %v6616_v27  ;;  %v1006_v27 = vld [vmem:[#allocation11 + $0x468] sm:$0xff] }
 0x230   :  { %819 = vmatpush1.bf16.msra.mxu0 %v7492_v28  ;;  %v938_v28 = vld [vmem:[#allocation11 + $0x248] sm:$0xff] }
 0x231   :  { %820 = vmatprep.subr.bf16.mxu0 %v7497_v29  ;;  %v942_v29 = vld [vmem:[#allocation11 + $0x268] sm:$0xff] }
 0x232   :  { %v6569_v42 = vcombine.low %v938_v28, %v942_v29 }
 0x234   :  { %821 = vmatpush1.bf16.msra.mxu0 %v7495_v30  ;;  %v6615_v30 = vcombine.low %v985_v24, %v989_v25  ;;  %v1005_v25 = vld [vmem:[#allocation11 + $0x460] sm:$0xff] }
 0x235   :  { %822 = vmatprep.subr.bf16.mxu0 %v7500_v31  ;;  %v6561_v31 = vcombine.low %v930_v19, %v934_v20 }
 0x236   :  { %2474 = vmatpush1.bf16.msra.mxu1 %v6615_v30  ;;  %v6632_v30 = vcombine.high %v1001_v21, %v1005_v25 }
 0x238   :  { %823 = vmatpush1.bf16.msra.mxu0 %v7498_v32  ;;  %v8626_v32 = vld [vmem:[#allocation11 + $0x400] sm:$0xff] }
 0x239   :  { %824 = vmatprep.subr.bf16.mxu0 %v7503_v33  ;;  %v8628_v33 = vld [vmem:[#allocation11 + $0x420] sm:$0xff] }
 0x23c   :  { %825 = vmatpush1.bf16.msra.mxu0 %v7501_v34  ;;  %v8630_v34 = vld [vmem:[#allocation11 + $0x408] sm:$0xff] }
 0x23d   :  { %826 = vmatprep.subr.bf16.mxu0 %v7506_v35  ;;  %v6570_v35 = vcombine.high %v938_v28, %v942_v29 }
 0x240   :  { %827 = vmatpush1.bf16.msra.mxu0 %v7504_v36  ;;  %v6624_v36 = vcombine.high %v8626_v32, %v8628_v33 }
 0x241   :  { %828 = vmatprep.subr.bf16.mxu0 %v7509_v37  ;;  %v8634_v37 = vld [vmem:[#allocation11 + $0x428] sm:$0xff] }
 0x242   :  { %2486 = vmatprep.subr.bf16.mxu1 %v6624_v36  ;;  %v1013_v36 = vld [vmem:[#allocation11 + $0x4a0] sm:$0xff] }
 0x244   :  { %829 = vmatpush1.bf16.msra.mxu0 %v7507_v38  ;;  %v946_v38 = vld [vmem:[#allocation11 + $0x288] sm:$0xff] }
 0x245   :  { %830 = vmatprep.subr.bf16.mxu0 %v7512_v39  ;;  %v950_v39 = vld [vmem:[#allocation11 + $0x2a8] sm:$0xff] }
 0x246   :  { %v6578_v44 = vcombine.high %v946_v38, %v950_v39  ;;  %v6577_v47 = vcombine.low %v946_v38, %v950_v39  ;;  %v1010_v38 = vld [vmem:[#allocation11 + $0x488] sm:$0xff] }
 0x247   :  { %v1014_v39 = vld [vmem:[#allocation11 + $0x4a8] sm:$0xff] }
 0x248   :  { %831 = vmatpush1.bf16.msra.mxu0 %v7510_v40  ;;  %v6623_v40 = vcombine.low %v8626_v32, %v8628_v33 }
 0x249   :  { %832 = vmatprep.subr.bf16.mxu0 %v7515_v41  ;;  %v6625_v41 = vcombine.low %v8630_v34, %v8634_v37 }
 0x24c   :  { %833 = vmatpush1.bf16.msra.mxu0 %v7513_v45  ;;  %v954_v45 = vld [vmem:[#allocation11 + $0x2c8] sm:$0xff] }
 0x24d   :  { %2529 = vmatprep.subr.bf16.mxu0 %v6498_v46  ;;  %v958_v46 = vld [vmem:[#allocation11 + $0x2e8] sm:$0xff] }
 0x24e   :  { %v6586_v49 = vcombine.high %v954_v45, %v958_v46  ;;  %v6585_v53 = vcombine.low %v954_v45, %v958_v46  ;;  %v6642_v46 = vcombine.high %v1010_v38, %v1014_v39 }
 0x24f   :  { %835 = vmatmul.mubr.bf16.vlgmr.msra.gmra.mrb[8].mxu0 %v8622_v9  ;;  %v6546_v9 = vcombine.high %v914_v4, %v918_v5  ;;  %v8642_v4 = vld [vmem:[#allocation10] sm:$0xf] }
 0x250   :  { %2530 = vmatpush1.bf16.msra.mxu0 %v6497_v50  ;;  %v962_v50 = vld [vmem:[#allocation11 + $0x308] sm:$0xff]  ;;  %v422_v5 = vrot.slane %v8642_v4, %v8615_v48 }
 0x251   :  { %2531 = vmatprep.subr.bf16.mxu0 %v6506_v52  ;;  %v966_v52 = vld [vmem:[#allocation11 + $0x328] sm:$0xff] }
 0x252   :  { %v6594_v22 = vcombine.high %v962_v50, %v966_v52  ;;  %v6593_v56 = vcombine.low %v962_v50, %v966_v52  ;;  %v1018_v50 = vld [vmem:[#allocation11 + $0x4c8] sm:$0xff] }
 0x253   :  { %v1022_v52 = vld [vmem:[#allocation11 + $0x4e8] sm:$0xff] }
 0x254   :  { %2532 = vmatpush1.bf16.msra.mxu0 %v6505_v54  ;;  %v970_v54 = vld [vmem:[#allocation11 + $0x348] sm:$0xff]  ;;  %v6650_v33 = vcombine.high %v1018_v50, %v1022_v52 }
 0x255   :  { %2533 = vmatprep.subr.bf16.mxu0 %v6514_v55  ;;  %v974_v55 = vld [vmem:[#allocation11 + $0x368] sm:$0xff] }
 0x256   :  { %v6602_v57 = vcombine.high %v970_v54, %v974_v55  ;;  %v6601_v60 = vcombine.low %v970_v54, %v974_v55  ;;  %v6649_v55 = vcombine.low %v1018_v50, %v1022_v52 }
 0x258   :  { %2534 = vmatpush1.bf16.msra.mxu0 %v6513_v58  ;;  %v978_v58 = vld [vmem:[#allocation11 + $0x388] sm:$0xff] }
 0x259   :  { %2535 = vmatprep.subr.bf16.mxu0 %v6522_v59  ;;  %v982_v59 = vld [vmem:[#allocation11 + $0x3a8] sm:$0xff] }
 0x25a   :  { %v6610_v61 = vcombine.high %v978_v58, %v982_v59  ;;  %v6609_v0 = vcombine.low %v978_v58, %v982_v59  ;;  %v1033_v58 = vld [vmem:[#allocation11 + $0x540] sm:$0xff] }
 0x25b   :  { %v1037_v59 = vld [vmem:[#allocation11 + $0x560] sm:$0xff] }
 0x25c   :  { %2536 = vmatpush1.bf16.msra.mxu0 %v6521_v62  ;;  %v986_v62 = vld [vmem:[#allocation11 + $0x3c8] sm:$0xff] }
 0x25d   :  { %2537 = vmatprep.subr.bf16.mxu0 %v6530_v63  ;;  %v990_v63 = vld [vmem:[#allocation11 + $0x3e8] sm:$0xff] }
 0x25e   :  { %v6618_v1 = vcombine.high %v986_v62, %v990_v63 }
 0x260   :  { %2538 = vmatpush1.bf16.msra.mxu0 %v6529_v2  ;;  %v6617_v2 = vcombine.low %v986_v62, %v990_v63 }
 0x261   :  { %2539 = vmatprep.subr.bf16.mxu0 %v6538_v3  ;;  %v6626_v3 = vcombine.high %v8630_v34, %v8634_v37  ;;  %v1025_v34 = vld [vmem:[#allocation11 + $0x500] sm:$0xff] }
 0x262   :  { %v1029_v37 = vld [vmem:[#allocation11 + $0x520] sm:$0xff] }
 0x263   :  { %v6655_v62 = vcombine.low %v1025_v34, %v1029_v37 }
 0x264   :  { %2540 = vmatpush1.bf16.msra.mxu0 %v6537_v6  ;;  %v426_v6 = vrot.slane %v8642_v4, %v8618_v51 }
 0x265   :  { %2541 = vmatprep.subr.bf16.mxu0 %v6546_v9 }
 0x268   :  { %2542 = vmatpush1.bf16.msra.mxu0 %v6545_v14 }
 0x269   :  { %2543 = vmatprep.subr.bf16.mxu0 %v6554_v17 }
 0x26c   :  { %2544 = vmatpush1.bf16.msra.mxu0 %v6553_v23 }
 0x26d   :  { %2545 = vmatprep.subr.bf16.mxu0 %v6562_v26  ;;  %v1002_v26 = vld [vmem:[#allocation11 + $0x448] sm:$0xff] }
 0x270   :  { %2546 = vmatpush1.bf16.msra.mxu0 %v6561_v31  ;;  %v6634_v31 = vcombine.high %v1002_v26, %v1006_v27 }
 0x271   :  { %2547 = vmatprep.subr.bf16.mxu0 %v6570_v35  ;;  %v1009_v35 = vld [vmem:[#allocation11 + $0x480] sm:$0xff] }
 0x272   :  { %v6640_v45 = vcombine.high %v1009_v35, %v1013_v36 }
 0x274   :  { %2548 = vmatpush1.bf16.msra.mxu0 %v6569_v42  ;;  %v6631_v42 = vcombine.low %v1001_v21, %v1005_v25  ;;  %v1058_v21 = vld [vmem:[#allocation11 + $0x608] sm:$0xff] }
 0x275   :  { %2549 = vmatprep.subr.bf16.mxu0 %v6578_v44  ;;  %v6633_v44 = vcombine.low %v1002_v26, %v1006_v27 }
 0x278   :  { %2550 = vmatpush1.bf16.msra.mxu0 %v6577_v47  ;;  %v1017_v47 = vld [vmem:[#allocation11 + $0x4c0] sm:$0xff] }
 0x279   :  { %2551 = vmatprep.subr.bf16.mxu0 %v6586_v49  ;;  %v1021_v49 = vld [vmem:[#allocation11 + $0x4e0] sm:$0xff] }
 0x27a   :  { %v6648_v32 = vcombine.high %v1017_v47, %v1021_v49  ;;  %v6647_v54 = vcombine.low %v1017_v47, %v1021_v49  ;;  %v1074_v47 = vld [vmem:[#allocation11 + $0x688] sm:$0xff] }
 0x27b   :  { %v1078_v49 = vld [vmem:[#allocation11 + $0x6a8] sm:$0xff] }
 0x27c   :  { %2552 = vmatpush1.bf16.msra.mxu0 %v6585_v53  ;;  %v6639_v53 = vcombine.low %v1009_v35, %v1013_v36  ;;  %v1066_v35 = vld [vmem:[#allocation11 + $0x648] sm:$0xff] }
 0x27d   :  { %2553 = vmatprep.subr.bf16.mxu0 %v6594_v22  ;;  %v6641_v22 = vcombine.low %v1010_v38, %v1014_v39  ;;  %v1070_v36 = vld [vmem:[#allocation11 + $0x668] sm:$0xff] }
 0x27e   :  { %v6697_v52 = vcombine.low %v1066_v35, %v1070_v36 }
 0x280   :  { %2554 = vmatpush1.bf16.msra.mxu0 %v6593_v56  ;;  %v6656_v56 = vcombine.high %v1025_v34, %v1029_v37  ;;  %v1082_v34 = vld [vmem:[#allocation11 + $0x6c8] sm:$0xff] }
 0x281   :  { %2555 = vmatprep.subr.bf16.mxu0 %v6602_v57  ;;  %v1086_v37 = vld [vmem:[#allocation11 + $0x6e8] sm:$0xff] }
 0x284   :  { %2556 = vmatpush1.bf16.msra.mxu0 %v6601_v60  ;;  %v1034_v60 = vld [vmem:[#allocation11 + $0x548] sm:$0xff] }
 0x285   :  { %2557 = vmatprep.subr.bf16.mxu0 %v6610_v61  ;;  %v1038_v61 = vld [vmem:[#allocation11 + $0x568] sm:$0xff] }
 0x288   :  { %2558 = vmatpush1.bf16.msra.mxu0 %v6609_v0  ;;  %v6664_v0 = vcombine.high %v1033_v58, %v1037_v59 }
 0x289   :  { %2559 = vmatprep.subr.bf16.mxu0 %v6618_v1  ;;  %v6666_v1 = vcombine.high %v1034_v60, %v1038_v61 }
 0x28c   :  { %2560 = vmatpush1.bf16.msra.mxu0 %v6617_v2  ;;  %v1041_v2 = vld [vmem:[#allocation11 + $0x580] sm:$0xff] }
 0x28d   :  { %2572 = vmatprep.subr.bf16.mxu0 %v6626_v3  ;;  %v1045_v3 = vld [vmem:[#allocation11 + $0x5a0] sm:$0xff] }
 0x2e2   :  { %v793_v7 = vpop.f32.mrb[4].mxu0 }
 0x2e3   :  { %v794_v8 = vadd.f32 %v793_v7, %v422_v5  ;;  %v795_v9 = vpop.f32.mrb[5].mxu0  ;;  %v6663_v7 = vcombine.low %v1033_v58, %v1037_v59  ;;  %v1090_v58 = vld [vmem:[#allocation11 + $0x708] sm:$0xff] }
 0x2e4   :  { %v796_v10 = vadd.f32 %v795_v9, %v426_v6  ;;  %v797_v11 = vpop.f32.mrb[6].mxu0  ;;  %v6672_v9 = vcombine.high %v1041_v2, %v1045_v3  ;;  %v1094_v59 = vld [vmem:[#allocation11 + $0x728] sm:$0xff] }
 0x2e5   :  { %v845_v12 = vmul.f32 0.2, %v794_v8  ;;  %v798_v13 = vadd.f32 %v797_v11, %v422_v5  ;;  %v799_v14 = vpop.f32.mrb[7].mxu0  ;;  %v1042_v5 = vld [vmem:[#allocation11 + $0x588] sm:$0xff]  ;;  %v1049_v11 = vld [vmem:[#allocation11 + $0x5c0] sm:$0xff] }
 0x2e6   :  { %v846_v15 = vmul.f32 0.2, %v796_v10  ;;  %v800_v16 = vadd.f32 %v799_v14, %v426_v6  ;;  %v1046_v6 = vld [vmem:[#allocation11 + $0x5a8] sm:$0xff] }
 0x2e7   :  { %v849_v17 = vmul.f32 0.2, %v798_v13  ;;  %v853_v19 = vmax.f32 %v794_v8, %v845_v12  ;;  %v6665_v8 = vcombine.low %v1034_v60, %v1038_v61  ;;  %v1053_v12 = vld [vmem:[#allocation11 + $0x5e0] sm:$0xff]  ;;  %v1054_v14 = vld [vmem:[#allocation11 + $0x5e8] sm:$0xff]  ;;  %v6713_v61 = vcombine.low %v1082_v34, %v1086_v37 }
 0x2e8   :  { %v850_v18 = vmul.f32 0.2, %v800_v16  ;;  %v854_v23 = vmax.f32 %v796_v10, %v846_v15  ;;  %v6674_v10 = vcombine.high %v1042_v5, %v1046_v6  ;;  %v6671_v15 = vcombine.low %v1041_v2, %v1045_v3  ;;  %v1098_v2 = vld [vmem:[#allocation11 + $0x748] sm:$0xff] }
 0x2e9   :  { %v857_v20 = vmax.f32 %v798_v13, %v849_v17  ;;  %v1050_v13 = vld [vmem:[#allocation11 + $0x5c8] sm:$0xff]  ;;  %v6680_v17 = vcombine.high %v1049_v11, %v1053_v12 }
 0x2ea   :  { %v858_v24 = vmax.f32 %v800_v16, %v850_v18  ;;  %v6673_v16 = vcombine.low %v1042_v5, %v1046_v6  ;;  %v6682_v18 = vcombine.high %v1050_v13, %v1054_v14  ;;  %v6681_v25 = vcombine.low %v1050_v13, %v1054_v14  ;;  %v1102_v3 = vld [vmem:[#allocation11 + $0x768] sm:$0xff] }
 0x2eb   :  { %v8648_v28 = vpack.c.bf16 %v857_v20, %v853_v19  ;;  %v1057_v19 = vld [vmem:[#allocation11 + $0x600] sm:$0xff]  ;;  %v8663_v5 = vsub.s32 2, %v8612_v43  ;;  %v1106_v13 = vld [vmem:[#allocation11 + $0x788] sm:$0xff] }
 0x2ec   :  { %v8650_v29 = vpack.c.bf16 %v858_v24, %v854_v23  ;;  %v1061_v20 = vld [vmem:[#allocation11 + $0x620] sm:$0xff]  ;;  %v1062_v23 = vld [vmem:[#allocation11 + $0x628] sm:$0xff]  ;;  %v6679_v24 = vcombine.low %v1049_v11, %v1053_v12 }
 0x2ed   :  { %v6688_v26 = vcombine.high %v1057_v19, %v1061_v20  ;;  %v6690_v27 = vcombine.high %v1058_v21, %v1062_v23  ;;  %v6687_v38 = vcombine.low %v1057_v19, %v1061_v20  ;;  %v6689_v39 = vcombine.low %v1058_v21, %v1062_v23  ;;  %v1105_v11 = vld [vmem:[#allocation11 + $0x780] sm:$0xff]  ;;  %v1110_v14 = vld [vmem:[#allocation11 + $0x7a8] sm:$0xff] }
 0x2ee   :  { %2475 = vmatprep.mubr.bf16.mxu1 %v8650_v29  ;;  %2561 = vmatprep.mubr.bf16.mxu0 %v8650_v29  ;;  %v1109_v12 = vld [vmem:[#allocation11 + $0x7a0] sm:$0xff]  ;;  %v6738_v20 = vcombine.high %v1106_v13, %v1110_v14 }
 0x2ef   :  { %2476 = vmatmul.mubr.bf16.vlgmr.msra.gmra.mrb[0].mxu1 %v8648_v28  ;;  %2562 = vmatmul.mubr.bf16.vlgmr.msra.gmra.mrb[12].mxu0 %v8648_v28  ;;  %v6736_v19 = vcombine.high %v1105_v11, %v1109_v12  ;;  %v1113_v21 = vld [vmem:[#allocation11 + $0x7c0] sm:$0xff] }
 0x2f0   :  { %2487 = vmatpush1.bf16.msra.mxu1 %v6623_v40  ;;  %2573 = vmatpush1.bf16.msra.mxu0 %v6625_v41  ;;  %v1026_v40 = vld [vmem:[#allocation11 + $0x508] sm:$0xff] }
 0x2f1   :  { %2488 = vmatprep.subr.bf16.mxu1 %v6632_v30  ;;  %2574 = vmatprep.subr.bf16.mxu0 %v6634_v31  ;;  %v1030_v41 = vld [vmem:[#allocation11 + $0x528] sm:$0xff]  ;;  %v1065_v30 = vld [vmem:[#allocation11 + $0x640] sm:$0xff] }
 0x2f2   :  { %v6658_v57 = vcombine.high %v1026_v40, %v1030_v41  ;;  %v6657_v63 = vcombine.low %v1026_v40, %v1030_v41  ;;  %v1069_v31 = vld [vmem:[#allocation11 + $0x660] sm:$0xff]  ;;  %v6705_v41 = vcombine.low %v1074_v47, %v1078_v49 }
 0x2f3   :  { %v6695_v50 = vcombine.low %v1065_v30, %v1069_v31 }
 0x2f4   :  { %2489 = vmatpush1.bf16.msra.mxu1 %v6631_v42  ;;  %2575 = vmatpush1.bf16.msra.mxu0 %v6633_v44  ;;  %v6696_v42 = vcombine.high %v1065_v30, %v1069_v31  ;;  %v6698_v44 = vcombine.high %v1066_v35, %v1070_v36  ;;  %v6735_v36 = vcombine.low %v1105_v11, %v1109_v12 }
 0x2f5   :  { %2490 = vmatprep.subr.bf16.mxu1 %v6640_v45  ;;  %2576 = vmatprep.subr.bf16.mxu0 %v6642_v46  ;;  %v1073_v45 = vld [vmem:[#allocation11 + $0x680] sm:$0xff] }
 0x2f6   :  { %v1077_v46 = vld [vmem:[#allocation11 + $0x6a0] sm:$0xff] }
 0x2f7   :  { %v6703_v40 = vcombine.low %v1073_v45, %v1077_v46 }
 0x2f8   :  { %2491 = vmatpush1.bf16.msra.mxu1 %v6639_v53  ;;  %2577 = vmatpush1.bf16.msra.mxu0 %v6641_v22  ;;  %v6704_v53 = vcombine.high %v1073_v45, %v1077_v46  ;;  %v6706_v22 = vcombine.high %v1074_v47, %v1078_v49  ;;  %v867_v46 = vld [vmem:[#allocation11 + $0x10] sm:$0xff] }
 0x2f9   :  { %2492 = vmatprep.subr.bf16.mxu1 %v6648_v32  ;;  %2578 = vmatprep.subr.bf16.mxu0 %v6650_v33  ;;  %v1081_v32 = vld [vmem:[#allocation11 + $0x6c0] sm:$0xff]  ;;  %v871_v47 = vld [vmem:[#allocation11 + $0x30] sm:$0xff] }
 0x2fa   :  { %v1085_v33 = vld [vmem:[#allocation11 + $0x6e0] sm:$0xff] }
 0x2fb   :  { %v6711_v60 = vcombine.low %v1081_v32, %v1085_v33 }
 0x2fc   :  { %2493 = vmatpush1.bf16.msra.mxu1 %v6647_v54  ;;  %2579 = vmatpush1.bf16.msra.mxu0 %v6649_v55  ;;  %v6712_v54 = vcombine.high %v1081_v32, %v1085_v33  ;;  %v6714_v55 = vcombine.high %v1082_v34, %v1086_v37  ;;  %v6500_v37 = vcombine.high %v867_v46, %v871_v47 }
 0x2fd   :  { %2494 = vmatprep.subr.bf16.mxu1 %v6656_v56  ;;  %2580 = vmatprep.subr.bf16.mxu0 %v6658_v57  ;;  %v1089_v56 = vld [vmem:[#allocation11 + $0x700] sm:$0xff] }
 0x2fe   :  { %v1093_v57 = vld [vmem:[#allocation11 + $0x720] sm:$0xff] }
 0x2ff   :  { %v6719_v6 = vcombine.low %v1089_v56, %v1093_v57 }
 0x300   :  { %2495 = vmatpush1.bf16.msra.mxu1 %v6655_v62  ;;  %2581 = vmatpush1.bf16.msra.mxu0 %v6657_v63  ;;  %v6720_v62 = vcombine.high %v1089_v56, %v1093_v57  ;;  %v6722_v63 = vcombine.high %v1090_v58, %v1094_v59  ;;  %v875_v57 = vld [vmem:[#allocation11 + $0x50] sm:$0xff] }
 0x301   :  { %2496 = vmatprep.subr.bf16.mxu1 %v6664_v0  ;;  %2582 = vmatprep.subr.bf16.mxu0 %v6666_v1  ;;  %v1097_v0 = vld [vmem:[#allocation11 + $0x740] sm:$0xff] }
 0x302   :  { %v1101_v1 = vld [vmem:[#allocation11 + $0x760] sm:$0xff] }
 0x304   :  { %2497 = vmatpush1.bf16.msra.mxu1 %v6663_v7  ;;  %2583 = vmatpush1.bf16.msra.mxu0 %v6665_v8  ;;  %v6721_v7 = vcombine.low %v1090_v58, %v1094_v59  ;;  %v8666_v8 = vsub.s32 3, %v8612_v43  ;;  %v879_v59 = vld [vmem:[#allocation11 + $0x70] sm:$0xff] }
 0x305   :  { %2498 = vmatprep.subr.bf16.mxu1 %v6672_v9  ;;  %2584 = vmatprep.subr.bf16.mxu0 %v6674_v10  ;;  %v6728_v9 = vcombine.high %v1097_v0, %v1101_v1  ;;  %v6730_v10 = vcombine.high %v1098_v2, %v1102_v3 }
 0x308   :  { %2499 = vmatpush1.bf16.msra.mxu1 %v6671_v15  ;;  %2585 = vmatpush1.bf16.msra.mxu0 %v6673_v16  ;;  %v430_v15 = vrot.slane %v8642_v4, %v8663_v5  ;;  %v434_v16 = vrot.slane %v8642_v4, %v8666_v8 }
 0x309   :  { %2500 = vmatprep.subr.bf16.mxu1 %v6680_v17  ;;  %2586 = vmatprep.subr.bf16.mxu0 %v6682_v18  ;;  %v6727_v17 = vcombine.low %v1097_v0, %v1101_v1  ;;  %v6729_v18 = vcombine.low %v1098_v2, %v1102_v3  ;;  %v6508_v1 = vcombine.high %v875_v57, %v879_v59  ;;  %v883_v3 = vld [vmem:[#allocation11 + $0x90] sm:$0xff] }
 0x30c   :  { %2501 = vmatpush1.bf16.msra.mxu1 %v6679_v24  ;;  %2587 = vmatpush1.bf16.msra.mxu0 %v6681_v25  ;;  %v1117_v24 = vld [vmem:[#allocation11 + $0x7e0] sm:$0xff]  ;;  %v1114_v25 = vld [vmem:[#allocation11 + $0x7c8] sm:$0xff] }
 0x30d   :  { %2502 = vmatprep.subr.bf16.mxu1 %v6688_v26  ;;  %2588 = vmatprep.subr.bf16.mxu0 %v6690_v27  ;;  %v1118_v26 = vld [vmem:[#allocation11 + $0x7e8] sm:$0xff]  ;;  %v6743_v33 = vcombine.low %v1113_v21, %v1117_v24 }
 0x30e   :  { %v6746_v45 = vcombine.high %v1114_v25, %v1118_v26  ;;  %v6745_v34 = vcombine.low %v1114_v25, %v1118_v26  ;;  %v904_v25 = vld [vmem:[#allocation11 + $0x138] sm:$0xff] }
 0x310   :  { %2503 = vmatpush1.bf16.msra.mxu1 %v6687_v38  ;;  %2589 = vmatpush1.bf16.msra.mxu0 %v6689_v39  ;;  %v6737_v38 = vcombine.low %v1106_v13, %v1110_v14  ;;  %v891_v14 = vld [vmem:[#allocation11 + $0xd0] sm:$0xff] }
 0x311   :  { %2504 = vmatprep.subr.bf16.mxu1 %v6696_v42  ;;  %2590 = vmatprep.subr.bf16.mxu0 %v6698_v44  ;;  %v6744_v44 = vcombine.high %v1113_v21, %v1117_v24  ;;  %v903_v24 = vld [vmem:[#allocation11 + $0x130] sm:$0xff] }
 0x314   :  { %2505 = vmatpush1.bf16.msra.mxu1 %v6695_v50  ;;  %2591 = vmatpush1.bf16.msra.mxu0 %v6697_v52  ;;  %v868_v52 = vld [vmem:[#allocation11 + $0x18] sm:$0xff] }
 0x315   :  { %2506 = vmatprep.subr.bf16.mxu1 %v6704_v53  ;;  %2592 = vmatprep.subr.bf16.mxu0 %v6706_v22  ;;  %v872_v53 = vld [vmem:[#allocation11 + $0x38] sm:$0xff] }
 0x316   :  { %v6501_v0 = vcombine.low %v868_v52, %v872_v53 }
 0x318   :  { %2507 = vmatpush1.bf16.msra.mxu1 %v6703_v40  ;;  %2593 = vmatpush1.bf16.msra.mxu0 %v6705_v41 }
 0x319   :  { %2508 = vmatprep.subr.bf16.mxu1 %v6712_v54  ;;  %2594 = vmatprep.subr.bf16.mxu0 %v6714_v55  ;;  %v6502_v54 = vcombine.high %v868_v52, %v872_v53 }
 0x31c   :  { %2509 = vmatpush1.bf16.msra.mxu1 %v6711_v60  ;;  %2595 = vmatpush1.bf16.msra.mxu0 %v6713_v61  ;;  %v876_v60 = vld [vmem:[#allocation11 + $0x58] sm:$0xff] }
 0x31d   :  { %2510 = vmatprep.subr.bf16.mxu1 %v6720_v62  ;;  %2596 = vmatprep.subr.bf16.mxu0 %v6722_v63  ;;  %v880_v61 = vld [vmem:[#allocation11 + $0x78] sm:$0xff]  ;;  %v6499_v63 = vcombine.low %v867_v46, %v871_v47  ;;  %v915_v46 = vld [vmem:[#allocation11 + $0x190] sm:$0xff] }
 0x31e   :  { %v6510_v2 = vcombine.high %v876_v60, %v880_v61  ;;  %v6509_v11 = vcombine.low %v876_v60, %v880_v61  ;;  %v919_v47 = vld [vmem:[#allocation11 + $0x1b0] sm:$0xff]  ;;  %v932_v60 = vld [vmem:[#allocation11 + $0x218] sm:$0xff] }
 0x31f   :  { %v936_v61 = vld [vmem:[#allocation11 + $0x238] sm:$0xff] }
 0x320   :  { %2511 = vmatpush1.bf16.msra.mxu1 %v6719_v6  ;;  %2597 = vmatpush1.bf16.msra.mxu0 %v6721_v7  ;;  %v887_v6 = vld [vmem:[#allocation11 + $0xb0] sm:$0xff]  ;;  %v884_v7 = vld [vmem:[#allocation11 + $0x98] sm:$0xff] }
 0x321   :  { %2512 = vmatprep.subr.bf16.mxu1 %v6728_v9  ;;  %2598 = vmatprep.subr.bf16.mxu0 %v6730_v10  ;;  %v888_v9 = vld [vmem:[#allocation11 + $0xb8] sm:$0xff]  ;;  %v6507_v10 = vcombine.low %v875_v57, %v879_v59  ;;  %v6516_v12 = vcombine.high %v883_v3, %v887_v6  ;;  %v931_v57 = vld [vmem:[#allocation11 + $0x210] sm:$0xff] }
 0x322   :  { %v836_v23 = vpop.f32.mrb[8].mxu0  ;;  %v6518_v13 = vcombine.high %v884_v7, %v888_v9  ;;  %v935_v59 = vld [vmem:[#allocation11 + $0x230] sm:$0xff] }
 0x323   :  { %v837_v27 = vadd.f32 %v836_v23, %v430_v15  ;;  %v838_v30 = vpop.f32.mrb[9].mxu0  ;;  %v899_v23 = vld [vmem:[#allocation11 + $0x110] sm:$0xff] }
 0x324   :  { %v839_v31 = vadd.f32 %v838_v30, %v434_v16  ;;  %v840_v35 = vpop.f32.mrb[10].mxu0  ;;  %2513 = vmatpush1.bf16.msra.mxu1 %v6727_v17  ;;  %2599 = vmatpush1.bf16.msra.mxu0 %v6729_v18  ;;  %v896_v17 = vld [vmem:[#allocation11 + $0xf8] sm:$0xff]  ;;  %v6515_v18 = vcombine.low %v883_v3, %v887_v6  ;;  %v6532_v30 = vcombine.high %v899_v23, %v903_v24  ;;  %v939_v3 = vld [vmem:[#allocation11 + $0x250] sm:$0xff] }
 0x325   :  { %v847_v4 = vmul.f32 0.2, %v837_v27  ;;  %v841_v39 = vadd.f32 %v840_v35, %v430_v15  ;;  %v842_v42 = vpop.f32.mrb[11].mxu0  ;;  %2514 = vmatprep.subr.bf16.mxu1 %v6736_v19  ;;  %2600 = vmatprep.subr.bf16.mxu0 %v6738_v20  ;;  %v895_v15 = vld [vmem:[#allocation11 + $0xf0] sm:$0xff]  ;;  %v6517_v19 = vcombine.low %v884_v7, %v888_v9  ;;  %v940_v7 = vld [vmem:[#allocation11 + $0x258] sm:$0xff] }
 0x326   :  { %v848_v49 = vmul.f32 0.2, %v839_v31  ;;  %v843_v50 = vadd.f32 %v842_v42, %v434_v16  ;;  %v892_v16 = vld [vmem:[#allocation11 + $0xd8] sm:$0xff]  ;;  %v6524_v20 = vcombine.high %v891_v14, %v895_v15  ;;  %v6523_v26 = vcombine.low %v891_v14, %v895_v15  ;;  %v907_v35 = vld [vmem:[#allocation11 + $0x150] sm:$0xff] }
 0x327   :  { %v851_v22 = vmul.f32 0.2, %v841_v39  ;;  %v855_v40 = vmax.f32 %v837_v27, %v847_v4  ;;  %v6526_v21 = vcombine.high %v892_v16, %v896_v17  ;;  %v6525_v27 = vcombine.low %v892_v16, %v896_v17  ;;  %v912_v4 = vld [vmem:[#allocation11 + $0x178] sm:$0xff]  ;;  %v943_v6 = vld [vmem:[#allocation11 + $0x270] sm:$0xff] }
 0x328   :  { %v852_v32 = vmul.f32 0.2, %v843_v50  ;;  %2515 = vmatpush1.bf16.msra.mxu1 %v6735_v36  ;;  %2601 = vmatpush1.bf16.msra.mxu0 %v6737_v38  ;;  %v856_v55 = vmax.f32 %v839_v31, %v848_v49  ;;  %v911_v36 = vld [vmem:[#allocation11 + $0x170] sm:$0xff]  ;;  %v908_v38 = vld [vmem:[#allocation11 + $0x158] sm:$0xff] }
 0x329   :  { %v859_v41 = vmax.f32 %v841_v39, %v851_v22  ;;  %2516 = vmatprep.subr.bf16.mxu1 %v6744_v44  ;;  %2602 = vmatprep.subr.bf16.mxu0 %v6746_v45  ;;  %v6531_v39 = vcombine.low %v899_v23, %v903_v24  ;;  %v6540_v44 = vcombine.high %v907_v35, %v911_v36  ;;  %v916_v49 = vld [vmem:[#allocation11 + $0x198] sm:$0xff]  ;;  %v947_v14 = vld [vmem:[#allocation11 + $0x290] sm:$0xff] }
 0x32a   :  { %v860_v56 = vmax.f32 %v843_v50, %v852_v32  ;;  %v6542_v45 = vcombine.high %v908_v38, %v912_v4  ;;  %v920_v50 = vld [vmem:[#allocation11 + $0x1b8] sm:$0xff]  ;;  %v6539_v52 = vcombine.low %v907_v35, %v911_v36  ;;  %v6541_v53 = vcombine.low %v908_v38, %v912_v4  ;;  %v951_v15 = vld [vmem:[#allocation11 + $0x2b0] sm:$0xff] }
 0x32b   :  { %v8672_v58 = vpack.c.bf16 %v859_v41, %v855_v40  ;;  %v6548_v22 = vcombine.high %v915_v46, %v919_v47  ;;  %v6550_v32 = vcombine.high %v916_v49, %v920_v50  ;;  %v928_v40 = vld [vmem:[#allocation11 + $0x1f8] sm:$0xff]  ;;  %v6547_v41 = vcombine.low %v915_v46, %v919_v47  ;;  %v955_v23 = vld [vmem:[#allocation11 + $0x2d0] sm:$0xff] }
 0x32c   :  { %v8674_v62 = vpack.c.bf16 %v860_v56, %v856_v55  ;;  %2517 = vmatpush1.bf16.msra.mxu1 %v6743_v33  ;;  %2603 = vmatpush1.bf16.msra.mxu0 %v6745_v34  ;;  %v923_v33 = vld [vmem:[#allocation11 + $0x1d0] sm:$0xff]  ;;  %v944_v9 = vld [vmem:[#allocation11 + $0x278] sm:$0xff] }
 0x32d   :  { %2615 = vmatprep.subr.bf16.mxu1 %v6500_v37  ;;  %2701 = vmatprep.subr.bf16.mxu0 %v6502_v54  ;;  %v927_v34 = vld [vmem:[#allocation11 + $0x1f0] sm:$0xff]  ;;  %v924_v37 = vld [vmem:[#allocation11 + $0x1d8] sm:$0xff]  ;;  %v6549_v54 = vcombine.low %v916_v49, %v920_v50 }
 0x32e   :  { %2518 = vmatprep.mubr.bf16.mxu1 %v8674_v62  ;;  %2604 = vmatprep.mubr.bf16.mxu0 %v8674_v62  ;;  %v6556_v55 = vcombine.high %v923_v33, %v927_v34  ;;  %v6558_v56 = vcombine.high %v924_v37, %v928_v40  ;;  %v948_v16 = vld [vmem:[#allocation11 + $0x298] sm:$0xff]  ;;  %v959_v24 = vld [vmem:[#allocation11 + $0x2f0] sm:$0xff] }
 0x32f   :  { %2519 = vmatmul.mubr.bf16.vlgmr.msra.gmra.mrb[0].mxu1 %v8672_v58  ;;  %2605 = vmatmul.mubr.bf16.vlgmr.msra.gmra.mrb[12].mxu0 %v8672_v58  ;;  %v952_v17 = vld [vmem:[#allocation11 + $0x2b8] sm:$0xff]  ;;  %v963_v35 = vld [vmem:[#allocation11 + $0x310] sm:$0xff] }
 0x330   :  { %2616 = vmatpush1.bf16.msra.mxu1 %v6499_v63  ;;  %2647 = vmatprep.mubr.bf16.mxu1 %v8650_v29  ;;  %v6555_v63 = vcombine.low %v923_v33, %v927_v34  ;;  %v967_v36 = vld [vmem:[#allocation11 + $0x330] sm:$0xff]  ;;  %v964_v38 = vld [vmem:[#allocation11 + $0x318] sm:$0xff] }
 0x331   :  { %2702 = vmatpush1.bf16.msra.mxu0 %v6501_v0  ;;  %2733 = vmatprep.mubr.bf16.mxu0 %v8650_v29  ;;  %v900_v29 = vld [vmem:[#allocation11 + $0x118] sm:$0xff]  ;;  %v6557_v0 = vcombine.low %v924_v37, %v928_v40  ;;  %v971_v46 = vld [vmem:[#allocation11 + $0x350] sm:$0xff] }
 0x332   :  { %2617 = vmatprep.subr.bf16.mxu1 %v6508_v1  ;;  %2703 = vmatprep.subr.bf16.mxu0 %v6510_v2  ;;  %v6534_v31 = vcombine.high %v900_v29, %v904_v25  ;;  %v6533_v42 = vcombine.low %v900_v29, %v904_v25  ;;  %v6564_v1 = vcombine.high %v931_v57, %v935_v59  ;;  %v956_v29 = vld [vmem:[#allocation11 + $0x2d8] sm:$0xff]  ;;  %v975_v47 = vld [vmem:[#allocation11 + $0x370] sm:$0xff] }
 0x333   :  { %v6566_v2 = vcombine.high %v932_v60, %v936_v61  ;;  %v960_v25 = vld [vmem:[#allocation11 + $0x2f8] sm:$0xff]  ;;  %v979_v33 = vld [vmem:[#allocation11 + $0x390] sm:$0xff] }
 0x334   :  { %2618 = vmatpush1.bf16.msra.mxu1 %v6507_v10  ;;  %v6563_v10 = vcombine.low %v931_v57, %v935_v59  ;;  %v968_v4 = vld [vmem:[#allocation11 + $0x338] sm:$0xff]  ;;  %v983_v34 = vld [vmem:[#allocation11 + $0x3b0] sm:$0xff] }
 0x335   :  { %2704 = vmatpush1.bf16.msra.mxu0 %v6509_v11  ;;  %2619 = vmatprep.subr.bf16.mxu1 %v6516_v12  ;;  %v6565_v11 = vcombine.low %v932_v60, %v936_v61  ;;  %v6572_v12 = vcombine.high %v939_v3, %v943_v6  ;;  %v972_v49 = vld [vmem:[#allocation11 + $0x358] sm:$0xff]  ;;  %v987_v57 = vld [vmem:[#allocation11 + $0x3d0] sm:$0xff] }
 0x336   :  { %2705 = vmatprep.subr.bf16.mxu0 %v6518_v13  ;;  %v6574_v13 = vcombine.high %v940_v7, %v944_v9  ;;  %v976_v50 = vld [vmem:[#allocation11 + $0x378] sm:$0xff]  ;;  %v991_v59 = vld [vmem:[#allocation11 + $0x3f0] sm:$0xff] }
 0x337   :  { %v980_v37 = vld [vmem:[#allocation11 + $0x398] sm:$0xff] }
 0x338   :  { %2620 = vmatpush1.bf16.msra.mxu1 %v6515_v18  ;;  %v6571_v18 = vcombine.low %v939_v3, %v943_v6  ;;  %v984_v40 = vld [vmem:[#allocation11 + $0x3b8] sm:$0xff]  ;;  %v995_v3 = vld [vmem:[#allocation11 + $0x410] sm:$0xff] }
 0x339   :  { %2706 = vmatpush1.bf16.msra.mxu0 %v6517_v19  ;;  %2621 = vmatprep.subr.bf16.mxu1 %v6524_v20  ;;  %v6573_v19 = vcombine.low %v940_v7, %v944_v9  ;;  %v6580_v20 = vcombine.high %v947_v14, %v951_v15  ;;  %v988_v60 = vld [vmem:[#allocation11 + $0x3d8] sm:$0xff]  ;;  %v999_v6 = vld [vmem:[#allocation11 + $0x430] sm:$0xff] }
 0x33a   :  { %2707 = vmatprep.subr.bf16.mxu0 %v6526_v21  ;;  %v6582_v21 = vcombine.high %v948_v16, %v952_v17  ;;  %v992_v61 = vld [vmem:[#allocation11 + $0x3f8] sm:$0xff] }
 0x33b   :  { %v996_v7 = vld [vmem:[#allocation11 + $0x418] sm:$0xff] }
 0x33c   :  { %2622 = vmatpush1.bf16.msra.mxu1 %v6523_v26  ;;  %v6579_v26 = vcombine.low %v947_v14, %v951_v15  ;;  %v1000_v9 = vld [vmem:[#allocation11 + $0x438] sm:$0xff]  ;;  %v1003_v14 = vld [vmem:[#allocation11 + $0x450] sm:$0xff] }
 0x33d   :  { %2708 = vmatpush1.bf16.msra.mxu0 %v6525_v27  ;;  %2623 = vmatprep.subr.bf16.mxu1 %v6532_v30  ;;  %v6581_v27 = vcombine.low %v948_v16, %v952_v17  ;;  %v6588_v30 = vcombine.high %v955_v23, %v959_v24  ;;  %v1007_v15 = vld [vmem:[#allocation11 + $0x470] sm:$0xff]  ;;  %v6627_v16 = vcombine.low %v995_v3, %v999_v6  ;;  %v1004_v17 = vld [vmem:[#allocation11 + $0x458] sm:$0xff] }
 0x33e   :  { %2709 = vmatprep.subr.bf16.mxu0 %v6534_v31  ;;  %v6590_v31 = vcombine.high %v956_v29, %v960_v25 }
 0x340   :  { %2624 = vmatpush1.bf16.msra.mxu1 %v6531_v39  ;;  %v6587_v39 = vcombine.low %v955_v23, %v959_v24  ;;  %v1015_v23 = vld [vmem:[#allocation11 + $0x4b0] sm:$0xff] }
 0x341   :  { %2710 = vmatpush1.bf16.msra.mxu0 %v6533_v42  ;;  %2625 = vmatprep.subr.bf16.mxu1 %v6540_v44  ;;  %v6589_v42 = vcombine.low %v956_v29, %v960_v25  ;;  %v6596_v44 = vcombine.high %v963_v35, %v967_v36  ;;  %v1012_v29 = vld [vmem:[#allocation11 + $0x498] sm:$0xff] }
 0x342   :  { %2711 = vmatprep.subr.bf16.mxu0 %v6542_v45  ;;  %v6598_v45 = vcombine.high %v964_v38, %v968_v4  ;;  %v1016_v25 = vld [vmem:[#allocation11 + $0x4b8] sm:$0xff] }
 0x344   :  { %2626 = vmatpush1.bf16.msra.mxu1 %v6539_v52  ;;  %v6595_v52 = vcombine.low %v963_v35, %v967_v36  ;;  %v1019_v35 = vld [vmem:[#allocation11 + $0x4d0] sm:$0xff] }
 0x345   :  { %2712 = vmatpush1.bf16.msra.mxu0 %v6541_v53  ;;  %2627 = vmatprep.subr.bf16.mxu1 %v6548_v22  ;;  %v6597_v53 = vcombine.low %v964_v38, %v968_v4  ;;  %v6604_v22 = vcombine.high %v971_v46, %v975_v47  ;;  %v1023_v36 = vld [vmem:[#allocation11 + $0x4f0] sm:$0xff]  ;;  %v1020_v38 = vld [vmem:[#allocation11 + $0x4d8] sm:$0xff] }
 0x346   :  { %2713 = vmatprep.subr.bf16.mxu0 %v6550_v32  ;;  %v6606_v32 = vcombine.high %v972_v49, %v976_v50  ;;  %v1024_v4 = vld [vmem:[#allocation11 + $0x4f8] sm:$0xff] }
 0x348   :  { %2628 = vmatpush1.bf16.msra.mxu1 %v6547_v41  ;;  %v6603_v41 = vcombine.low %v971_v46, %v975_v47  ;;  %v1031_v46 = vld [vmem:[#allocation11 + $0x530] sm:$0xff]  ;;  %v1028_v47 = vld [vmem:[#allocation11 + $0x518] sm:$0xff] }
 0x349   :  { %2714 = vmatpush1.bf16.msra.mxu0 %v6549_v54  ;;  %2629 = vmatprep.subr.bf16.mxu1 %v6556_v55  ;;  %v6605_v54 = vcombine.low %v972_v49, %v976_v50  ;;  %v6612_v55 = vcombine.high %v979_v33, %v983_v34  ;;  %v1032_v49 = vld [vmem:[#allocation11 + $0x538] sm:$0xff]  ;;  %v6653_v50 = vcombine.low %v1020_v38, %v1024_v4 }
 0x34a   :  { %2715 = vmatprep.subr.bf16.mxu0 %v6558_v56  ;;  %v6614_v56 = vcombine.high %v980_v37, %v984_v40 }
 0x34c   :  { %2630 = vmatpush1.bf16.msra.mxu1 %v6555_v63  ;;  %v6611_v63 = vcombine.low %v979_v33, %v983_v34  ;;  %v1036_v33 = vld [vmem:[#allocation11 + $0x558] sm:$0xff] }
 0x34d   :  { %2716 = vmatpush1.bf16.msra.mxu0 %v6557_v0  ;;  %2631 = vmatprep.subr.bf16.mxu1 %v6564_v1  ;;  %v6613_v0 = vcombine.low %v980_v37, %v984_v40  ;;  %v6620_v1 = vcombine.high %v987_v57, %v991_v59  ;;  %v1040_v34 = vld [vmem:[#allocation11 + $0x578] sm:$0xff]  ;;  %v6661_v40 = vcombine.low %v1028_v47, %v1032_v49 }
 0x34e   :  { %2717 = vmatprep.subr.bf16.mxu0 %v6566_v2  ;;  %v6622_v2 = vcombine.high %v988_v60, %v992_v61 }
 0x350   :  { %2632 = vmatpush1.bf16.msra.mxu1 %v6563_v10  ;;  %v6619_v10 = vcombine.low %v987_v57, %v991_v59  ;;  %v1044_v57 = vld [vmem:[#allocation11 + $0x598] sm:$0xff] }
 0x351   :  { %2718 = vmatpush1.bf16.msra.mxu0 %v6565_v11  ;;  %2633 = vmatprep.subr.bf16.mxu1 %v6572_v12  ;;  %v6621_v11 = vcombine.low %v988_v60, %v992_v61  ;;  %v6628_v12 = vcombine.high %v995_v3, %v999_v6  ;;  %v1048_v59 = vld [vmem:[#allocation11 + $0x5b8] sm:$0xff]  ;;  %v6669_v61 = vcombine.low %v1036_v33, %v1040_v34 }
 0x352   :  { %2719 = vmatprep.subr.bf16.mxu0 %v6574_v13  ;;  %v6630_v13 = vcombine.high %v996_v7, %v1000_v9  ;;  %v1052_v3 = vld [vmem:[#allocation11 + $0x5d8] sm:$0xff] }
 0x353   :  { %v1056_v6 = vld [vmem:[#allocation11 + $0x5f8] sm:$0xff] }
 0x354   :  { %2634 = vmatpush1.bf16.msra.mxu1 %v6571_v18  ;;  %v1008_v18 = vld [vmem:[#allocation11 + $0x478] sm:$0xff] }
 0x355   :  { %2720 = vmatpush1.bf16.msra.mxu0 %v6573_v19  ;;  %2635 = vmatprep.subr.bf16.mxu1 %v6580_v20  ;;  %v6629_v19 = vcombine.low %v996_v7, %v1000_v9  ;;  %v6636_v20 = vcombine.high %v1003_v14, %v1007_v15  ;;  %v6638_v24 = vcombine.high %v1004_v17, %v1008_v18 }
 0x356   :  { %2721 = vmatprep.subr.bf16.mxu0 %v6582_v21  ;;  %v1011_v21 = vld [vmem:[#allocation11 + $0x490] sm:$0xff]  ;;  %v6677_v9 = vcombine.low %v1044_v57, %v1048_v59 }
 0x358   :  { %2636 = vmatpush1.bf16.msra.mxu1 %v6579_v26  ;;  %v6635_v26 = vcombine.low %v1003_v14, %v1007_v15  ;;  %v1060_v14 = vld [vmem:[#allocation11 + $0x618] sm:$0xff] }
 0x359   :  { %2722 = vmatpush1.bf16.msra.mxu0 %v6581_v27  ;;  %2637 = vmatprep.subr.bf16.mxu1 %v6588_v30  ;;  %v6637_v27 = vcombine.low %v1004_v17, %v1008_v18  ;;  %v6644_v30 = vcombine.high %v1011_v21, %v1015_v23  ;;  %v1064_v15 = vld [vmem:[#allocation11 + $0x638] sm:$0xff]  ;;  %v6685_v17 = vcombine.low %v1052_v3, %v1056_v6 }
 0x35a   :  { %2723 = vmatprep.subr.bf16.mxu0 %v6590_v31  ;;  %v6646_v31 = vcombine.high %v1012_v29, %v1016_v25 }
 0x35c   :  { %2638 = vmatpush1.bf16.msra.mxu1 %v6587_v39  ;;  %v6643_v39 = vcombine.low %v1011_v21, %v1015_v23  ;;  %v1071_v21 = vld [vmem:[#allocation11 + $0x670] sm:$0xff]  ;;  %v1068_v23 = vld [vmem:[#allocation11 + $0x658] sm:$0xff] }
 0x35d   :  { %2724 = vmatpush1.bf16.msra.mxu0 %v6589_v42  ;;  %2639 = vmatprep.subr.bf16.mxu1 %v6596_v44  ;;  %v6652_v42 = vcombine.high %v1019_v35, %v1023_v36  ;;  %v6654_v44 = vcombine.high %v1020_v38, %v1024_v4 }
 0x35e   :  { %2725 = vmatprep.subr.bf16.mxu0 %v6598_v45  ;;  %v1027_v45 = vld [vmem:[#allocation11 + $0x510] sm:$0xff] }
 0x35f   :  { %v6659_v37 = vcombine.low %v1027_v45, %v1031_v46 }
 0x360   :  { %2640 = vmatpush1.bf16.msra.mxu1 %v6595_v52  ;;  %v6660_v52 = vcombine.high %v1027_v45, %v1031_v46  ;;  %v1084_v45 = vld [vmem:[#allocation11 + $0x6d8] sm:$0xff] }
 0x361   :  { %2726 = vmatpush1.bf16.msra.mxu0 %v6597_v53  ;;  %2641 = vmatprep.subr.bf16.mxu1 %v6604_v22  ;;  %v6662_v53 = vcombine.high %v1028_v47, %v1032_v49  ;;  %v1035_v22 = vld [vmem:[#allocation11 + $0x550] sm:$0xff]  ;;  %v1088_v46 = vld [vmem:[#allocation11 + $0x6f8] sm:$0xff] }
 0x362   :  { %2727 = vmatprep.subr.bf16.mxu0 %v6606_v32  ;;  %v1039_v32 = vld [vmem:[#allocation11 + $0x570] sm:$0xff] }
 0x363   :  { %v6667_v60 = vcombine.low %v1035_v22, %v1039_v32 }
 0x364   :  { %2642 = vmatpush1.bf16.msra.mxu1 %v6603_v41  ;;  %v6668_v41 = vcombine.high %v1035_v22, %v1039_v32  ;;  %v1092_v22 = vld [vmem:[#allocation11 + $0x718] sm:$0xff] }
 0x365   :  { %2728 = vmatpush1.bf16.msra.mxu0 %v6605_v54  ;;  %2643 = vmatprep.subr.bf16.mxu1 %v6612_v55  ;;  %v6670_v54 = vcombine.high %v1036_v33, %v1040_v34  ;;  %v1043_v55 = vld [vmem:[#allocation11 + $0x590] sm:$0xff]  ;;  %v1096_v32 = vld [vmem:[#allocation11 + $0x738] sm:$0xff]  ;;  %v6717_v34 = vcombine.low %v1084_v45, %v1088_v46 }
 0x366   :  { %2729 = vmatprep.subr.bf16.mxu0 %v6614_v56  ;;  %v1047_v56 = vld [vmem:[#allocation11 + $0x5b0] sm:$0xff] }
 0x367   :  { %v6675_v7 = vcombine.low %v1043_v55, %v1047_v56 }
 0x368   :  { %2644 = vmatpush1.bf16.msra.mxu1 %v6611_v63  ;;  %v6676_v63 = vcombine.high %v1043_v55, %v1047_v56  ;;  %v1100_v55 = vld [vmem:[#allocation11 + $0x758] sm:$0xff] }
 0x369   :  { %2730 = vmatpush1.bf16.msra.mxu0 %v6613_v0  ;;  %2645 = vmatprep.subr.bf16.mxu1 %v6620_v1  ;;  %v6678_v0 = vcombine.high %v1044_v57, %v1048_v59  ;;  %v1051_v1 = vld [vmem:[#allocation11 + $0x5d0] sm:$0xff]  ;;  %v1104_v56 = vld [vmem:[#allocation11 + $0x778] sm:$0xff]  ;;  %v6725_v59 = vcombine.low %v1092_v22, %v1096_v32 }
 0x36a   :  { %2731 = vmatprep.subr.bf16.mxu0 %v6622_v2  ;;  %v1055_v2 = vld [vmem:[#allocation11 + $0x5f0] sm:$0xff] }
 0x36c   :  { %2646 = vmatpush1.bf16.msra.mxu1 %v6619_v10  ;;  %v6684_v10 = vcombine.high %v1051_v1, %v1055_v2 }
 0x36d   :  { %2732 = vmatpush1.bf16.msra.mxu0 %v6621_v11  ;;  %2658 = vmatprep.subr.bf16.mxu1 %v6628_v12  ;;  %v6686_v11 = vcombine.high %v1052_v3, %v1056_v6  ;;  %v1059_v12 = vld [vmem:[#allocation11 + $0x610] sm:$0xff]  ;;  %v6733_v6 = vcombine.low %v1100_v55, %v1104_v56 }
 0x36e   :  { %2744 = vmatprep.subr.bf16.mxu0 %v6630_v13  ;;  %v1063_v13 = vld [vmem:[#allocation11 + $0x630] sm:$0xff] }
 0x36f   :  { %2648 = vmatmul.mubr.bf16.vlgmr.msra.gmra.mrb[4].mxu1 %v8648_v28  ;;  %v6692_v18 = vcombine.high %v1059_v12, %v1063_v13 }
 0x370   :  { %2734 = vmatmul.mubr.bf16.vlgmr.msra.gmra.mrb[16].mxu0 %v8648_v28  ;;  %2659 = vmatpush1.bf16.msra.mxu1 %v6627_v16  ;;  %v6645_v28 = vcombine.low %v1012_v29, %v1016_v25  ;;  %v6683_v16 = vcombine.low %v1051_v1, %v1055_v2  ;;  %v6691_v29 = vcombine.low %v1059_v12, %v1063_v13  ;;  %v1108_v1 = vld [vmem:[#allocation11 + $0x798] sm:$0xff] }
 0x371   :  { %2690 = vmatprep.mubr.bf16.mxu1 %v8674_v62  ;;  %2745 = vmatpush1.bf16.msra.mxu0 %v6629_v19  ;;  %v6694_v19 = vcombine.high %v1060_v14, %v1064_v15  ;;  %v6693_v25 = vcombine.low %v1060_v14, %v1064_v15  ;;  %v1112_v2 = vld [vmem:[#allocation11 + $0x7b8] sm:$0xff] }
 0x372   :  { %2776 = vmatprep.mubr.bf16.mxu0 %v8674_v62  ;;  %2660 = vmatprep.subr.bf16.mxu1 %v6636_v20  ;;  %v6651_v62 = vcombine.low %v1019_v35, %v1023_v36  ;;  %v1067_v20 = vld [vmem:[#allocation11 + $0x650] sm:$0xff]  ;;  %v1076_v35 = vld [vmem:[#allocation11 + $0x698] sm:$0xff]  ;;  %v6741_v15 = vcombine.low %v1108_v1, %v1112_v2 }
 0x373   :  { %2746 = vmatprep.subr.bf16.mxu0 %v6638_v24  ;;  %v1072_v24 = vld [vmem:[#allocation11 + $0x678] sm:$0xff]  ;;  %v6699_v38 = vcombine.low %v1067_v20, %v1071_v21 }
 0x374   :  { %2661 = vmatpush1.bf16.msra.mxu1 %v6635_v26  ;;  %v6700_v26 = vcombine.high %v1067_v20, %v1071_v21  ;;  %v1080_v36 = vld [vmem:[#allocation11 + $0x6b8] sm:$0xff]  ;;  %v6701_v4 = vcombine.low %v1068_v23, %v1072_v24  ;;  %v7518_v20 = vld [vmem:[#allocation14 + $0x4] ss:$28 sps:$4 sm:$0xff]   ;;  %v7521_v21 = vld [vmem:[#allocation14 + $0xc] ss:$28 sps:$4 sm:$0xff]  }
 0x375   :  { %2747 = vmatpush1.bf16.msra.mxu0 %v6637_v27  ;;  %2662 = vmatprep.subr.bf16.mxu1 %v6644_v30  ;;  %v6702_v27 = vcombine.high %v1068_v23, %v1072_v24  ;;  %v1075_v30 = vld [vmem:[#allocation11 + $0x690] sm:$0xff]  ;;  %v6709_v49 = vcombine.low %v1076_v35, %v1080_v36  ;;  %v1116_v12 = vld [vmem:[#allocation11 + $0x7d8] sm:$0xff]  ;;  %v7516_v23 = vld [vmem:[#allocation14] ss:$28 sps:$4 sm:$0xff]  }
 0x376   :  { %2748 = vmatprep.subr.bf16.mxu0 %v6646_v31  ;;  %v1079_v31 = vld [vmem:[#allocation11 + $0x6b0] sm:$0xff]  ;;  %v1120_v13 = vld [vmem:[#allocation11 + $0x7f8] sm:$0xff] }
 0x377   :  { %v6707_v47 = vcombine.low %v1075_v30, %v1079_v31  ;;  %v7519_v24 = vld [vmem:[#allocation14 + $0x8] ss:$28 sps:$4 sm:$0xff]  }
 0x378   :  { %2663 = vmatpush1.bf16.msra.mxu1 %v6643_v39  ;;  %v6708_v39 = vcombine.high %v1075_v30, %v1079_v31  ;;  %v7530_v30 = vld [vmem:[#allocation14 + $0x74] ss:$28 sps:$4 sm:$0xff]   ;;  %v7533_v31 = vld [vmem:[#allocation14 + $0x7c] ss:$28 sps:$4 sm:$0xff]  }
 0x379   :  { %2749 = vmatpush1.bf16.msra.mxu0 %v6645_v28  ;;  %2664 = vmatprep.subr.bf16.mxu1 %v6652_v42  ;;  %v6710_v28 = vcombine.high %v1076_v35, %v1080_v36  ;;  %v1083_v42 = vld [vmem:[#allocation11 + $0x6d0] sm:$0xff]  ;;  %v7531_v36 = vld [vmem:[#allocation14 + $0x78] ss:$28 sps:$4 sm:$0xff]  }
 0x37a   :  { %2750 = vmatprep.subr.bf16.mxu0 %v6654_v44  ;;  %v1087_v44 = vld [vmem:[#allocation11 + $0x6f0] sm:$0xff] }
 0x37b   :  { %v6715_v33 = vcombine.low %v1083_v42, %v1087_v44  ;;  %v7528_v35 = vld [vmem:[#allocation14 + $0x70] ss:$28 sps:$4 sm:$0xff]  }
 0x37c   :  { %2665 = vmatpush1.bf16.msra.mxu1 %v6651_v62  ;;  %v6716_v62 = vcombine.high %v1083_v42, %v1087_v44  ;;  %v7545_v42 = vld [vmem:[#allocation14 + $0xec] ss:$28 sps:$4 sm:$0xff]   ;;  %v7540_v44 = vld [vmem:[#allocation14 + $0xe0] ss:$28 sps:$4 sm:$0xff]  }
 0x37d   :  { %2751 = vmatpush1.bf16.msra.mxu0 %v6653_v50  ;;  %2666 = vmatprep.subr.bf16.mxu1 %v6660_v52  ;;  %v6718_v50 = vcombine.high %v1084_v45, %v1088_v46  ;;  %v1091_v52 = vld [vmem:[#allocation11 + $0x710] sm:$0xff]  ;;  %v7548_v46 = vld [vmem:[#allocation14 + $0x11c] ss:$28 sps:$4 sm:$0xff]  }
 0x37e   :  { %2752 = vmatprep.subr.bf16.mxu0 %v6662_v53  ;;  %v1095_v53 = vld [vmem:[#allocation11 + $0x730] sm:$0xff] }
 0x37f   :  { %v6723_v57 = vcombine.low %v1091_v52, %v1095_v53  ;;  %v7543_v45 = vld [vmem:[#allocation14 + $0xe8] ss:$28 sps:$4 sm:$0xff]  }
 0x380   :  { %2667 = vmatpush1.bf16.msra.mxu1 %v6659_v37  ;;  %v6724_v37 = vcombine.high %v1091_v52, %v1095_v53  ;;  %v7557_v52 = vld [vmem:[#allocation14 + $0x15c] ss:$28 sps:$4 sm:$0xff]   ;;  %v7552_v53 = vld [vmem:[#allocation14 + $0x150] ss:$28 sps:$4 sm:$0xff]  }
 0x381   :  { %2753 = vmatpush1.bf16.msra.mxu0 %v6661_v40  ;;  %2668 = vmatprep.subr.bf16.mxu1 %v6668_v41  ;;  %v6726_v40 = vcombine.high %v1092_v22, %v1096_v32  ;;  %v1099_v41 = vld [vmem:[#allocation11 + $0x750] sm:$0xff]  ;;  %v7555_v22 = vld [vmem:[#allocation14 + $0x158] ss:$28 sps:$4 sm:$0xff]  }
 0x382   :  { %2754 = vmatprep.subr.bf16.mxu0 %v6670_v54  ;;  %v1103_v54 = vld [vmem:[#allocation11 + $0x770] sm:$0xff] }
 0x383   :  { %v6731_v3 = vcombine.low %v1099_v41, %v1103_v54  ;;  %v7560_v32 = vld [vmem:[#allocation14 + $0x18c] ss:$28 sps:$4 sm:$0xff]  }
 0x384   :  { %2669 = vmatpush1.bf16.msra.mxu1 %v6667_v60  ;;  %v6732_v60 = vcombine.high %v1099_v41, %v1103_v54  ;;  %v7569_v41 = vld [vmem:[#allocation14 + $0x1cc] ss:$28 sps:$4 sm:$0xff]   ;;  %v7564_v54 = vld [vmem:[#allocation14 + $0x1c0] ss:$28 sps:$4 sm:$0xff]  }
 0x385   :  { %2755 = vmatpush1.bf16.msra.mxu0 %v6669_v61  ;;  %2670 = vmatprep.subr.bf16.mxu1 %v6676_v63  ;;  %v6734_v61 = vcombine.high %v1100_v55, %v1104_v56  ;;  %v1107_v63 = vld [vmem:[#allocation11 + $0x790] sm:$0xff]  ;;  %v7572_v56 = vld [vmem:[#allocation14 + $0x1fc] ss:$28 sps:$4 sm:$0xff]  }
 0x386   :  { %2756 = vmatprep.subr.bf16.mxu0 %v6678_v0  ;;  %v1111_v0 = vld [vmem:[#allocation11 + $0x7b0] sm:$0xff] }
 0x387   :  { %v6739_v14 = vcombine.low %v1107_v63, %v1111_v0  ;;  %v7567_v55 = vld [vmem:[#allocation14 + $0x1c8] ss:$28 sps:$4 sm:$0xff]  }
 0x388   :  { %2671 = vmatpush1.bf16.msra.mxu1 %v6675_v7  ;;  %v6740_v7 = vcombine.high %v1107_v63, %v1111_v0  ;;  %v7581_v63 = vld [vmem:[#allocation14 + $0x23c] ss:$28 sps:$4 sm:$0xff]   ;;  %v7576_v0 = vld [vmem:[#allocation14 + $0x230] ss:$28 sps:$4 sm:$0xff]  }
 0x389   :  { %2757 = vmatpush1.bf16.msra.mxu0 %v6677_v9  ;;  %2672 = vmatprep.subr.bf16.mxu1 %v6684_v10  ;;  %v6742_v9 = vcombine.high %v1108_v1, %v1112_v2  ;;  %v1115_v10 = vld [vmem:[#allocation11 + $0x7d0] sm:$0xff]  ;;  %v7579_v1 = vld [vmem:[#allocation14 + $0x238] ss:$28 sps:$4 sm:$0xff]  }
 0x38a   :  { %2758 = vmatprep.subr.bf16.mxu0 %v6686_v11  ;;  %v1119_v11 = vld [vmem:[#allocation11 + $0x7f0] sm:$0xff] }
 0x38b   :  { %v7584_v2 = vld [vmem:[#allocation14 + $0x26c] ss:$28 sps:$4 sm:$0xff]  }
 0x38c   :  { %2673 = vmatpush1.bf16.msra.mxu1 %v6683_v16  ;;  %v6748_v16 = vcombine.high %v1115_v10, %v1119_v11 }
 0x38d   :  { %2759 = vmatpush1.bf16.msra.mxu0 %v6685_v17  ;;  %2674 = vmatprep.subr.bf16.mxu1 %v6692_v18  ;;  %v6750_v17 = vcombine.high %v1116_v12, %v1120_v13  ;;  %v6747_v18 = vcombine.low %v1115_v10, %v1119_v11  ;;  %v7593_v10 = vld [vmem:[#allocation14 + $0x2ac] ss:$28 sps:$4 sm:$0xff]   ;;  %v7588_v11 = vld [vmem:[#allocation14 + $0x2a0] ss:$28 sps:$4 sm:$0xff]  }
 0x38e   :  { %2760 = vmatprep.subr.bf16.mxu0 %v6694_v19  ;;  %v6749_v19 = vcombine.low %v1116_v12, %v1120_v13  ;;  %v7591_v12 = vld [vmem:[#allocation14 + $0x2a8] ss:$28 sps:$4 sm:$0xff]   ;;  %v7596_v13 = vld [vmem:[#allocation14 + $0x2dc] ss:$28 sps:$4 sm:$0xff]  }
 0x390   :  { %2675 = vmatpush1.bf16.msra.mxu1 %v6691_v29  ;;  %v7524_v29 = vld [vmem:[#allocation14 + $0x3c] ss:$28 sps:$4 sm:$0xff]  }
 0x391   :  { %2761 = vmatpush1.bf16.msra.mxu0 %v6693_v25  ;;  %2676 = vmatprep.subr.bf16.mxu1 %v6700_v26  ;;  %v7527_v25 = vld [vmem:[#allocation14 + $0x44] ss:$28 sps:$4 sm:$0xff]   ;;  %v7522_v26 = vld [vmem:[#allocation14 + $0x38] ss:$28 sps:$4 sm:$0xff]  }
 0x392   :  { %2762 = vmatprep.subr.bf16.mxu0 %v6702_v27  ;;  %v7525_v27 = vld [vmem:[#allocation14 + $0x40] ss:$28 sps:$4 sm:$0xff]  }
 0x394   :  { %2677 = vmatpush1.bf16.msra.mxu1 %v6699_v38  ;;  %v7536_v38 = vld [vmem:[#allocation14 + $0xac] ss:$28 sps:$4 sm:$0xff]  }
 0x395   :  { %2763 = vmatpush1.bf16.msra.mxu0 %v6701_v4  ;;  %2678 = vmatprep.subr.bf16.mxu1 %v6708_v39  ;;  %v7539_v4 = vld [vmem:[#allocation14 + $0xb4] ss:$28 sps:$4 sm:$0xff]   ;;  %v7534_v39 = vld [vmem:[#allocation14 + $0xa8] ss:$28 sps:$4 sm:$0xff]  }
 0x396   :  { %2764 = vmatprep.subr.bf16.mxu0 %v6710_v28  ;;  %v7542_v28 = vld [vmem:[#allocation14 + $0xe4] ss:$28 sps:$4 sm:$0xff]  }
 0x398   :  { %2679 = vmatpush1.bf16.msra.mxu1 %v6707_v47  ;;  %v7551_v47 = vld [vmem:[#allocation14 + $0x124] ss:$28 sps:$4 sm:$0xff]  }
 0x399   :  { %2765 = vmatpush1.bf16.msra.mxu0 %v6709_v49  ;;  %2680 = vmatprep.subr.bf16.mxu1 %v6716_v62  ;;  %v7546_v49 = vld [vmem:[#allocation14 + $0x118] ss:$28 sps:$4 sm:$0xff]   ;;  %v7549_v62 = vld [vmem:[#allocation14 + $0x120] ss:$28 sps:$4 sm:$0xff]  }
 0x39a   :  { %2766 = vmatprep.subr.bf16.mxu0 %v6718_v50  ;;  %v7554_v50 = vld [vmem:[#allocation14 + $0x154] ss:$28 sps:$4 sm:$0xff]  }
 0x39c   :  { %2681 = vmatpush1.bf16.msra.mxu1 %v6715_v33  ;;  %v7563_v33 = vld [vmem:[#allocation14 + $0x194] ss:$28 sps:$4 sm:$0xff]  }
 0x39d   :  { %2767 = vmatpush1.bf16.msra.mxu0 %v6717_v34  ;;  %2682 = vmatprep.subr.bf16.mxu1 %v6724_v37  ;;  %v7558_v34 = vld [vmem:[#allocation14 + $0x188] ss:$28 sps:$4 sm:$0xff]   ;;  %v7561_v37 = vld [vmem:[#allocation14 + $0x190] ss:$28 sps:$4 sm:$0xff]  }
 0x39e   :  { %2768 = vmatprep.subr.bf16.mxu0 %v6726_v40  ;;  %v7566_v40 = vld [vmem:[#allocation14 + $0x1c4] ss:$28 sps:$4 sm:$0xff]  }
 0x3a0   :  { %2683 = vmatpush1.bf16.msra.mxu1 %v6723_v57  ;;  %v7575_v57 = vld [vmem:[#allocation14 + $0x204] ss:$28 sps:$4 sm:$0xff]  }
 0x3a1   :  { %2769 = vmatpush1.bf16.msra.mxu0 %v6725_v59  ;;  %2684 = vmatprep.subr.bf16.mxu1 %v6732_v60  ;;  %v7570_v59 = vld [vmem:[#allocation14 + $0x1f8] ss:$28 sps:$4 sm:$0xff]   ;;  %v7573_v60 = vld [vmem:[#allocation14 + $0x200] ss:$28 sps:$4 sm:$0xff]  }
 0x3a2   :  { %2770 = vmatprep.subr.bf16.mxu0 %v6734_v61  ;;  %v7578_v61 = vld [vmem:[#allocation14 + $0x234] ss:$28 sps:$4 sm:$0xff]  }
 0x3a4   :  { %2685 = vmatpush1.bf16.msra.mxu1 %v6731_v3  ;;  %v7587_v3 = vld [vmem:[#allocation14 + $0x274] ss:$28 sps:$4 sm:$0xff]  }
 0x3a5   :  { %2771 = vmatpush1.bf16.msra.mxu0 %v6733_v6  ;;  %2686 = vmatprep.subr.bf16.mxu1 %v6740_v7  ;;  %v7582_v6 = vld [vmem:[#allocation14 + $0x268] ss:$28 sps:$4 sm:$0xff]   ;;  %v7585_v7 = vld [vmem:[#allocation14 + $0x270] ss:$28 sps:$4 sm:$0xff]  }
 0x3a6   :  { %2772 = vmatprep.subr.bf16.mxu0 %v6742_v9  ;;  %v7590_v9 = vld [vmem:[#allocation14 + $0x2a4] ss:$28 sps:$4 sm:$0xff]  }
 0x3a8   :  { %2687 = vmatpush1.bf16.msra.mxu1 %v6739_v14  ;;  %v7599_v14 = vld [vmem:[#allocation14 + $0x2e4] ss:$28 sps:$4 sm:$0xff]  }
 0x3a9   :  { %2773 = vmatpush1.bf16.msra.mxu0 %v6741_v15  ;;  %2688 = vmatprep.subr.bf16.mxu1 %v6748_v16  ;;  %v7594_v15 = vld [vmem:[#allocation14 + $0x2d8] ss:$28 sps:$4 sm:$0xff]   ;;  %v7597_v16 = vld [vmem:[#allocation14 + $0x2e0] ss:$28 sps:$4 sm:$0xff]  }
 0x3aa   :  { %2774 = vmatprep.subr.bf16.mxu0 %v6750_v17  ;;  %v7602_v17 = vld [vmem:[#allocation14 + $0x314] ss:$28 sps:$4 sm:$0xff]  }
 0x3ac   :  { %2689 = vmatpush1.bf16.msra.mxu1 %v6747_v18  ;;  %v7605_v18 = vld [vmem:[#allocation14 + $0x31c] ss:$28 sps:$4 sm:$0xff]  }
 0x3ad   :  { %2775 = vmatpush1.bf16.msra.mxu0 %v6749_v19  ;;  %5680 = vmatprep.subr.bf16.mxu1 %v7518_v20  ;;  %v7600_v19 = vld [vmem:[#allocation14 + $0x310] ss:$28 sps:$4 sm:$0xff]   ;;  %v7603_v20 = vld [vmem:[#allocation14 + $0x318] ss:$28 sps:$4 sm:$0xff]  }
 0x3ae   :  { %5852 = vmatprep.subr.bf16.mxu0 %v7521_v21  ;;  %v7608_v21 = vld [vmem:[#allocation14 + $0x34c] ss:$28 sps:$4 sm:$0xff]  }
 0x3af   :  { %2691 = vmatmul.mubr.bf16.vlgmr.msra.gmra.mrb[4].mxu1 %v8672_v58 }
 0x3b0   :  { %2777 = vmatmul.mubr.bf16.vlgmr.msra.gmra.mrb[16].mxu0 %v8672_v58  ;;  %5681 = vmatpush1.bf16.msra.mxu1 %v7516_v23  ;;  %v7537_v58 = vld [vmem:[#allocation14 + $0xb0] ss:$28 sps:$4 sm:$0xff]  }
 0x3b1   :  { %5853 = vmatpush1.bf16.msra.mxu0 %v7519_v24  ;;  %5682 = vmatprep.subr.bf16.mxu1 %v7524_v29  ;;  %v7611_v23 = vld [vmem:[#allocation14 + $0x354] ss:$28 sps:$4 sm:$0xff]   ;;  %v7606_v24 = vld [vmem:[#allocation14 + $0x348] ss:$28 sps:$4 sm:$0xff]  }
 0x3b2   :  { %5854 = vmatprep.subr.bf16.mxu0 %v7527_v25  ;;  %v7609_v29 = vld [vmem:[#allocation14 + $0x350] ss:$28 sps:$4 sm:$0xff]   ;;  %v7614_v25 = vld [vmem:[#allocation14 + $0x384] ss:$28 sps:$4 sm:$0xff]  }
 0x3b4   :  { %5683 = vmatpush1.bf16.msra.mxu1 %v7522_v26  ;;  %v7617_v26 = vld [vmem:[#allocation14 + $0x38c] ss:$28 sps:$4 sm:$0xff]  }
 0x3b5   :  { %5855 = vmatpush1.bf16.msra.mxu0 %v7525_v27  ;;  %5684 = vmatprep.subr.bf16.mxu1 %v7530_v30  ;;  %v8688_v27 = vld [vmem:[#allocation13] sm:$0xff] }
 0x3b6   :  { %5856 = vmatprep.subr.bf16.mxu0 %v7533_v31  ;;  %v1126_v30 = vrot.slane %v8688_v27, %v8615_v48  ;;  %v1134_v31 = vrot.slane %v8688_v27, %v8663_v5 }
 0x3b8   :  { %5685 = vmatpush1.bf16.msra.mxu1 %v7528_v35  ;;  %v1130_v35 = vrot.slane %v8688_v27, %v8618_v51 }
 0x3b9   :  { %5857 = vmatpush1.bf16.msra.mxu0 %v7531_v36  ;;  %5686 = vmatprep.subr.bf16.mxu1 %v7536_v38  ;;  %v1138_v36 = vrot.slane %v8688_v27, %v8666_v8 }
 0x3ba   :  { %5858 = vmatprep.subr.bf16.mxu0 %v7539_v4 }
 0x3bc   :  { %5687 = vmatpush1.bf16.msra.mxu1 %v7534_v39 }
 0x3bd   :  { %5859 = vmatpush1.bf16.msra.mxu0 %v7537_v58  ;;  %5688 = vmatprep.subr.bf16.mxu1 %v7542_v28 }
 0x3be   :  { %5860 = vmatprep.subr.bf16.mxu0 %v7545_v42 }
 0x3c0   :  { %5689 = vmatpush1.bf16.msra.mxu1 %v7540_v44 }
 0x3c1   :  { %5861 = vmatpush1.bf16.msra.mxu0 %v7543_v45  ;;  %5690 = vmatprep.subr.bf16.mxu1 %v7548_v46 }
 0x3c2   :  { %5862 = vmatprep.subr.bf16.mxu0 %v7551_v47 }
 0x3c4   :  { %5691 = vmatpush1.bf16.msra.mxu1 %v7546_v49 }
 0x3c5   :  { %5863 = vmatpush1.bf16.msra.mxu0 %v7549_v62  ;;  %5692 = vmatprep.subr.bf16.mxu1 %v7554_v50 }
 0x3c6   :  { %5864 = vmatprep.subr.bf16.mxu0 %v7557_v52 }
 0x3c8   :  { %5693 = vmatpush1.bf16.msra.mxu1 %v7552_v53 }
 0x3c9   :  { %5865 = vmatpush1.bf16.msra.mxu0 %v7555_v22  ;;  %5694 = vmatprep.subr.bf16.mxu1 %v7560_v32 }
 0x3ca   :  { %5866 = vmatprep.subr.bf16.mxu0 %v7563_v33 }
 0x3cc   :  { %5695 = vmatpush1.bf16.msra.mxu1 %v7558_v34 }
 0x3cd   :  { %5867 = vmatpush1.bf16.msra.mxu0 %v7561_v37  ;;  %5696 = vmatprep.subr.bf16.mxu1 %v7566_v40 }
 0x3ce   :  { %5868 = vmatprep.subr.bf16.mxu0 %v7569_v41 }
 0x3d0   :  { %5697 = vmatpush1.bf16.msra.mxu1 %v7564_v54 }
 0x3d1   :  { %5869 = vmatpush1.bf16.msra.mxu0 %v7567_v55  ;;  %5698 = vmatprep.subr.bf16.mxu1 %v7572_v56 }
 0x3d2   :  { %5870 = vmatprep.subr.bf16.mxu0 %v7575_v57 }
 0x3d4   :  { %5699 = vmatpush1.bf16.msra.mxu1 %v7570_v59 }
 0x3d5   :  { %5871 = vmatpush1.bf16.msra.mxu0 %v7573_v60  ;;  %5700 = vmatprep.subr.bf16.mxu1 %v7578_v61 }
 0x3d6   :  { %5872 = vmatprep.subr.bf16.mxu0 %v7581_v63 }
 0x3d8   :  { %5701 = vmatpush1.bf16.msra.mxu1 %v7576_v0 }
 0x3d9   :  { %5873 = vmatpush1.bf16.msra.mxu0 %v7579_v1  ;;  %5702 = vmatprep.subr.bf16.mxu1 %v7584_v2 }
 0x3da   :  { %5874 = vmatprep.subr.bf16.mxu0 %v7587_v3 }
 0x3dc   :  { %5703 = vmatpush1.bf16.msra.mxu1 %v7582_v6 }
 0x3dd   :  { %5875 = vmatpush1.bf16.msra.mxu0 %v7585_v7  ;;  %5704 = vmatprep.subr.bf16.mxu1 %v7590_v9  ;;  %v7612_v9 = vld [vmem:[#allocation14 + $0x380] ss:$28 sps:$4 sm:$0xff]  }
 0x3de   :  { %5876 = vmatprep.subr.bf16.mxu0 %v7593_v10  ;;  %v7615_v10 = vld [vmem:[#allocation14 + $0x388] ss:$28 sps:$4 sm:$0xff]  }
 0x3e0   :  { %5705 = vmatpush1.bf16.msra.mxu1 %v7588_v11  ;;  %v7620_v11 = vld [vmem:[#allocation14 + $0x3bc] ss:$28 sps:$4 sm:$0xff]  }
 0x3e1   :  { %5877 = vmatpush1.bf16.msra.mxu0 %v7591_v12  ;;  %5706 = vmatprep.subr.bf16.mxu1 %v7596_v13  ;;  %v7623_v12 = vld [vmem:[#allocation14 + $0x3c4] ss:$28 sps:$4 sm:$0xff]   ;;  %v7618_v13 = vld [vmem:[#allocation14 + $0x3b8] ss:$28 sps:$4 sm:$0xff]  }
 0x3e2   :  { %5878 = vmatprep.subr.bf16.mxu0 %v7599_v14  ;;  %v7621_v14 = vld [vmem:[#allocation14 + $0x3c0] ss:$28 sps:$4 sm:$0xff]  }
 0x3e4   :  { %5707 = vmatpush1.bf16.msra.mxu1 %v7594_v15  ;;  %v7626_v15 = vld [vmem:[#allocation14 + $0x3f4] ss:$28 sps:$4 sm:$0xff]  }
 0x3e5   :  { %5879 = vmatpush1.bf16.msra.mxu0 %v7597_v16  ;;  %5708 = vmatprep.subr.bf16.mxu1 %v7602_v17  ;;  %v7629_v16 = vld [vmem:[#allocation14 + $0x3fc] ss:$28 sps:$4 sm:$0xff]   ;;  %v7624_v17 = vld [vmem:[#allocation14 + $0x3f0] ss:$28 sps:$4 sm:$0xff]  }
 0x3e6   :  { %5880 = vmatprep.subr.bf16.mxu0 %v7605_v18  ;;  %v7627_v18 = vld [vmem:[#allocation14 + $0x3f8] ss:$28 sps:$4 sm:$0xff]  }
 0x3e8   :  { %5709 = vmatpush1.bf16.msra.mxu1 %v7600_v19  ;;  %v7632_v19 = vld [vmem:[#allocation14 + $0x42c] ss:$28 sps:$4 sm:$0xff]  }
 0x3e9   :  { %5881 = vmatpush1.bf16.msra.mxu0 %v7603_v20  ;;  %5710 = vmatprep.subr.bf16.mxu1 %v7608_v21  ;;  %v7635_v20 = vld [vmem:[#allocation14 + $0x434] ss:$28 sps:$4 sm:$0xff]   ;;  %v7630_v21 = vld [vmem:[#allocation14 + $0x428] ss:$28 sps:$4 sm:$0xff]  }
 0x3ea   :  { %5882 = vmatprep.subr.bf16.mxu0 %v7611_v23  ;;  %v7633_v23 = vld [vmem:[#allocation14 + $0x430] ss:$28 sps:$4 sm:$0xff]  }
 0x3ec   :  { %5711 = vmatpush1.bf16.msra.mxu1 %v7606_v24  ;;  %v7638_v24 = vld [vmem:[#allocation14 + $0x464] ss:$28 sps:$4 sm:$0xff]  }
 0x3ed   :  { %5883 = vmatpush1.bf16.msra.mxu0 %v7609_v29  ;;  %5723 = vmatprep.subr.bf16.mxu1 %v7614_v25  ;;  %v7641_v29 = vld [vmem:[#allocation14 + $0x46c] ss:$28 sps:$4 sm:$0xff]   ;;  %v7636_v25 = vld [vmem:[#allocation14 + $0x460] ss:$28 sps:$4 sm:$0xff]  }
 0x3ee   :  { %5895 = vmatprep.subr.bf16.mxu0 %v7617_v26  ;;  %v7639_v26 = vld [vmem:[#allocation14 + $0x468] ss:$28 sps:$4 sm:$0xff]  }
 0x402   :  { %v2520_v38 = vpop.f32.mrb[0].mxu1  ;;  %v2606_v4 = vpop.f32.mrb[12].mxu0 }
 0x403   :  { %v7287_v39 = vadd.f32 %v2520_v38, %v1126_v30  ;;  %v7291_v58 = vadd.f32 %v2606_v4, %v1134_v31  ;;  %v2522_v28 = vpop.f32.mrb[1].mxu1  ;;  %v2608_v42 = vpop.f32.mrb[13].mxu0  ;;  %v7650_v38 = vld [vmem:[#allocation14 + $0x4d4] ss:$28 sps:$4 sm:$0xff]   ;;  %v7653_v4 = vld [vmem:[#allocation14 + $0x4dc] ss:$28 sps:$4 sm:$0xff]  }
 0x404   :  { %v7288_v44 = vadd.f32 %v2522_v28, %v1130_v35  ;;  %v7292_v45 = vadd.f32 %v2608_v42, %v1138_v36  ;;  %v2524_v46 = vpop.f32.mrb[2].mxu1  ;;  %v2610_v47 = vpop.f32.mrb[14].mxu0  ;;  %v7656_v28 = vld [vmem:[#allocation14 + $0x50c] ss:$28 sps:$4 sm:$0xff]   ;;  %v7659_v42 = vld [vmem:[#allocation14 + $0x514] ss:$28 sps:$4 sm:$0xff]  }
 0x405   :  { %v2787_v49 = vmul.f32 0.2, %v7287_v39  ;;  %v2789_v62 = vmul.f32 0.2, %v7291_v58  ;;  %v7289_v50 = vadd.f32 %v2524_v46, %v1126_v30  ;;  %v7293_v52 = vadd.f32 %v2610_v47, %v1134_v31  ;;  %v2526_v53 = vpop.f32.mrb[3].mxu1  ;;  %v2612_v22 = vpop.f32.mrb[15].mxu0 }
 0x406   :  { %v2788_v32 = vmul.f32 0.2, %v7288_v44  ;;  %v2790_v33 = vmul.f32 0.2, %v7292_v45  ;;  %v7290_v34 = vadd.f32 %v2526_v53, %v1130_v35  ;;  %v7294_v37 = vadd.f32 %v2612_v22, %v1138_v36  ;;  %v7644_v30 = vld [vmem:[#allocation14 + $0x49c] ss:$28 sps:$4 sm:$0xff]  }
 0x407   :  { %v2795_v40 = vmul.f32 0.2, %v7289_v50  ;;  %v2797_v41 = vmul.f32 0.2, %v7293_v52  ;;  %v2803_v56 = vmax.f32 %v7287_v39, %v2787_v49  ;;  %v2805_v57 = vmax.f32 %v7291_v58, %v2789_v62  ;;  %v7647_v31 = vld [vmem:[#allocation14 + $0x4a4] ss:$28 sps:$4 sm:$0xff]  }
 0x408   :  { %v2796_v54 = vmul.f32 0.2, %v7290_v34  ;;  %v2798_v55 = vmul.f32 0.2, %v7294_v37  ;;  %v2804_v61 = vmax.f32 %v7288_v44, %v2788_v32  ;;  %v2806_v63 = vmax.f32 %v7292_v45, %v2790_v33  ;;  %v7642_v35 = vld [vmem:[#allocation14 + $0x498] ss:$28 sps:$4 sm:$0xff]  }
 0x409   :  { %v2811_v59 = vmax.f32 %v7289_v50, %v2795_v40  ;;  %v2813_v60 = vmax.f32 %v7293_v52, %v2797_v41  ;;  %v7645_v36 = vld [vmem:[#allocation14 + $0x4a0] ss:$28 sps:$4 sm:$0xff]   ;;  %v7648_v39 = vld [vmem:[#allocation14 + $0x4d0] ss:$28 sps:$4 sm:$0xff]   ;;  %v7651_v58 = vld [vmem:[#allocation14 + $0x4d8] ss:$28 sps:$4 sm:$0xff]  }
 0x40a   :  { %v2812_v0 = vmax.f32 %v7290_v34, %v2796_v54  ;;  %v2814_v1 = vmax.f32 %v7294_v37, %v2798_v55  ;;  %v7654_v44 = vld [vmem:[#allocation14 + $0x508] ss:$28 sps:$4 sm:$0xff]   ;;  %v7657_v45 = vld [vmem:[#allocation14 + $0x510] ss:$28 sps:$4 sm:$0xff]   ;;  %v7660_v49 = vld [vmem:[#allocation14 + $0x540] ss:$28 sps:$4 sm:$0xff]  }
 0x40b   :  { %v8698_v2 = vpack.c.bf16 %v2811_v59, %v2803_v56  ;;  %v8700_v3 = vpack.c.bf16 %v2813_v60, %v2805_v57  ;;  %v7662_v46 = vld [vmem:[#allocation14 + $0x544] ss:$28 sps:$4 sm:$0xff]   ;;  %v7665_v47 = vld [vmem:[#allocation14 + $0x54c] ss:$28 sps:$4 sm:$0xff]   ;;  %v7668_v50 = vld [vmem:[#allocation14 + $0x57c] ss:$28 sps:$4 sm:$0xff]  }
 0x40c   :  { %v8702_v6 = vpack.c.bf16 %v2812_v0, %v2804_v61  ;;  %v8704_v7 = vpack.c.bf16 %v2814_v1, %v2806_v63  ;;  %v7663_v62 = vld [vmem:[#allocation14 + $0x548] ss:$28 sps:$4 sm:$0xff]   ;;  %v7666_v53 = vld [vmem:[#allocation14 + $0x578] ss:$28 sps:$4 sm:$0xff]   ;;  %v7669_v22 = vld [vmem:[#allocation14 + $0x580] ss:$28 sps:$4 sm:$0xff]  }
 0x40d   :  { %v7671_v52 = vld [vmem:[#allocation14 + $0x584] ss:$28 sps:$4 sm:$0xff]   ;;  %v7674_v32 = vld [vmem:[#allocation14 + $0x5b4] ss:$28 sps:$4 sm:$0xff]   ;;  %v7677_v33 = vld [vmem:[#allocation14 + $0x5bc] ss:$28 sps:$4 sm:$0xff]  }
 0x40e   :  { %5712 = vmatprep.mubr.bf16.mxu1 %v8702_v6  ;;  %5884 = vmatprep.mubr.bf16.mxu0 %v8702_v6  ;;  %v7672_v34 = vld [vmem:[#allocation14 + $0x5b0] ss:$28 sps:$4 sm:$0xff]   ;;  %v7675_v37 = vld [vmem:[#allocation14 + $0x5b8] ss:$28 sps:$4 sm:$0xff]   ;;  %v7678_v54 = vld [vmem:[#allocation14 + $0x5e8] ss:$28 sps:$4 sm:$0xff]  }
 0x40f   :  { %5713 = vmatmul.mubr.bf16.vlgmr.msra.gmra.mrb[8].mxu1 %v8698_v2  ;;  %5885 = vmatmul.mubr.bf16.vlgmr.msra.gmra.mrb[20].mxu0 %v8698_v2  ;;  %v7680_v40 = vld [vmem:[#allocation14 + $0x5ec] ss:$28 sps:$4 sm:$0xff]   ;;  %v7683_v41 = vld [vmem:[#allocation14 + $0x5f4] ss:$28 sps:$4 sm:$0xff]   ;;  %v7686_v56 = vld [vmem:[#allocation14 + $0x624] ss:$28 sps:$4 sm:$0xff]  }
 0x410   :  { %5724 = vmatpush1.bf16.msra.mxu1 %v7612_v9  ;;  %5896 = vmatpush1.bf16.msra.mxu0 %v7615_v10  ;;  %v7681_v55 = vld [vmem:[#allocation14 + $0x5f0] ss:$28 sps:$4 sm:$0xff]   ;;  %v7684_v59 = vld [vmem:[#allocation14 + $0x620] ss:$28 sps:$4 sm:$0xff]   ;;  %v7687_v60 = vld [vmem:[#allocation14 + $0x628] ss:$28 sps:$4 sm:$0xff]  }
 0x411   :  { %5755 = vmatprep.mubr.bf16.mxu1 %v8704_v7  ;;  %5927 = vmatprep.mubr.bf16.mxu0 %v8704_v7  ;;  %v7689_v57 = vld [vmem:[#allocation14 + $0x62c] ss:$28 sps:$4 sm:$0xff]   ;;  %v7692_v61 = vld [vmem:[#allocation14 + $0x65c] ss:$28 sps:$4 sm:$0xff]   ;;  %v7695_v63 = vld [vmem:[#allocation14 + $0x664] ss:$28 sps:$4 sm:$0xff]  }
 0x412   :  { %5725 = vmatprep.subr.bf16.mxu1 %v7620_v11  ;;  %5897 = vmatprep.subr.bf16.mxu0 %v7623_v12  ;;  %v7690_v0 = vld [vmem:[#allocation14 + $0x658] ss:$28 sps:$4 sm:$0xff]   ;;  %v7693_v1 = vld [vmem:[#allocation14 + $0x660] ss:$28 sps:$4 sm:$0xff]   ;;  %v7696_v11 = vld [vmem:[#allocation14 + $0x690] ss:$28 sps:$4 sm:$0xff]  }
 0x413   :  { %v7698_v9 = vld [vmem:[#allocation14 + $0x694] ss:$28 sps:$4 sm:$0xff]   ;;  %v7701_v10 = vld [vmem:[#allocation14 + $0x69c] ss:$28 sps:$4 sm:$0xff]  }
 0x414   :  { %5726 = vmatpush1.bf16.msra.mxu1 %v7618_v13  ;;  %5898 = vmatpush1.bf16.msra.mxu0 %v7621_v14  ;;  %v7699_v12 = vld [vmem:[#allocation14 + $0x698] ss:$28 sps:$4 sm:$0xff]   ;;  %v7704_v13 = vld [vmem:[#allocation14 + $0x6cc] ss:$28 sps:$4 sm:$0xff]  }
 0x415   :  { %5727 = vmatprep.subr.bf16.mxu1 %v7626_v15  ;;  %5899 = vmatprep.subr.bf16.mxu0 %v7629_v16  ;;  %v7707_v14 = vld [vmem:[#allocation14 + $0x6d4] ss:$28 sps:$4 sm:$0xff]   ;;  %v7702_v15 = vld [vmem:[#allocation14 + $0x6c8] ss:$28 sps:$4 sm:$0xff]  }
 0x416   :  { %v7705_v16 = vld [vmem:[#allocation14 + $0x6d0] ss:$28 sps:$4 sm:$0xff]  }
 0x418   :  { %5728 = vmatpush1.bf16.msra.mxu1 %v7624_v17  ;;  %5900 = vmatpush1.bf16.msra.mxu0 %v7627_v18  ;;  %v7710_v17 = vld [vmem:[#allocation14 + $0x704] ss:$28 sps:$4 sm:$0xff]   ;;  %v7713_v18 = vld [vmem:[#allocation14 + $0x70c] ss:$28 sps:$4 sm:$0xff]  }
 0x419   :  { %5729 = vmatprep.subr.bf16.mxu1 %v7632_v19  ;;  %5901 = vmatprep.subr.bf16.mxu0 %v7635_v20  ;;  %v7708_v19 = vld [vmem:[#allocation14 + $0x700] ss:$28 sps:$4 sm:$0xff]   ;;  %v7711_v20 = vld [vmem:[#allocation14 + $0x708] ss:$28 sps:$4 sm:$0xff]  }
 0x41c   :  { %5730 = vmatpush1.bf16.msra.mxu1 %v7630_v21  ;;  %5902 = vmatpush1.bf16.msra.mxu0 %v7633_v23  ;;  %v7716_v21 = vld [vmem:[#allocation14 + $0x73c] ss:$28 sps:$4 sm:$0xff]   ;;  %v7719_v23 = vld [vmem:[#allocation14 + $0x744] ss:$28 sps:$4 sm:$0xff]  }
 0x41d   :  { %5731 = vmatprep.subr.bf16.mxu1 %v7638_v24  ;;  %5903 = vmatprep.subr.bf16.mxu0 %v7641_v29  ;;  %v7714_v24 = vld [vmem:[#allocation14 + $0x738] ss:$28 sps:$4 sm:$0xff]   ;;  %v7717_v29 = vld [vmem:[#allocation14 + $0x740] ss:$28 sps:$4 sm:$0xff]  }
 0x420   :  { %5732 = vmatpush1.bf16.msra.mxu1 %v7636_v25  ;;  %5904 = vmatpush1.bf16.msra.mxu0 %v7639_v26  ;;  %v7722_v25 = vld [vmem:[#allocation14 + $0x774] ss:$28 sps:$4 sm:$0xff]   ;;  %v7725_v26 = vld [vmem:[#allocation14 + $0x77c] ss:$28 sps:$4 sm:$0xff]  }
 0x421   :  { %5733 = vmatprep.subr.bf16.mxu1 %v7644_v30  ;;  %5905 = vmatprep.subr.bf16.mxu0 %v7647_v31  ;;  %v7720_v30 = vld [vmem:[#allocation14 + $0x770] ss:$28 sps:$4 sm:$0xff]   ;;  %v7723_v31 = vld [vmem:[#allocation14 + $0x778] ss:$28 sps:$4 sm:$0xff]  }
 0x424   :  { %5734 = vmatpush1.bf16.msra.mxu1 %v7642_v35  ;;  %5906 = vmatpush1.bf16.msra.mxu0 %v7645_v36  ;;  %v7728_v35 = vld [vmem:[#allocation14 + $0x7ac] ss:$28 sps:$4 sm:$0xff]   ;;  %v7731_v36 = vld [vmem:[#allocation14 + $0x7b4] ss:$28 sps:$4 sm:$0xff]  }
 0x425   :  { %5735 = vmatprep.subr.bf16.mxu1 %v7650_v38  ;;  %5907 = vmatprep.subr.bf16.mxu0 %v7653_v4  ;;  %v7726_v38 = vld [vmem:[#allocation14 + $0x7a8] ss:$28 sps:$4 sm:$0xff]   ;;  %v7729_v4 = vld [vmem:[#allocation14 + $0x7b0] ss:$28 sps:$4 sm:$0xff]  }
 0x428   :  { %5736 = vmatpush1.bf16.msra.mxu1 %v7648_v39  ;;  %5908 = vmatpush1.bf16.msra.mxu0 %v7651_v58  ;;  %v7734_v39 = vld [vmem:[#allocation14 + $0x7e4] ss:$28 sps:$4 sm:$0xff]   ;;  %v7737_v58 = vld [vmem:[#allocation14 + $0x7ec] ss:$28 sps:$4 sm:$0xff]  }
 0x429   :  { %5737 = vmatprep.subr.bf16.mxu1 %v7656_v28  ;;  %5909 = vmatprep.subr.bf16.mxu0 %v7659_v42  ;;  %v7732_v28 = vld [vmem:[#allocation14 + $0x7e0] ss:$28 sps:$4 sm:$0xff]   ;;  %v7735_v42 = vld [vmem:[#allocation14 + $0x7e8] ss:$28 sps:$4 sm:$0xff]  }
 0x42c   :  { %5738 = vmatpush1.bf16.msra.mxu1 %v7654_v44  ;;  %5910 = vmatpush1.bf16.msra.mxu0 %v7657_v45  ;;  %v7740_v44 = vld [vmem:[#allocation14 + $0x81c] ss:$28 sps:$4 sm:$0xff]   ;;  %v7743_v45 = vld [vmem:[#allocation14 + $0x824] ss:$28 sps:$4 sm:$0xff]  }
 0x42d   :  { %5739 = vmatprep.subr.bf16.mxu1 %v7662_v46  ;;  %5911 = vmatprep.subr.bf16.mxu0 %v7665_v47  ;;  %v7738_v46 = vld [vmem:[#allocation14 + $0x818] ss:$28 sps:$4 sm:$0xff]   ;;  %v7741_v47 = vld [vmem:[#allocation14 + $0x820] ss:$28 sps:$4 sm:$0xff]  }
 0x430   :  { %5740 = vmatpush1.bf16.msra.mxu1 %v7660_v49  ;;  %5912 = vmatpush1.bf16.msra.mxu0 %v7663_v62  ;;  %v7746_v49 = vld [vmem:[#allocation14 + $0x854] ss:$28 sps:$4 sm:$0xff]   ;;  %v7749_v62 = vld [vmem:[#allocation14 + $0x85c] ss:$28 sps:$4 sm:$0xff]  }
 0x431   :  { %5741 = vmatprep.subr.bf16.mxu1 %v7668_v50  ;;  %5913 = vmatprep.subr.bf16.mxu0 %v7671_v52  ;;  %v7744_v50 = vld [vmem:[#allocation14 + $0x850] ss:$28 sps:$4 sm:$0xff]   ;;  %v7747_v52 = vld [vmem:[#allocation14 + $0x858] ss:$28 sps:$4 sm:$0xff]  }
 0x434   :  { %5742 = vmatpush1.bf16.msra.mxu1 %v7666_v53  ;;  %5914 = vmatpush1.bf16.msra.mxu0 %v7669_v22  ;;  %v7752_v53 = vld [vmem:[#allocation14 + $0x88c] ss:$28 sps:$4 sm:$0xff]   ;;  %v7755_v22 = vld [vmem:[#allocation14 + $0x894] ss:$28 sps:$4 sm:$0xff]  }
 0x435   :  { %5743 = vmatprep.subr.bf16.mxu1 %v7674_v32  ;;  %5915 = vmatprep.subr.bf16.mxu0 %v7677_v33  ;;  %v7750_v32 = vld [vmem:[#allocation14 + $0x888] ss:$28 sps:$4 sm:$0xff]   ;;  %v7753_v33 = vld [vmem:[#allocation14 + $0x890] ss:$28 sps:$4 sm:$0xff]  }
 0x438   :  { %5744 = vmatpush1.bf16.msra.mxu1 %v7672_v34  ;;  %5916 = vmatpush1.bf16.msra.mxu0 %v7675_v37  ;;  %v7758_v34 = vld [vmem:[#allocation14 + $0x8c4] ss:$28 sps:$4 sm:$0xff]   ;;  %v7761_v37 = vld [vmem:[#allocation14 + $0x8cc] ss:$28 sps:$4 sm:$0xff]  }
 0x439   :  { %5745 = vmatprep.subr.bf16.mxu1 %v7680_v40  ;;  %5917 = vmatprep.subr.bf16.mxu0 %v7683_v41  ;;  %v7756_v40 = vld [vmem:[#allocation14 + $0x8c0] ss:$28 sps:$4 sm:$0xff]   ;;  %v7759_v41 = vld [vmem:[#allocation14 + $0x8c8] ss:$28 sps:$4 sm:$0xff]  }
 0x43c   :  { %5746 = vmatpush1.bf16.msra.mxu1 %v7678_v54  ;;  %5918 = vmatpush1.bf16.msra.mxu0 %v7681_v55  ;;  %v7764_v54 = vld [vmem:[#allocation14 + $0x8fc] ss:$28 sps:$4 sm:$0xff]   ;;  %v7767_v55 = vld [vmem:[#allocation14 + $0x904] ss:$28 sps:$4 sm:$0xff]  }
 0x43d   :  { %5747 = vmatprep.subr.bf16.mxu1 %v7686_v56  ;;  %5919 = vmatprep.subr.bf16.mxu0 %v7689_v57  ;;  %v7762_v56 = vld [vmem:[#allocation14 + $0x8f8] ss:$28 sps:$4 sm:$0xff]   ;;  %v7765_v57 = vld [vmem:[#allocation14 + $0x900] ss:$28 sps:$4 sm:$0xff]  }
 0x440   :  { %5748 = vmatpush1.bf16.msra.mxu1 %v7684_v59  ;;  %5920 = vmatpush1.bf16.msra.mxu0 %v7687_v60  ;;  %v7770_v59 = vld [vmem:[#allocation14 + $0x934] ss:$28 sps:$4 sm:$0xff]   ;;  %v7773_v60 = vld [vmem:[#allocation14 + $0x93c] ss:$28 sps:$4 sm:$0xff]  }
 0x441   :  { %5749 = vmatprep.subr.bf16.mxu1 %v7692_v61  ;;  %5921 = vmatprep.subr.bf16.mxu0 %v7695_v63  ;;  %v7768_v61 = vld [vmem:[#allocation14 + $0x930] ss:$28 sps:$4 sm:$0xff]   ;;  %v7771_v63 = vld [vmem:[#allocation14 + $0x938] ss:$28 sps:$4 sm:$0xff]  }
 0x444   :  { %5750 = vmatpush1.bf16.msra.mxu1 %v7690_v0  ;;  %5922 = vmatpush1.bf16.msra.mxu0 %v7693_v1  ;;  %v7776_v0 = vld [vmem:[#allocation14 + $0x96c] ss:$28 sps:$4 sm:$0xff]   ;;  %v7779_v1 = vld [vmem:[#allocation14 + $0x974] ss:$28 sps:$4 sm:$0xff]  }
 0x445   :  { %5751 = vmatprep.subr.bf16.mxu1 %v7698_v9  ;;  %5923 = vmatprep.subr.bf16.mxu0 %v7701_v10  ;;  %v7774_v9 = vld [vmem:[#allocation14 + $0x968] ss:$28 sps:$4 sm:$0xff]   ;;  %v7777_v10 = vld [vmem:[#allocation14 + $0x970] ss:$28 sps:$4 sm:$0xff]  }
 0x448   :  { %5752 = vmatpush1.bf16.msra.mxu1 %v7696_v11  ;;  %5924 = vmatpush1.bf16.msra.mxu0 %v7699_v12  ;;  %v7782_v11 = vld [vmem:[#allocation14 + $0x9a4] ss:$28 sps:$4 sm:$0xff]   ;;  %v7785_v12 = vld [vmem:[#allocation14 + $0x9ac] ss:$28 sps:$4 sm:$0xff]  }
 0x449   :  { %5753 = vmatprep.subr.bf16.mxu1 %v7704_v13  ;;  %5925 = vmatprep.subr.bf16.mxu0 %v7707_v14  ;;  %v1141_v13 = vsub.s32 4, %v8612_v43  ;;  %v7780_v14 = vld [vmem:[#allocation14 + $0x9a0] ss:$28 sps:$4 sm:$0xff]  }
 0x44c   :  { %5754 = vmatpush1.bf16.msra.mxu1 %v7702_v15  ;;  %5926 = vmatpush1.bf16.msra.mxu0 %v7705_v16  ;;  %v7783_v15 = vld [vmem:[#allocation14 + $0x9a8] ss:$28 sps:$4 sm:$0xff]   ;;  %v1149_v16 = vsub.s32 6, %v8612_v43 }
 0x44d   :  { %5766 = vmatprep.subr.bf16.mxu1 %v7710_v17  ;;  %5938 = vmatprep.subr.bf16.mxu0 %v7713_v18  ;;  %v1145_v17 = vsub.s32 5, %v8612_v43  ;;  %v7788_v18 = vld [vmem:[#allocation14 + $0x9dc] ss:$28 sps:$4 sm:$0xff]  }
 0x44f   :  { %5756 = vmatmul.mubr.bf16.vlgmr.msra.gmra.mrb[8].mxu1 %v8700_v3  ;;  %5928 = vmatmul.mubr.bf16.vlgmr.msra.gmra.mrb[20].mxu0 %v8700_v3 }
 0x450   :  { %5767 = vmatpush1.bf16.msra.mxu1 %v7708_v19  ;;  %5939 = vmatpush1.bf16.msra.mxu0 %v7711_v20  ;;  %v7791_v19 = vld [vmem:[#allocation14 + $0x9e4] ss:$28 sps:$4 sm:$0xff]   ;;  %v1153_v20 = vsub.s32 7, %v8612_v43 }
 0x451   :  { %5768 = vmatprep.subr.bf16.mxu1 %v7716_v21  ;;  %5940 = vmatprep.subr.bf16.mxu0 %v7719_v23  ;;  %v1142_v21 = vrot.slane %v8688_v27, %v1141_v13  ;;  %v1150_v23 = vrot.slane %v8688_v27, %v1149_v16 }
 0x454   :  { %5769 = vmatpush1.bf16.msra.mxu1 %v7714_v24  ;;  %5941 = vmatpush1.bf16.msra.mxu0 %v7717_v29  ;;  %v7786_v24 = vld [vmem:[#allocation14 + $0x9d8] ss:$28 sps:$4 sm:$0xff]   ;;  %v7789_v29 = vld [vmem:[#allocation14 + $0x9e0] ss:$28 sps:$4 sm:$0xff]  }
 0x455   :  { %5770 = vmatprep.subr.bf16.mxu1 %v7722_v25  ;;  %5942 = vmatprep.subr.bf16.mxu0 %v7725_v26  ;;  %v1146_v25 = vrot.slane %v8688_v27, %v1145_v17  ;;  %v1154_v26 = vrot.slane %v8688_v27, %v1153_v20  ;;  %v7804_v20 = vld [vmem:[#allocation14 + $0xa80] ss:$28 sps:$4 sm:$0xff]  }
 0x458   :  { %5771 = vmatpush1.bf16.msra.mxu1 %v7720_v30  ;;  %5943 = vmatpush1.bf16.msra.mxu0 %v7723_v31  ;;  %v7794_v30 = vld [vmem:[#allocation14 + $0xa14] ss:$28 sps:$4 sm:$0xff]   ;;  %v7797_v31 = vld [vmem:[#allocation14 + $0xa1c] ss:$28 sps:$4 sm:$0xff]  }
 0x459   :  { %5772 = vmatprep.subr.bf16.mxu1 %v7728_v35  ;;  %5944 = vmatprep.subr.bf16.mxu0 %v7731_v36 }
 0x45c   :  { %5773 = vmatpush1.bf16.msra.mxu1 %v7726_v38  ;;  %5945 = vmatpush1.bf16.msra.mxu0 %v7729_v4 }
 0x45d   :  { %5774 = vmatprep.subr.bf16.mxu1 %v7734_v39  ;;  %5946 = vmatprep.subr.bf16.mxu0 %v7737_v58  ;;  %v7792_v39 = vld [vmem:[#allocation14 + $0xa10] ss:$28 sps:$4 sm:$0xff]  }
 0x460   :  { %5775 = vmatpush1.bf16.msra.mxu1 %v7732_v28  ;;  %5947 = vmatpush1.bf16.msra.mxu0 %v7735_v42 }
 0x461   :  { %5776 = vmatprep.subr.bf16.mxu1 %v7740_v44  ;;  %5948 = vmatprep.subr.bf16.mxu0 %v7743_v45  ;;  %v7795_v45 = vld [vmem:[#allocation14 + $0xa18] ss:$28 sps:$4 sm:$0xff]  }
 0x464   :  { %5777 = vmatpush1.bf16.msra.mxu1 %v7738_v46  ;;  %5949 = vmatpush1.bf16.msra.mxu0 %v7741_v47  ;;  %v7800_v46 = vld [vmem:[#allocation14 + $0xa4c] ss:$28 sps:$4 sm:$0xff]  }
 0x465   :  { %5778 = vmatprep.subr.bf16.mxu1 %v7746_v49  ;;  %5950 = vmatprep.subr.bf16.mxu0 %v7749_v62 }
 0x468   :  { %5779 = vmatpush1.bf16.msra.mxu1 %v7744_v50  ;;  %5951 = vmatpush1.bf16.msra.mxu0 %v7747_v52  ;;  %v7803_v52 = vld [vmem:[#allocation14 + $0xa54] ss:$28 sps:$4 sm:$0xff]  }
 0x469   :  { %5780 = vmatprep.subr.bf16.mxu1 %v7752_v53  ;;  %5952 = vmatprep.subr.bf16.mxu0 %v7755_v22 }
 0x46c   :  { %5781 = vmatpush1.bf16.msra.mxu1 %v7750_v32  ;;  %5953 = vmatpush1.bf16.msra.mxu0 %v7753_v33 }
 0x46d   :  { %5782 = vmatprep.subr.bf16.mxu1 %v7758_v34  ;;  %5954 = vmatprep.subr.bf16.mxu0 %v7761_v37 }
 0x470   :  { %5783 = vmatpush1.bf16.msra.mxu1 %v7756_v40  ;;  %5955 = vmatpush1.bf16.msra.mxu0 %v7759_v41 }
 0x471   :  { %5784 = vmatprep.subr.bf16.mxu1 %v7764_v54  ;;  %5956 = vmatprep.subr.bf16.mxu0 %v7767_v55  ;;  %v7798_v54 = vld [vmem:[#allocation14 + $0xa48] ss:$28 sps:$4 sm:$0xff]  }
 0x474   :  { %5785 = vmatpush1.bf16.msra.mxu1 %v7762_v56  ;;  %5957 = vmatpush1.bf16.msra.mxu0 %v7765_v57  ;;  %v7801_v57 = vld [vmem:[#allocation14 + $0xa50] ss:$28 sps:$4 sm:$0xff]  }
 0x475   :  { %5786 = vmatprep.subr.bf16.mxu1 %v7770_v59  ;;  %5958 = vmatprep.subr.bf16.mxu0 %v7773_v60 }
 0x478   :  { %5787 = vmatpush1.bf16.msra.mxu1 %v7768_v61  ;;  %5959 = vmatpush1.bf16.msra.mxu0 %v7771_v63  ;;  %v7806_v63 = vld [vmem:[#allocation14 + $0xa84] ss:$28 sps:$4 sm:$0xff]  }
 0x479   :  { %5788 = vmatprep.subr.bf16.mxu1 %v7776_v0  ;;  %5960 = vmatprep.subr.bf16.mxu0 %v7779_v1  ;;  %v7809_v0 = vld [vmem:[#allocation14 + $0xa8c] ss:$28 sps:$4 sm:$0xff]  }
 0x47c   :  { %5789 = vmatpush1.bf16.msra.mxu1 %v7774_v9  ;;  %5961 = vmatpush1.bf16.msra.mxu0 %v7777_v10 }
 0x47d   :  { %5790 = vmatprep.subr.bf16.mxu1 %v7782_v11  ;;  %5962 = vmatprep.subr.bf16.mxu0 %v7785_v12 }
 0x480   :  { %5791 = vmatpush1.bf16.msra.mxu1 %v7780_v14  ;;  %5963 = vmatpush1.bf16.msra.mxu0 %v7783_v15 }
 0x481   :  { %5792 = vmatprep.subr.bf16.mxu1 %v7788_v18  ;;  %5964 = vmatprep.subr.bf16.mxu0 %v7791_v19 }
 0x482   :  { %v2692_v35 = vpop.f32.mrb[4].mxu1 }
 0x483   :  { %v7295_v36 = vadd.f32 %v2692_v35, %v1142_v21  ;;  %v2778_v38 = vpop.f32.mrb[16].mxu0  ;;  %v2694_v4 = vpop.f32.mrb[5].mxu1  ;;  %v7816_v35 = vld [vmem:[#allocation14 + $0xaf0] ss:$28 sps:$4 sm:$0xff]  }
 0x484   :  { %v7299_v58 = vadd.f32 %v2778_v38, %v1150_v23  ;;  %v7296_v28 = vadd.f32 %v2694_v4, %v1146_v25  ;;  %v2780_v42 = vpop.f32.mrb[17].mxu0  ;;  %5793 = vmatpush1.bf16.msra.mxu1 %v7786_v24  ;;  %5965 = vmatpush1.bf16.msra.mxu0 %v7789_v29  ;;  %v2696_v44 = vpop.f32.mrb[6].mxu1  ;;  %v7812_v24 = vld [vmem:[#allocation14 + $0xabc] ss:$28 sps:$4 sm:$0xff]   ;;  %v7815_v29 = vld [vmem:[#allocation14 + $0xac4] ss:$28 sps:$4 sm:$0xff]  }
 0x485   :  { %v2791_v47 = vmul.f32 0.2, %v7295_v36  ;;  %v7300_v49 = vadd.f32 %v2780_v42, %v1154_v26  ;;  %v7297_v62 = vadd.f32 %v2696_v44, %v1142_v21  ;;  %v2782_v50 = vpop.f32.mrb[18].mxu0  ;;  %v2698_v27 = vpop.f32.mrb[7].mxu1  ;;  %5794 = vmatprep.subr.bf16.mxu1 %v7794_v30  ;;  %5966 = vmatprep.subr.bf16.mxu0 %v7797_v31  ;;  %v7807_v21 = vld [vmem:[#allocation14 + $0xa88] ss:$28 sps:$4 sm:$0xff]  }
 0x486   :  { %v2793_v53 = vmul.f32 0.2, %v7299_v58  ;;  %v2792_v22 = vmul.f32 0.2, %v7296_v28  ;;  %v7301_v32 = vadd.f32 %v2782_v50, %v1150_v23  ;;  %v7298_v33 = vadd.f32 %v2698_v27, %v1146_v25  ;;  %v2784_v34 = vpop.f32.mrb[19].mxu0 }
 0x487   :  { %v2794_v37 = vmul.f32 0.2, %v7300_v49  ;;  %v2799_v40 = vmul.f32 0.2, %v7297_v62  ;;  %v7302_v41 = vadd.f32 %v2784_v34, %v1154_v26  ;;  %v2807_v59 = vmax.f32 %v7295_v36, %v2791_v47  ;;  %v7810_v25 = vld [vmem:[#allocation14 + $0xab8] ss:$28 sps:$4 sm:$0xff]  }
 0x488   :  { %v2801_v55 = vmul.f32 0.2, %v7301_v32  ;;  %v2800_v56 = vmul.f32 0.2, %v7298_v33  ;;  %5795 = vmatpush1.bf16.msra.mxu1 %v7792_v39  ;;  %5967 = vmatpush1.bf16.msra.mxu0 %v7795_v45  ;;  %v2809_v1 = vmax.f32 %v7299_v58, %v2793_v53  ;;  %v2808_v9 = vmax.f32 %v7296_v28, %v2792_v22  ;;  %v7813_v26 = vld [vmem:[#allocation14 + $0xac0] ss:$28 sps:$4 sm:$0xff]  }
 0x489   :  { %v2815_v60 = vmax.f32 %v7297_v62, %v2799_v40  ;;  %v2802_v61 = vmul.f32 0.2, %v7302_v41  ;;  %5796 = vmatprep.subr.bf16.mxu1 %v7800_v46  ;;  %5968 = vmatprep.subr.bf16.mxu0 %v7803_v52  ;;  %v2810_v12 = vmax.f32 %v7300_v49, %v2794_v37  ;;  %v7818_v30 = vld [vmem:[#allocation14 + $0xaf4] ss:$28 sps:$4 sm:$0xff]   ;;  %v7821_v31 = vld [vmem:[#allocation14 + $0xafc] ss:$28 sps:$4 sm:$0xff]  }
 0x48a   :  { %v2817_v10 = vmax.f32 %v7301_v32, %v2801_v55  ;;  %v2816_v11 = vmax.f32 %v7298_v33, %v2800_v56  ;;  %v7819_v36 = vld [vmem:[#allocation14 + $0xaf8] ss:$28 sps:$4 sm:$0xff]   ;;  %v7824_v38 = vld [vmem:[#allocation14 + $0xb2c] ss:$28 sps:$4 sm:$0xff]   ;;  %v7830_v28 = vld [vmem:[#allocation14 + $0xb64] ss:$28 sps:$4 sm:$0xff]  }
 0x48b   :  { %v8728_v14 = vpack.c.bf16 %v2815_v60, %v2807_v59  ;;  %v2818_v15 = vmax.f32 %v7302_v41, %v2802_v61  ;;  %v7827_v4 = vld [vmem:[#allocation14 + $0xb34] ss:$28 sps:$4 sm:$0xff]   ;;  %v7822_v39 = vld [vmem:[#allocation14 + $0xb28] ss:$28 sps:$4 sm:$0xff]   ;;  %v7828_v44 = vld [vmem:[#allocation14 + $0xb60] ss:$28 sps:$4 sm:$0xff]  }
 0x48c   :  { %v8730_v18 = vpack.c.bf16 %v2817_v10, %v2809_v1  ;;  %v8732_v19 = vpack.c.bf16 %v2816_v11, %v2808_v9  ;;  %5797 = vmatpush1.bf16.msra.mxu1 %v7798_v54  ;;  %5969 = vmatpush1.bf16.msra.mxu0 %v7801_v57  ;;  %v7825_v58 = vld [vmem:[#allocation14 + $0xb30] ss:$28 sps:$4 sm:$0xff]   ;;  %v7831_v45 = vld [vmem:[#allocation14 + $0xb68] ss:$28 sps:$4 sm:$0xff]   ;;  %v7836_v46 = vld [vmem:[#allocation14 + $0xb9c] ss:$28 sps:$4 sm:$0xff]  }
 0x48d   :  { %v8734_v23 = vpack.c.bf16 %v2818_v15, %v2810_v12  ;;  %5809 = vmatprep.subr.bf16.mxu1 %v7806_v63  ;;  %5981 = vmatprep.subr.bf16.mxu0 %v7809_v0  ;;  %v7833_v42 = vld [vmem:[#allocation14 + $0xb6c] ss:$28 sps:$4 sm:$0xff]   ;;  %v7839_v47 = vld [vmem:[#allocation14 + $0xba4] ss:$28 sps:$4 sm:$0xff]   ;;  %v7834_v49 = vld [vmem:[#allocation14 + $0xb98] ss:$28 sps:$4 sm:$0xff]  }
 0x48e   :  { %5798 = vmatprep.mubr.bf16.mxu1 %v8732_v19  ;;  %5970 = vmatprep.mubr.bf16.mxu0 %v8732_v19  ;;  %v7837_v62 = vld [vmem:[#allocation14 + $0xba0] ss:$28 sps:$4 sm:$0xff]   ;;  %v7842_v50 = vld [vmem:[#allocation14 + $0xbd4] ss:$28 sps:$4 sm:$0xff]   ;;  %v7848_v22 = vld [vmem:[#allocation14 + $0xc0c] ss:$28 sps:$4 sm:$0xff]  }
 0x48f   :  { %5799 = vmatmul.mubr.bf16.vlgmr.msra.gmra.mrb[8].mxu1 %v8728_v14  ;;  %5971 = vmatmul.mubr.bf16.vlgmr.msra.gmra.mrb[20].mxu0 %v8728_v14  ;;  %v7845_v27 = vld [vmem:[#allocation14 + $0xbdc] ss:$28 sps:$4 sm:$0xff]   ;;  %v7840_v52 = vld [vmem:[#allocation14 + $0xbd0] ss:$28 sps:$4 sm:$0xff]   ;;  %v7846_v33 = vld [vmem:[#allocation14 + $0xc08] ss:$28 sps:$4 sm:$0xff]  }
 0x490   :  { %5810 = vmatpush1.bf16.msra.mxu1 %v7804_v20  ;;  %5982 = vmatpush1.bf16.msra.mxu0 %v7807_v21  ;;  %v7843_v53 = vld [vmem:[#allocation14 + $0xbd8] ss:$28 sps:$4 sm:$0xff]   ;;  %v7849_v34 = vld [vmem:[#allocation14 + $0xc10] ss:$28 sps:$4 sm:$0xff]   ;;  %v7854_v37 = vld [vmem:[#allocation14 + $0xc44] ss:$28 sps:$4 sm:$0xff]  }
 0x491   :  { %5841 = vmatprep.mubr.bf16.mxu1 %v8734_v23  ;;  %6013 = vmatprep.mubr.bf16.mxu0 %v8734_v23  ;;  %v7851_v32 = vld [vmem:[#allocation14 + $0xc14] ss:$28 sps:$4 sm:$0xff]   ;;  %v7857_v40 = vld [vmem:[#allocation14 + $0xc4c] ss:$28 sps:$4 sm:$0xff]   ;;  %v7852_v41 = vld [vmem:[#allocation14 + $0xc40] ss:$28 sps:$4 sm:$0xff]  }
 0x492   :  { %5811 = vmatprep.subr.bf16.mxu1 %v7812_v24  ;;  %5983 = vmatprep.subr.bf16.mxu0 %v7815_v29  ;;  %v7855_v54 = vld [vmem:[#allocation14 + $0xc48] ss:$28 sps:$4 sm:$0xff]   ;;  %v7860_v55 = vld [vmem:[#allocation14 + $0xc7c] ss:$28 sps:$4 sm:$0xff]   ;;  %v7866_v60 = vld [vmem:[#allocation14 + $0xcb4] ss:$28 sps:$4 sm:$0xff]  }
 0x493   :  { %v7863_v56 = vld [vmem:[#allocation14 + $0xc84] ss:$28 sps:$4 sm:$0xff]   ;;  %v7858_v57 = vld [vmem:[#allocation14 + $0xc78] ss:$28 sps:$4 sm:$0xff]   ;;  %v7864_v63 = vld [vmem:[#allocation14 + $0xcb0] ss:$28 sps:$4 sm:$0xff]  }
 0x494   :  { %5812 = vmatpush1.bf16.msra.mxu1 %v7810_v25  ;;  %5984 = vmatpush1.bf16.msra.mxu0 %v7813_v26  ;;  %v7861_v59 = vld [vmem:[#allocation14 + $0xc80] ss:$28 sps:$4 sm:$0xff]   ;;  %v7867_v0 = vld [vmem:[#allocation14 + $0xcb8] ss:$28 sps:$4 sm:$0xff]   ;;  %v7872_v1 = vld [vmem:[#allocation14 + $0xcec] ss:$28 sps:$4 sm:$0xff]  }
 0x495   :  { %5813 = vmatprep.subr.bf16.mxu1 %v7818_v30  ;;  %5985 = vmatprep.subr.bf16.mxu0 %v7821_v31  ;;  %v7869_v61 = vld [vmem:[#allocation14 + $0xcbc] ss:$28 sps:$4 sm:$0xff]   ;;  %v7875_v9 = vld [vmem:[#allocation14 + $0xcf4] ss:$28 sps:$4 sm:$0xff]   ;;  %v7870_v10 = vld [vmem:[#allocation14 + $0xce8] ss:$28 sps:$4 sm:$0xff]  }
 0x496   :  { %v7873_v11 = vld [vmem:[#allocation14 + $0xcf0] ss:$28 sps:$4 sm:$0xff]   ;;  %v7878_v12 = vld [vmem:[#allocation14 + $0xd24] ss:$28 sps:$4 sm:$0xff]   ;;  %v7884_v24 = vld [vmem:[#allocation14 + $0xd5c] ss:$28 sps:$4 sm:$0xff]  }
 0x497   :  { %v7881_v15 = vld [vmem:[#allocation14 + $0xd2c] ss:$28 sps:$4 sm:$0xff]   ;;  %v7876_v20 = vld [vmem:[#allocation14 + $0xd20] ss:$28 sps:$4 sm:$0xff]   ;;  %v7882_v25 = vld [vmem:[#allocation14 + $0xd58] ss:$28 sps:$4 sm:$0xff]  }
 0x498   :  { %5814 = vmatpush1.bf16.msra.mxu1 %v7816_v35  ;;  %5986 = vmatpush1.bf16.msra.mxu0 %v7819_v36  ;;  %v7879_v21 = vld [vmem:[#allocation14 + $0xd28] ss:$28 sps:$4 sm:$0xff]   ;;  %v7885_v26 = vld [vmem:[#allocation14 + $0xd60] ss:$28 sps:$4 sm:$0xff]   ;;  %v7890_v30 = vld [vmem:[#allocation14 + $0xd94] ss:$28 sps:$4 sm:$0xff]  }
 0x499   :  { %5815 = vmatprep.subr.bf16.mxu1 %v7824_v38  ;;  %5987 = vmatprep.subr.bf16.mxu0 %v7827_v4  ;;  %v7887_v29 = vld [vmem:[#allocation14 + $0xd64] ss:$28 sps:$4 sm:$0xff]   ;;  %v7893_v31 = vld [vmem:[#allocation14 + $0xd9c] ss:$28 sps:$4 sm:$0xff]   ;;  %v7888_v35 = vld [vmem:[#allocation14 + $0xd90] ss:$28 sps:$4 sm:$0xff]  }
 0x49a   :  { %v7891_v36 = vld [vmem:[#allocation14 + $0xd98] ss:$28 sps:$4 sm:$0xff]   ;;  %v7896_v38 = vld [vmem:[#allocation14 + $0xdcc] ss:$28 sps:$4 sm:$0xff]  }
 0x49b   :  { %v7899_v4 = vld [vmem:[#allocation14 + $0xdd4] ss:$28 sps:$4 sm:$0xff]  }
 0x49c   :  { %5816 = vmatpush1.bf16.msra.mxu1 %v7822_v39  ;;  %5988 = vmatpush1.bf16.msra.mxu0 %v7825_v58  ;;  %v7894_v39 = vld [vmem:[#allocation14 + $0xdc8] ss:$28 sps:$4 sm:$0xff]   ;;  %v7897_v58 = vld [vmem:[#allocation14 + $0xdd0] ss:$28 sps:$4 sm:$0xff]  }
 0x49d   :  { %5817 = vmatprep.subr.bf16.mxu1 %v7830_v28  ;;  %5989 = vmatprep.subr.bf16.mxu0 %v7833_v42  ;;  %v7902_v28 = vld [vmem:[#allocation14 + $0x14] ss:$28 sps:$4 sm:$0xff]  }
 0x49e   :  { %v7903_v42 = vld [vmem:[#allocation14 + $0x558] ss:$28 sps:$4 sm:$0xff]  }
 0x4a0   :  { %5818 = vmatpush1.bf16.msra.mxu1 %v7828_v44  ;;  %5990 = vmatpush1.bf16.msra.mxu0 %v7831_v45  ;;  %v7900_v44 = vld [vmem:[#allocation14 + $0x10] ss:$28 sps:$4 sm:$0xff]   ;;  %v7904_v45 = vld [vmem:[#allocation14 + $0x398] ss:$28 sps:$4 sm:$0xff]  }
 0x4a1   :  { %5819 = vmatprep.subr.bf16.mxu1 %v7836_v46  ;;  %5991 = vmatprep.subr.bf16.mxu0 %v7839_v47  ;;  %v7907_v46 = vld [vmem:[#allocation14 + $0x4c] ss:$28 sps:$4 sm:$0xff]  }
 0x4a2   :  { %v7908_v47 = vld [vmem:[#allocation14 + $0x590] ss:$28 sps:$4 sm:$0xff]  }
 0x4a4   :  { %5820 = vmatpush1.bf16.msra.mxu1 %v7834_v49  ;;  %5992 = vmatpush1.bf16.msra.mxu0 %v7837_v62  ;;  %v7905_v49 = vld [vmem:[#allocation14 + $0x48] ss:$28 sps:$4 sm:$0xff]   ;;  %v7909_v62 = vld [vmem:[#allocation14 + $0x3d0] ss:$28 sps:$4 sm:$0xff]  }
 0x4a5   :  { %5821 = vmatprep.subr.bf16.mxu1 %v7842_v50  ;;  %5993 = vmatprep.subr.bf16.mxu0 %v7845_v27  ;;  %v7912_v50 = vld [vmem:[#allocation14 + $0x84] ss:$28 sps:$4 sm:$0xff]  }
 0x4a6   :  { %v7913_v27 = vld [vmem:[#allocation14 + $0x5c8] ss:$28 sps:$4 sm:$0xff]  }
 0x4a8   :  { %5822 = vmatpush1.bf16.msra.mxu1 %v7840_v52  ;;  %5994 = vmatpush1.bf16.msra.mxu0 %v7843_v53  ;;  %v7910_v52 = vld [vmem:[#allocation14 + $0x80] ss:$28 sps:$4 sm:$0xff]   ;;  %v7914_v53 = vld [vmem:[#allocation14 + $0x408] ss:$28 sps:$4 sm:$0xff]  }
 0x4a9   :  { %5823 = vmatprep.subr.bf16.mxu1 %v7848_v22  ;;  %5995 = vmatprep.subr.bf16.mxu0 %v7851_v32  ;;  %v7917_v22 = vld [vmem:[#allocation14 + $0xbc] ss:$28 sps:$4 sm:$0xff]  }
 0x4aa   :  { %v7918_v32 = vld [vmem:[#allocation14 + $0x600] ss:$28 sps:$4 sm:$0xff]  }
 0x4ac   :  { %5824 = vmatpush1.bf16.msra.mxu1 %v7846_v33  ;;  %5996 = vmatpush1.bf16.msra.mxu0 %v7849_v34  ;;  %v7915_v33 = vld [vmem:[#allocation14 + $0xb8] ss:$28 sps:$4 sm:$0xff]   ;;  %v7919_v34 = vld [vmem:[#allocation14 + $0x440] ss:$28 sps:$4 sm:$0xff]  }
 0x4ad   :  { %5825 = vmatprep.subr.bf16.mxu1 %v7854_v37  ;;  %5997 = vmatprep.subr.bf16.mxu0 %v7857_v40  ;;  %v7922_v37 = vld [vmem:[#allocation14 + $0xf4] ss:$28 sps:$4 sm:$0xff]  }
 0x4ae   :  { %v7923_v40 = vld [vmem:[#allocation14 + $0x638] ss:$28 sps:$4 sm:$0xff]  }
 0x4b0   :  { %5826 = vmatpush1.bf16.msra.mxu1 %v7852_v41  ;;  %5998 = vmatpush1.bf16.msra.mxu0 %v7855_v54  ;;  %v7920_v41 = vld [vmem:[#allocation14 + $0xf0] ss:$28 sps:$4 sm:$0xff]   ;;  %v7924_v54 = vld [vmem:[#allocation14 + $0x478] ss:$28 sps:$4 sm:$0xff]  }
 0x4b1   :  { %5827 = vmatprep.subr.bf16.mxu1 %v7860_v55  ;;  %5999 = vmatprep.subr.bf16.mxu0 %v7863_v56  ;;  %v7927_v55 = vld [vmem:[#allocation14 + $0x12c] ss:$28 sps:$4 sm:$0xff]  }
 0x4b2   :  { %v7928_v56 = vld [vmem:[#allocation14 + $0x670] ss:$28 sps:$4 sm:$0xff]  }
 0x4b4   :  { %5828 = vmatpush1.bf16.msra.mxu1 %v7858_v57  ;;  %6000 = vmatpush1.bf16.msra.mxu0 %v7861_v59  ;;  %v7925_v57 = vld [vmem:[#allocation14 + $0x128] ss:$28 sps:$4 sm:$0xff]   ;;  %v7929_v59 = vld [vmem:[#allocation14 + $0x4b0] ss:$28 sps:$4 sm:$0xff]  }
 0x4b5   :  { %5829 = vmatprep.subr.bf16.mxu1 %v7866_v60  ;;  %6001 = vmatprep.subr.bf16.mxu0 %v7869_v61  ;;  %v7932_v60 = vld [vmem:[#allocation14 + $0x164] ss:$28 sps:$4 sm:$0xff]  }
 0x4b6   :  { %v7933_v61 = vld [vmem:[#allocation14 + $0x6a8] ss:$28 sps:$4 sm:$0xff]  }
 0x4b8   :  { %5830 = vmatpush1.bf16.msra.mxu1 %v7864_v63  ;;  %6002 = vmatpush1.bf16.msra.mxu0 %v7867_v0  ;;  %v7930_v63 = vld [vmem:[#allocation14 + $0x160] ss:$28 sps:$4 sm:$0xff]   ;;  %v7934_v0 = vld [vmem:[#allocation14 + $0x4e8] ss:$28 sps:$4 sm:$0xff]  }
 0x4b9   :  { %5831 = vmatprep.subr.bf16.mxu1 %v7872_v1  ;;  %6003 = vmatprep.subr.bf16.mxu0 %v7875_v9  ;;  %v7937_v1 = vld [vmem:[#allocation14 + $0x19c] ss:$28 sps:$4 sm:$0xff]  }
 0x4ba   :  { %v7938_v9 = vld [vmem:[#allocation14 + $0x6e0] ss:$28 sps:$4 sm:$0xff]  }
 0x4bc   :  { %5832 = vmatpush1.bf16.msra.mxu1 %v7870_v10  ;;  %6004 = vmatpush1.bf16.msra.mxu0 %v7873_v11  ;;  %v7935_v10 = vld [vmem:[#allocation14 + $0x198] ss:$28 sps:$4 sm:$0xff]   ;;  %v7939_v11 = vld [vmem:[#allocation14 + $0x520] ss:$28 sps:$4 sm:$0xff]  }
 0x4bd   :  { %5833 = vmatprep.subr.bf16.mxu1 %v7878_v12  ;;  %6005 = vmatprep.subr.bf16.mxu0 %v7881_v15  ;;  %v7942_v12 = vld [vmem:[#allocation14 + $0x1d4] ss:$28 sps:$4 sm:$0xff]  }
 0x4be   :  { %v7943_v15 = vld [vmem:[#allocation14 + $0x8d8] ss:$28 sps:$4 sm:$0xff]  }
 0x4c0   :  { %5834 = vmatpush1.bf16.msra.mxu1 %v7876_v20  ;;  %6006 = vmatpush1.bf16.msra.mxu0 %v7879_v21  ;;  %v7940_v20 = vld [vmem:[#allocation14 + $0x1d0] ss:$28 sps:$4 sm:$0xff]   ;;  %v7944_v21 = vld [vmem:[#allocation14 + $0x718] ss:$28 sps:$4 sm:$0xff]  }
 0x4c1   :  { %5835 = vmatprep.subr.bf16.mxu1 %v7884_v24  ;;  %6007 = vmatprep.subr.bf16.mxu0 %v7887_v29  ;;  %v7947_v24 = vld [vmem:[#allocation14 + $0x20c] ss:$28 sps:$4 sm:$0xff]  }
 0x4c2   :  { %v7948_v29 = vld [vmem:[#allocation14 + $0x910] ss:$28 sps:$4 sm:$0xff]  }
 0x4c4   :  { %5836 = vmatpush1.bf16.msra.mxu1 %v7882_v25  ;;  %6008 = vmatpush1.bf16.msra.mxu0 %v7885_v26  ;;  %v7945_v25 = vld [vmem:[#allocation14 + $0x208] ss:$28 sps:$4 sm:$0xff]   ;;  %v7949_v26 = vld [vmem:[#allocation14 + $0x750] ss:$28 sps:$4 sm:$0xff]  }
 0x4c5   :  { %5837 = vmatprep.subr.bf16.mxu1 %v7890_v30  ;;  %6009 = vmatprep.subr.bf16.mxu0 %v7893_v31  ;;  %v7952_v30 = vld [vmem:[#allocation14 + $0x244] ss:$28 sps:$4 sm:$0xff]  }
 0x4c6   :  { %v7953_v31 = vld [vmem:[#allocation14 + $0x948] ss:$28 sps:$4 sm:$0xff]  }
 0x4c8   :  { %5838 = vmatpush1.bf16.msra.mxu1 %v7888_v35  ;;  %6010 = vmatpush1.bf16.msra.mxu0 %v7891_v36  ;;  %v7950_v35 = vld [vmem:[#allocation14 + $0x240] ss:$28 sps:$4 sm:$0xff]   ;;  %v7954_v36 = vld [vmem:[#allocation14 + $0x788] ss:$28 sps:$4 sm:$0xff]  }
 0x4c9   :  { %5839 = vmatprep.subr.bf16.mxu1 %v7896_v38  ;;  %6011 = vmatprep.subr.bf16.mxu0 %v7899_v4  ;;  %v7957_v38 = vld [vmem:[#allocation14 + $0x27c] ss:$28 sps:$4 sm:$0xff]  }
 0x4ca   :  { %v7958_v4 = vld [vmem:[#allocation14 + $0x980] ss:$28 sps:$4 sm:$0xff]  }
 0x4cc   :  { %5840 = vmatpush1.bf16.msra.mxu1 %v7894_v39  ;;  %6012 = vmatpush1.bf16.msra.mxu0 %v7897_v58  ;;  %v7955_v39 = vld [vmem:[#allocation14 + $0x278] ss:$28 sps:$4 sm:$0xff]   ;;  %v7959_v58 = vld [vmem:[#allocation14 + $0x7c0] ss:$28 sps:$4 sm:$0xff]  }
 0x4cd   :  { %6024 = vmatprep.subr.bf16.mxu1 %v7902_v28  ;;  %7221 = vmatprep.subr.bf16.mxu0 %v7903_v42  ;;  %v7962_v28 = vld [vmem:[#allocation14 + $0x2b4] ss:$28 sps:$4 sm:$0xff]  }
 0x4ce   :  { %v7963_v42 = vld [vmem:[#allocation14 + $0x9b8] ss:$28 sps:$4 sm:$0xff]  }
 0x4cf   :  { %5842 = vmatmul.mubr.bf16.vlgmr.msra.gmra.mrb[8].mxu1 %v8730_v18  ;;  %6014 = vmatmul.mubr.bf16.vlgmr.msra.gmra.mrb[20].mxu0 %v8730_v18 }
 0x4d0   :  { %6025 = vmatpush1.bf16.msra.mxu1 %v7900_v44  ;;  %6056 = vmatprep.mubr.bf16.mxu1 %v8702_v6  ;;  %v7960_v44 = vld [vmem:[#allocation14 + $0x2b0] ss:$28 sps:$4 sm:$0xff]  }
 0x4d1   :  { %7222 = vmatpush3.bf16.msra.mxu0 %v7904_v45  ;;  %6269 = vmatprep.mubr.bf16.mxu0 %v8704_v7  ;;  %v7964_v45 = vld [vmem:[#allocation14 + $0x7f8] ss:$28 sps:$4 sm:$0xff]  }
 0x4d2   :  { %6026 = vmatprep.subr.bf16.mxu1 %v7907_v46  ;;  %7223 = vmatprep.subr.bf16.mxu0 %v7908_v47  ;;  %v7967_v46 = vld [vmem:[#allocation14 + $0x2ec] ss:$28 sps:$4 sm:$0xff]  }
 0x4d3   :  { %v7968_v47 = vld [vmem:[#allocation14 + $0x9f0] ss:$28 sps:$4 sm:$0xff]  }
 0x4d4   :  { %6027 = vmatpush1.bf16.msra.mxu1 %v7905_v49  ;;  %v7965_v49 = vld [vmem:[#allocation14 + $0x2e8] ss:$28 sps:$4 sm:$0xff]  }
 0x4d5   :  { %7224 = vmatpush3.bf16.msra.mxu0 %v7909_v62  ;;  %6028 = vmatprep.subr.bf16.mxu1 %v7912_v50  ;;  %v7969_v62 = vld [vmem:[#allocation14 + $0x830] ss:$28 sps:$4 sm:$0xff]   ;;  %v7972_v50 = vld [vmem:[#allocation14 + $0x324] ss:$28 sps:$4 sm:$0xff]  }
 0x4d6   :  { %7225 = vmatprep.subr.bf16.mxu0 %v7913_v27  ;;  %v7973_v27 = vld [vmem:[#allocation14 + $0xa28] ss:$28 sps:$4 sm:$0xff]  }
 0x4d8   :  { %6029 = vmatpush1.bf16.msra.mxu1 %v7910_v52  ;;  %v7970_v52 = vld [vmem:[#allocation14 + $0x320] ss:$28 sps:$4 sm:$0xff]  }
 0x4d9   :  { %7226 = vmatpush3.bf16.msra.mxu0 %v7914_v53  ;;  %6030 = vmatprep.subr.bf16.mxu1 %v7917_v22  ;;  %v7974_v53 = vld [vmem:[#allocation14 + $0x868] ss:$28 sps:$4 sm:$0xff]   ;;  %v7977_v22 = vld [vmem:[#allocation14 + $0x35c] ss:$28 sps:$4 sm:$0xff]  }
 0x4da   :  { %7227 = vmatprep.subr.bf16.mxu0 %v7918_v32  ;;  %v7978_v32 = vld [vmem:[#allocation14 + $0xa60] ss:$28 sps:$4 sm:$0xff]  }
 0x4dc   :  { %6031 = vmatpush1.bf16.msra.mxu1 %v7915_v33  ;;  %v7975_v33 = vld [vmem:[#allocation14 + $0x358] ss:$28 sps:$4 sm:$0xff]  }
 0x4dd   :  { %7228 = vmatpush3.bf16.msra.mxu0 %v7919_v34  ;;  %6032 = vmatprep.subr.bf16.mxu1 %v7922_v37  ;;  %v7979_v34 = vld [vmem:[#allocation14 + $0x8a0] ss:$28 sps:$4 sm:$0xff]   ;;  %v7982_v37 = vld [vmem:[#allocation14 + $0x394] ss:$28 sps:$4 sm:$0xff]  }
 0x4de   :  { %7229 = vmatprep.subr.bf16.mxu0 %v7923_v40  ;;  %v7983_v40 = vld [vmem:[#allocation14 + $0xc58] ss:$28 sps:$4 sm:$0xff]  }
 0x4e0   :  { %6033 = vmatpush1.bf16.msra.mxu1 %v7920_v41  ;;  %v7980_v41 = vld [vmem:[#allocation14 + $0x390] ss:$28 sps:$4 sm:$0xff]  }
 0x4e1   :  { %7230 = vmatpush3.bf16.msra.mxu0 %v7924_v54  ;;  %6034 = vmatprep.subr.bf16.mxu1 %v7927_v55  ;;  %v7984_v54 = vld [vmem:[#allocation14 + $0xa98] ss:$28 sps:$4 sm:$0xff]   ;;  %v7987_v55 = vld [vmem:[#allocation14 + $0x3cc] ss:$28 sps:$4 sm:$0xff]  }
 0x4e2   :  { %7231 = vmatprep.subr.bf16.mxu0 %v7928_v56  ;;  %v7988_v56 = vld [vmem:[#allocation14 + $0xc90] ss:$28 sps:$4 sm:$0xff]  }
 0x4e4   :  { %6035 = vmatpush1.bf16.msra.mxu1 %v7925_v57  ;;  %v7985_v57 = vld [vmem:[#allocation14 + $0x3c8] ss:$28 sps:$4 sm:$0xff]  }
 0x4e5   :  { %7232 = vmatpush3.bf16.msra.mxu0 %v7929_v59  ;;  %6036 = vmatprep.subr.bf16.mxu1 %v7932_v60  ;;  %v7989_v59 = vld [vmem:[#allocation14 + $0xad0] ss:$28 sps:$4 sm:$0xff]   ;;  %v7992_v60 = vld [vmem:[#allocation14 + $0x404] ss:$28 sps:$4 sm:$0xff]  }
 0x4e6   :  { %7233 = vmatprep.subr.bf16.mxu0 %v7933_v61  ;;  %v7993_v61 = vld [vmem:[#allocation14 + $0xcc8] ss:$28 sps:$4 sm:$0xff]  }
 0x4e8   :  { %6037 = vmatpush1.bf16.msra.mxu1 %v7930_v63  ;;  %v7990_v63 = vld [vmem:[#allocation14 + $0x400] ss:$28 sps:$4 sm:$0xff]  }
 0x4e9   :  { %7234 = vmatpush3.bf16.msra.mxu0 %v7934_v0  ;;  %6038 = vmatprep.subr.bf16.mxu1 %v7937_v1  ;;  %v7994_v0 = vld [vmem:[#allocation14 + $0xb08] ss:$28 sps:$4 sm:$0xff]   ;;  %v7997_v1 = vld [vmem:[#allocation14 + $0x43c] ss:$28 sps:$4 sm:$0xff]  }
 0x4ea   :  { %7235 = vmatprep.subr.bf16.mxu0 %v7938_v9  ;;  %v7998_v9 = vld [vmem:[#allocation14 + $0xd00] ss:$28 sps:$4 sm:$0xff]  }
 0x4ec   :  { %6039 = vmatpush1.bf16.msra.mxu1 %v7935_v10  ;;  %v7995_v10 = vld [vmem:[#allocation14 + $0x438] ss:$28 sps:$4 sm:$0xff]  }
 0x4ed   :  { %7236 = vmatpush3.bf16.msra.mxu0 %v7939_v11  ;;  %6040 = vmatprep.subr.bf16.mxu1 %v7942_v12  ;;  %v8002_v11 = vld [vmem:[#allocation14 + $0x474] ss:$28 sps:$4 sm:$0xff]  }
 0x4ee   :  { %7243 = vmatprep.subr.bf16.mxu0 %v7943_v15  ;;  %v8003_v12 = vld [vmem:[#allocation14 + $0xd38] ss:$28 sps:$4 sm:$0xff]   ;;  %v8000_v15 = vld [vmem:[#allocation14 + $0x470] ss:$28 sps:$4 sm:$0xff]  }
 0x4f0   :  { %6270 = vmatmul.mubr.bf16.vlgmr.msra.gmra.mrb[24].mxu0 %v8700_v3  ;;  %6041 = vmatpush1.bf16.msra.mxu1 %v7940_v20  ;;  %v8004_v20 = vld [vmem:[#allocation14 + $0xb78] ss:$28 sps:$4 sm:$0xff]  }
 0x4f1   :  { %7244 = vmatpush3.bf16.msra.mxu0 %v7944_v21  ;;  %6310 = vmatprep.mubr.bf16.mxu0 %v8732_v19  ;;  %v8007_v21 = vld [vmem:[#allocation14 + $0x4ac] ss:$28 sps:$4 sm:$0xff]  }
 0x4f2   :  { %6042 = vmatprep.subr.bf16.mxu1 %v7947_v24  ;;  %7245 = vmatprep.subr.bf16.mxu0 %v7948_v29  ;;  %v8008_v24 = vld [vmem:[#allocation14 + $0xd70] ss:$28 sps:$4 sm:$0xff]   ;;  %v8005_v29 = vld [vmem:[#allocation14 + $0x4a8] ss:$28 sps:$4 sm:$0xff]  }
 0x4f4   :  { %6043 = vmatpush1.bf16.msra.mxu1 %v7945_v25  ;;  %v8009_v25 = vld [vmem:[#allocation14 + $0xbb0] ss:$28 sps:$4 sm:$0xff]  }
 0x4f5   :  { %7246 = vmatpush3.bf16.msra.mxu0 %v7949_v26  ;;  %6044 = vmatprep.subr.bf16.mxu1 %v7952_v30  ;;  %v8012_v26 = vld [vmem:[#allocation14 + $0x4e4] ss:$28 sps:$4 sm:$0xff]  }
 0x4f6   :  { %7247 = vmatprep.subr.bf16.mxu0 %v7953_v31  ;;  %v8013_v30 = vld [vmem:[#allocation14 + $0xda8] ss:$28 sps:$4 sm:$0xff]   ;;  %v8010_v31 = vld [vmem:[#allocation14 + $0x4e0] ss:$28 sps:$4 sm:$0xff]  }
 0x4f8   :  { %6045 = vmatpush1.bf16.msra.mxu1 %v7950_v35  ;;  %v8014_v35 = vld [vmem:[#allocation14 + $0xbe8] ss:$28 sps:$4 sm:$0xff]  }
 0x4f9   :  { %7248 = vmatpush3.bf16.msra.mxu0 %v7954_v36  ;;  %6046 = vmatprep.subr.bf16.mxu1 %v7957_v38  ;;  %v8017_v36 = vld [vmem:[#allocation14 + $0x51c] ss:$28 sps:$4 sm:$0xff]  }
 0x4fa   :  { %7249 = vmatprep.subr.bf16.mxu0 %v7958_v4  ;;  %v8018_v38 = vld [vmem:[#allocation14 + $0xde0] ss:$28 sps:$4 sm:$0xff]   ;;  %v8015_v4 = vld [vmem:[#allocation14 + $0x518] ss:$28 sps:$4 sm:$0xff]  }
 0x4fc   :  { %6047 = vmatpush1.bf16.msra.mxu1 %v7955_v39  ;;  %v8019_v39 = vld [vmem:[#allocation14 + $0xc20] ss:$28 sps:$4 sm:$0xff]  }
 0x4fd   :  { %7250 = vmatpush3.bf16.msra.mxu0 %v7959_v58  ;;  %6048 = vmatprep.subr.bf16.mxu1 %v7962_v28  ;;  %v8022_v58 = vld [vmem:[#allocation14 + $0x554] ss:$28 sps:$4 sm:$0xff]  }
 0x4fe   :  { %7251 = vmatprep.subr.bf16.mxu0 %v7963_v42  ;;  %v8020_v28 = vld [vmem:[#allocation14 + $0x550] ss:$28 sps:$4 sm:$0xff]  }
 0x4ff   :  { %v8025_v42 = vld [vmem:[#allocation14 + $0x58c] ss:$28 sps:$4 sm:$0xff]  }
 0x500   :  { %6049 = vmatpush1.bf16.msra.mxu1 %v7960_v44  ;;  %v8023_v44 = vld [vmem:[#allocation14 + $0x588] ss:$28 sps:$4 sm:$0xff]  }
 0x501   :  { %7252 = vmatpush3.bf16.msra.mxu0 %v7964_v45  ;;  %6050 = vmatprep.subr.bf16.mxu1 %v7967_v46  ;;  %v8028_v45 = vld [vmem:[#allocation14 + $0x5c4] ss:$28 sps:$4 sm:$0xff]  }
 0x502   :  { %7253 = vmatprep.subr.bf16.mxu0 %v7968_v47  ;;  %v8026_v46 = vld [vmem:[#allocation14 + $0x5c0] ss:$28 sps:$4 sm:$0xff]  }
 0x503   :  { %v8031_v47 = vld [vmem:[#allocation14 + $0x5fc] ss:$28 sps:$4 sm:$0xff]  }
 0x504   :  { %6051 = vmatpush1.bf16.msra.mxu1 %v7965_v49  ;;  %v8029_v49 = vld [vmem:[#allocation14 + $0x5f8] ss:$28 sps:$4 sm:$0xff]  }
 0x505   :  { %7254 = vmatpush3.bf16.msra.mxu0 %v7969_v62  ;;  %6052 = vmatprep.subr.bf16.mxu1 %v7972_v50  ;;  %v8034_v62 = vld [vmem:[#allocation14 + $0x634] ss:$28 sps:$4 sm:$0xff]  }
 0x506   :  { %7255 = vmatprep.subr.bf16.mxu0 %v7973_v27  ;;  %v8032_v50 = vld [vmem:[#allocation14 + $0x630] ss:$28 sps:$4 sm:$0xff]  }
 0x507   :  { %v8037_v27 = vld [vmem:[#allocation14 + $0x66c] ss:$28 sps:$4 sm:$0xff]  }
 0x508   :  { %6053 = vmatpush1.bf16.msra.mxu1 %v7970_v52  ;;  %v8035_v52 = vld [vmem:[#allocation14 + $0x668] ss:$28 sps:$4 sm:$0xff]  }
 0x509   :  { %7256 = vmatpush3.bf16.msra.mxu0 %v7974_v53  ;;  %6054 = vmatprep.subr.bf16.mxu1 %v7977_v22  ;;  %v8040_v53 = vld [vmem:[#allocation14 + $0x6a4] ss:$28 sps:$4 sm:$0xff]  }
 0x50a   :  { %7257 = vmatprep.subr.bf16.mxu0 %v7978_v32  ;;  %v8038_v22 = vld [vmem:[#allocation14 + $0x6a0] ss:$28 sps:$4 sm:$0xff]  }
 0x50b   :  { %v8043_v32 = vld [vmem:[#allocation14 + $0x6dc] ss:$28 sps:$4 sm:$0xff]  }
 0x50c   :  { %6055 = vmatpush1.bf16.msra.mxu1 %v7975_v33  ;;  %v8041_v33 = vld [vmem:[#allocation14 + $0x6d8] ss:$28 sps:$4 sm:$0xff]  }
 0x50d   :  { %7258 = vmatpush3.bf16.msra.mxu0 %v7979_v34  ;;  %6067 = vmatprep.subr.bf16.mxu1 %v7982_v37  ;;  %v8046_v34 = vld [vmem:[#allocation14 + $0x714] ss:$28 sps:$4 sm:$0xff]  }
 0x50e   :  { %7265 = vmatprep.subr.bf16.mxu0 %v7983_v40  ;;  %v8044_v37 = vld [vmem:[#allocation14 + $0x710] ss:$28 sps:$4 sm:$0xff]  }
 0x50f   :  { %6057 = vmatmul.mubr.bf16.vlgmr.msra.gmra.mrb[12].mxu1 %v8698_v2  ;;  %v8049_v40 = vld [vmem:[#allocation14 + $0x74c] ss:$28 sps:$4 sm:$0xff]  }
 0x510   :  { %6311 = vmatmul.mubr.bf16.vlgmr.msra.gmra.mrb[28].mxu0 %v8728_v14  ;;  %6068 = vmatpush1.bf16.msra.mxu1 %v7980_v41  ;;  %v8047_v41 = vld [vmem:[#allocation14 + $0x748] ss:$28 sps:$4 sm:$0xff]  }
 0x511   :  { %6099 = vmatprep.mubr.bf16.mxu1 %v8704_v7  ;;  %7266 = vmatpush3.bf16.msra.mxu0 %v7984_v54  ;;  %v7999_v7 = vld [vmem:[#allocation14 + $0xb40] ss:$28 sps:$4 sm:$0xff]  }
 0x512   :  { %6351 = vmatprep.mubr.bf16.mxu0 %v8734_v23  ;;  %6069 = vmatprep.subr.bf16.mxu1 %v7987_v55  ;;  %v8052_v54 = vld [vmem:[#allocation14 + $0x784] ss:$28 sps:$4 sm:$0xff]  }
 0x513   :  { %7267 = vmatprep.subr.bf16.mxu0 %v7988_v56  ;;  %v8050_v55 = vld [vmem:[#allocation14 + $0x780] ss:$28 sps:$4 sm:$0xff]  }
 0x514   :  { %6070 = vmatpush1.bf16.msra.mxu1 %v7985_v57  ;;  %v8055_v56 = vld [vmem:[#allocation14 + $0x7bc] ss:$28 sps:$4 sm:$0xff]  }
 0x515   :  { %7268 = vmatpush3.bf16.msra.mxu0 %v7989_v59  ;;  %6071 = vmatprep.subr.bf16.mxu1 %v7992_v60  ;;  %v8053_v57 = vld [vmem:[#allocation14 + $0x7b8] ss:$28 sps:$4 sm:$0xff]   ;;  %v8056_v60 = vld [vmem:[#allocation14 + $0x7f0] ss:$28 sps:$4 sm:$0xff]  }
 0x516   :  { %7269 = vmatprep.subr.bf16.mxu0 %v7993_v61  ;;  %v8058_v59 = vld [vmem:[#allocation14 + $0x7f4] ss:$28 sps:$4 sm:$0xff]   ;;  %v8061_v61 = vld [vmem:[#allocation14 + $0x82c] ss:$28 sps:$4 sm:$0xff]  }
 0x518   :  { %6072 = vmatpush1.bf16.msra.mxu1 %v7990_v63  ;;  %v8064_v63 = vld [vmem:[#allocation14 + $0x864] ss:$28 sps:$4 sm:$0xff]  }
 0x519   :  { %7270 = vmatpush3.bf16.msra.mxu0 %v7994_v0  ;;  %6073 = vmatprep.subr.bf16.mxu1 %v7997_v1  ;;  %v8067_v0 = vld [vmem:[#allocation14 + $0x89c] ss:$28 sps:$4 sm:$0xff]  }
 0x51a   :  { %7271 = vmatprep.subr.bf16.mxu0 %v7998_v9  ;;  %v8065_v1 = vld [vmem:[#allocation14 + $0x898] ss:$28 sps:$4 sm:$0xff]  }
 0x51b   :  { %v8070_v9 = vld [vmem:[#allocation14 + $0x8d4] ss:$28 sps:$4 sm:$0xff]  }
 0x51c   :  { %6074 = vmatpush1.bf16.msra.mxu1 %v7995_v10  ;;  %v8068_v10 = vld [vmem:[#allocation14 + $0x8d0] ss:$28 sps:$4 sm:$0xff]  }
 0x51d   :  { %7272 = vmatpush3.bf16.msra.mxu0 %v7999_v7  ;;  %6075 = vmatprep.subr.bf16.mxu1 %v8002_v11  ;;  %v8073_v7 = vld [vmem:[#allocation14 + $0x90c] ss:$28 sps:$4 sm:$0xff]  }
 0x51e   :  { %7273 = vmatprep.subr.bf16.mxu0 %v8003_v12  ;;  %v8071_v11 = vld [vmem:[#allocation14 + $0x908] ss:$28 sps:$4 sm:$0xff]  }
 0x51f   :  { %v8076_v12 = vld [vmem:[#allocation14 + $0x944] ss:$28 sps:$4 sm:$0xff]  }
 0x520   :  { %6076 = vmatpush1.bf16.msra.mxu1 %v8000_v15  ;;  %v8074_v15 = vld [vmem:[#allocation14 + $0x940] ss:$28 sps:$4 sm:$0xff]  }
 0x521   :  { %7274 = vmatpush3.bf16.msra.mxu0 %v8004_v20  ;;  %6077 = vmatprep.subr.bf16.mxu1 %v8007_v21  ;;  %v8079_v20 = vld [vmem:[#allocation14 + $0x97c] ss:$28 sps:$4 sm:$0xff]  }
 0x522   :  { %7275 = vmatprep.subr.bf16.mxu0 %v8008_v24  ;;  %v8077_v21 = vld [vmem:[#allocation14 + $0x978] ss:$28 sps:$4 sm:$0xff]  }
 0x523   :  { %v8082_v24 = vld [vmem:[#allocation14 + $0x9b4] ss:$28 sps:$4 sm:$0xff]  }
 0x524   :  { %6078 = vmatpush1.bf16.msra.mxu1 %v8005_v29  ;;  %v8080_v29 = vld [vmem:[#allocation14 + $0x9b0] ss:$28 sps:$4 sm:$0xff]  }
 0x525   :  { %7276 = vmatpush3.bf16.msra.mxu0 %v8009_v25  ;;  %6079 = vmatprep.subr.bf16.mxu1 %v8012_v26  ;;  %v8085_v25 = vld [vmem:[#allocation14 + $0x9ec] ss:$28 sps:$4 sm:$0xff]  }
 0x526   :  { %7277 = vmatprep.subr.bf16.mxu0 %v8013_v30  ;;  %v8083_v26 = vld [vmem:[#allocation14 + $0x9e8] ss:$28 sps:$4 sm:$0xff]  }
 0x527   :  { %v8088_v30 = vld [vmem:[#allocation14 + $0xa24] ss:$28 sps:$4 sm:$0xff]  }
 0x528   :  { %6080 = vmatpush1.bf16.msra.mxu1 %v8010_v31  ;;  %v8086_v31 = vld [vmem:[#allocation14 + $0xa20] ss:$28 sps:$4 sm:$0xff]  }
 0x529   :  { %7278 = vmatpush3.bf16.msra.mxu0 %v8014_v35  ;;  %6081 = vmatprep.subr.bf16.mxu1 %v8017_v36  ;;  %v8091_v35 = vld [vmem:[#allocation14 + $0xa5c] ss:$28 sps:$4 sm:$0xff]  }
 0x52a   :  { %7279 = vmatprep.subr.bf16.mxu0 %v8018_v38  ;;  %v8089_v36 = vld [vmem:[#allocation14 + $0xa58] ss:$28 sps:$4 sm:$0xff]  }
 0x52b   :  { %v8094_v38 = vld [vmem:[#allocation14 + $0xa94] ss:$28 sps:$4 sm:$0xff]  }
 0x52c   :  { %6082 = vmatpush1.bf16.msra.mxu1 %v8015_v4  ;;  %v8092_v4 = vld [vmem:[#allocation14 + $0xa90] ss:$28 sps:$4 sm:$0xff]  }
 0x52d   :  { %7280 = vmatpush3.bf16.msra.mxu0 %v8019_v39  ;;  %6083 = vmatprep.subr.bf16.mxu1 %v8022_v58  ;;  %v8097_v39 = vld [vmem:[#allocation14 + $0xacc] ss:$28 sps:$4 sm:$0xff]  }
 0x52e   :  { %v8095_v58 = vld [vmem:[#allocation14 + $0xac8] ss:$28 sps:$4 sm:$0xff]  }
 0x530   :  { %6352 = vmatmul.mubr.bf16.vlgmr.msra.gmra.mrb[32].mxu0 %v8730_v18  ;;  %6084 = vmatpush1.bf16.msra.mxu1 %v8020_v28  ;;  %v8100_v28 = vld [vmem:[#allocation14 + $0xb04] ss:$28 sps:$4 sm:$0xff]  }
 0x531   :  { %6085 = vmatprep.subr.bf16.mxu1 %v8025_v42  ;;  %v8098_v42 = vld [vmem:[#allocation14 + $0xb00] ss:$28 sps:$4 sm:$0xff]  }
 0x534   :  { %6086 = vmatpush1.bf16.msra.mxu1 %v8023_v44  ;;  %v8103_v44 = vld [vmem:[#allocation14 + $0xb3c] ss:$28 sps:$4 sm:$0xff]  }
 0x535   :  { %6087 = vmatprep.subr.bf16.mxu1 %v8028_v45  ;;  %v8101_v45 = vld [vmem:[#allocation14 + $0xb38] ss:$28 sps:$4 sm:$0xff]  }
 0x538   :  { %6088 = vmatpush1.bf16.msra.mxu1 %v8026_v46  ;;  %v8106_v46 = vld [vmem:[#allocation14 + $0xb74] ss:$28 sps:$4 sm:$0xff]  }
 0x539   :  { %6089 = vmatprep.subr.bf16.mxu1 %v8031_v47  ;;  %v8104_v47 = vld [vmem:[#allocation14 + $0xb70] ss:$28 sps:$4 sm:$0xff]  }
 0x53c   :  { %6090 = vmatpush1.bf16.msra.mxu1 %v8029_v49  ;;  %v8757_v49 = vld [vmem:[#allocation16] sm:$0xff] }
 0x53d   :  { %6091 = vmatprep.subr.bf16.mxu1 %v8034_v62  ;;  %v3352_v62 = vrot.slane %v8757_v49, %v8663_v5 }
 0x540   :  { %6092 = vmatpush1.bf16.msra.mxu1 %v8032_v50  ;;  %v3348_v50 = vrot.slane %v8757_v49, %v8618_v51 }
 0x541   :  { %6093 = vmatprep.subr.bf16.mxu1 %v8037_v27  ;;  %v3356_v27 = vrot.slane %v8757_v49, %v8666_v8  ;;  %v8115_v8 = vld [vmem:[#allocation14 + $0xc1c] ss:$28 sps:$4 sm:$0xff]  }
 0x544   :  { %6094 = vmatpush1.bf16.msra.mxu1 %v8035_v52  ;;  %v8107_v52 = vld [vmem:[#allocation14 + $0xba8] ss:$28 sps:$4 sm:$0xff]  }
 0x545   :  { %6095 = vmatprep.subr.bf16.mxu1 %v8040_v53  ;;  %v8112_v53 = vld [vmem:[#allocation14 + $0xbe4] ss:$28 sps:$4 sm:$0xff]  }
 0x548   :  { %6096 = vmatpush1.bf16.msra.mxu1 %v8038_v22 }
 0x549   :  { %6097 = vmatprep.subr.bf16.mxu1 %v8043_v32 }
 0x54c   :  { %6098 = vmatpush1.bf16.msra.mxu1 %v8041_v33 }
 0x54d   :  { %6110 = vmatprep.subr.bf16.mxu1 %v8046_v34 }
 0x54f   :  { %6100 = vmatmul.mubr.bf16.vlgmr.msra.gmra.mrb[12].mxu1 %v8700_v3  ;;  %v8059_v3 = vld [vmem:[#allocation14 + $0x828] ss:$28 sps:$4 sm:$0xff]  }
 0x550   :  { %6111 = vmatpush1.bf16.msra.mxu1 %v8044_v37  ;;  %6142 = vmatprep.mubr.bf16.mxu1 %v8732_v19  ;;  %v8062_v19 = vld [vmem:[#allocation14 + $0x860] ss:$28 sps:$4 sm:$0xff]  }
 0x551   :  { %6112 = vmatprep.subr.bf16.mxu1 %v8049_v40 }
 0x554   :  { %6113 = vmatpush1.bf16.msra.mxu1 %v8047_v41 }
 0x555   :  { %6114 = vmatprep.subr.bf16.mxu1 %v8052_v54 }
 0x558   :  { %6115 = vmatpush1.bf16.msra.mxu1 %v8050_v55  ;;  %v8110_v55 = vld [vmem:[#allocation14 + $0xbe0] ss:$28 sps:$4 sm:$0xff]  }
 0x559   :  { %6116 = vmatprep.subr.bf16.mxu1 %v8055_v56 }
 0x55c   :  { %6117 = vmatpush1.bf16.msra.mxu1 %v8053_v57 }
 0x55d   :  { %6118 = vmatprep.subr.bf16.mxu1 %v8058_v59 }
 0x560   :  { %6119 = vmatpush1.bf16.msra.mxu1 %v8056_v60 }
 0x561   :  { %6120 = vmatprep.subr.bf16.mxu1 %v8061_v61 }
 0x564   :  { %6121 = vmatpush1.bf16.msra.mxu1 %v8059_v3  ;;  %v8113_v3 = vld [vmem:[#allocation14 + $0xc18] ss:$28 sps:$4 sm:$0xff]  }
 0x565   :  { %6122 = vmatprep.subr.bf16.mxu1 %v8064_v63  ;;  %v8118_v63 = vld [vmem:[#allocation14 + $0xc54] ss:$28 sps:$4 sm:$0xff]  }
 0x568   :  { %6123 = vmatpush1.bf16.msra.mxu1 %v8062_v19  ;;  %v8116_v19 = vld [vmem:[#allocation14 + $0xc50] ss:$28 sps:$4 sm:$0xff]  }
 0x569   :  { %6124 = vmatprep.subr.bf16.mxu1 %v8067_v0  ;;  %v8121_v0 = vld [vmem:[#allocation14 + $0xc8c] ss:$28 sps:$4 sm:$0xff]  }
 0x56c   :  { %6125 = vmatpush1.bf16.msra.mxu1 %v8065_v1 }
 0x56d   :  { %6126 = vmatprep.subr.bf16.mxu1 %v8070_v9 }
 0x570   :  { %6127 = vmatpush1.bf16.msra.mxu1 %v8068_v10  ;;  %v8119_v10 = vld [vmem:[#allocation14 + $0xc88] ss:$28 sps:$4 sm:$0xff]  }
 0x571   :  { %6128 = vmatprep.subr.bf16.mxu1 %v8073_v7 }
 0x574   :  { %6129 = vmatpush1.bf16.msra.mxu1 %v8071_v11  ;;  %v8124_v11 = vld [vmem:[#allocation14 + $0xcc4] ss:$28 sps:$4 sm:$0xff]  }
 0x575   :  { %6130 = vmatprep.subr.bf16.mxu1 %v8076_v12 }
 0x578   :  { %6131 = vmatpush1.bf16.msra.mxu1 %v8074_v15 }
 0x579   :  { %6132 = vmatprep.subr.bf16.mxu1 %v8079_v20 }
 0x57c   :  { %6133 = vmatpush1.bf16.msra.mxu1 %v8077_v21  ;;  %v8122_v21 = vld [vmem:[#allocation14 + $0xcc0] ss:$28 sps:$4 sm:$0xff]  }
 0x57d   :  { %6134 = vmatprep.subr.bf16.mxu1 %v8082_v24 }
 0x580   :  { %6135 = vmatpush1.bf16.msra.mxu1 %v8080_v29  ;;  %v8127_v29 = vld [vmem:[#allocation14 + $0xcfc] ss:$28 sps:$4 sm:$0xff]  }
 0x581   :  { %6136 = vmatprep.subr.bf16.mxu1 %v8085_v25 }
 0x584   :  { %6137 = vmatpush1.bf16.msra.mxu1 %v8083_v26  ;;  %v8125_v26 = vld [vmem:[#allocation14 + $0xcf8] ss:$28 sps:$4 sm:$0xff]  }
 0x585   :  { %6138 = vmatprep.subr.bf16.mxu1 %v8088_v30  ;;  %v8130_v30 = vld [vmem:[#allocation14 + $0xd34] ss:$28 sps:$4 sm:$0xff]  }
 0x588   :  { %6139 = vmatpush1.bf16.msra.mxu1 %v8086_v31  ;;  %v8128_v31 = vld [vmem:[#allocation14 + $0xd30] ss:$28 sps:$4 sm:$0xff]  }
 0x589   :  { %6140 = vmatprep.subr.bf16.mxu1 %v8091_v35  ;;  %v8133_v35 = vld [vmem:[#allocation14 + $0xd6c] ss:$28 sps:$4 sm:$0xff]  }
 0x58c   :  { %6141 = vmatpush1.bf16.msra.mxu1 %v8089_v36  ;;  %v8131_v36 = vld [vmem:[#allocation14 + $0xd68] ss:$28 sps:$4 sm:$0xff]  }
 0x58d   :  { %6153 = vmatprep.subr.bf16.mxu1 %v8094_v38  ;;  %v8136_v38 = vld [vmem:[#allocation14 + $0xda4] ss:$28 sps:$4 sm:$0xff]  }
 0x58f   :  { %6143 = vmatmul.mubr.bf16.vlgmr.msra.gmra.mrb[12].mxu1 %v8728_v14  ;;  %v8109_v14 = vld [vmem:[#allocation14 + $0xbac] ss:$28 sps:$4 sm:$0xff]  }
 0x590   :  { %6154 = vmatpush1.bf16.msra.mxu1 %v8092_v4  ;;  %6185 = vmatprep.mubr.bf16.mxu1 %v8734_v23  ;;  %v3344_v23 = vrot.slane %v8757_v49, %v8615_v48 }
 0x591   :  { %6155 = vmatprep.subr.bf16.mxu1 %v8097_v39 }
 0x594   :  { %6156 = vmatpush1.bf16.msra.mxu1 %v8095_v58  ;;  %v8134_v58 = vld [vmem:[#allocation14 + $0xda0] ss:$28 sps:$4 sm:$0xff]  }
 0x595   :  { %6157 = vmatprep.subr.bf16.mxu1 %v8100_v28 }
 0x598   :  { %6158 = vmatpush1.bf16.msra.mxu1 %v8098_v42 }
 0x599   :  { %6159 = vmatprep.subr.bf16.mxu1 %v8103_v44  ;;  %v8139_v44 = vld [vmem:[#allocation14 + $0xddc] ss:$28 sps:$4 sm:$0xff]  }
 0x59c   :  { %6160 = vmatpush1.bf16.msra.mxu1 %v8101_v45 }
 0x59d   :  { %6161 = vmatprep.subr.bf16.mxu1 %v8106_v46 }
 0x5a0   :  { %6162 = vmatpush1.bf16.msra.mxu1 %v8104_v47  ;;  %v8137_v47 = vld [vmem:[#allocation14 + $0xdd8] ss:$28 sps:$4 sm:$0xff]  }
 0x5a1   :  { %6163 = vmatprep.subr.bf16.mxu1 %v8109_v14  ;;  %v8140_v14 = vld [vmem:[#allocation14 + $0x1d8] ss:$28 sps:$4 sm:$0xff]  }
 0x5a2   :  { %v5843_v22 = vpop.f32.mrb[8].mxu1  ;;  %v6015_v32 = vpop.f32.mrb[20].mxu0 }
 0x5a3   :  { %v7303_v33 = vadd.f32 %v5843_v22, %v3344_v23  ;;  %v7307_v34 = vadd.f32 %v6015_v32, %v3352_v62  ;;  %v5845_v37 = vpop.f32.mrb[9].mxu1  ;;  %v6017_v40 = vpop.f32.mrb[21].mxu0  ;;  %v8147_v22 = vld [vmem:[#allocation14 + $0xc0] ss:$28 sps:$4 sm:$0xff]   ;;  %v8148_v32 = vld [vmem:[#allocation14 + $0x2b8] ss:$28 sps:$4 sm:$0xff]  }
 0x5a4   :  { %v7304_v48 = vadd.f32 %v5845_v37, %v3348_v50  ;;  %v7308_v41 = vadd.f32 %v6017_v40, %v3356_v27  ;;  %v5847_v54 = vpop.f32.mrb[10].mxu1  ;;  %v6019_v5 = vpop.f32.mrb[22].mxu0  ;;  %6164 = vmatpush1.bf16.msra.mxu1 %v8107_v52  ;;  %v8145_v52 = vld [vmem:[#allocation14 + $0x88] ss:$28 sps:$4 sm:$0xff]  }
 0x5a5   :  { %8156 = vtanh.f32 %v7303_v33  ;;  %v7305_v51 = vadd.f32 %v5847_v54, %v3344_v23  ;;  %v5849_v56 = vpop.f32.mrb[11].mxu1  ;;  %v6021_v57 = vpop.f32.mrb[23].mxu0  ;;  %6165 = vmatprep.subr.bf16.mxu1 %v8112_v53  ;;  %v7309_v59 = vadd.f32 %v6019_v5, %v3352_v62  ;;  %v8141_v23 = vld [vmem:[#allocation14 + $0x18] ss:$28 sps:$4 sm:$0xff]   ;;  %v8142_v62 = vld [vmem:[#allocation14 + $0x210] ss:$28 sps:$4 sm:$0xff]  }
 0x5a6   :  { %8158 = vtanh.f32 %v7307_v34  ;;  %v7306_v60 = vadd.f32 %v5849_v56, %v3348_v50  ;;  %v7310_v61 = vadd.f32 %v6021_v57, %v3356_v27  ;;  %v8143_v50 = vld [vmem:[#allocation14 + $0x50] ss:$28 sps:$4 sm:$0xff]   ;;  %v8144_v27 = vld [vmem:[#allocation14 + $0x248] ss:$28 sps:$4 sm:$0xff]   ;;  %v8146_v53 = vld [vmem:[#allocation14 + $0x280] ss:$28 sps:$4 sm:$0xff]  }
 0x5a7   :  { %8160 = vtanh.f32 %v7304_v48  ;;  %v8149_v33 = vld [vmem:[#allocation14 + $0xf8] ss:$28 sps:$4 sm:$0xff]   ;;  %v8150_v34 = vld [vmem:[#allocation14 + $0x2f0] ss:$28 sps:$4 sm:$0xff]   ;;  %v8152_v37 = vld [vmem:[#allocation14 + $0x328] ss:$28 sps:$4 sm:$0xff]  }
 0x5a8   :  { %8162 = vtanh.f32 %v7308_v41  ;;  %6166 = vmatpush1.bf16.msra.mxu1 %v8110_v55  ;;  %v8153_v48 = vld [vmem:[#allocation14 + $0x168] ss:$28 sps:$4 sm:$0xff]   ;;  %v8154_v5 = vld [vmem:[#allocation14 + $0x360] ss:$28 sps:$4 sm:$0xff]  }
 0x5a9   :  { %8164 = vtanh.f32 %v7305_v51  ;;  %6167 = vmatprep.subr.bf16.mxu1 %v8115_v8  ;;  %v8155_v56 = vld [vmem:[#allocation14 + $0x1a0] ss:$28 sps:$4 sm:$0xff]  }
 0x5aa   :  { %8166 = vtanh.f32 %v7309_v59 }
 0x5ab   :  { %8168 = vtanh.f32 %v7306_v60 }
 0x5ac   :  { %8170 = vtanh.f32 %v7310_v61  ;;  %6168 = vmatpush1.bf16.msra.mxu1 %v8113_v3 }
 0x5ad   :  { %6169 = vmatprep.subr.bf16.mxu1 %v8118_v63  ;;  %v3360_v63 = vrot.slane %v8757_v49, %v1141_v13 }
 0x5af   :  { %v8157_v1 = vpop.eup %8156 }
 0x5b0   :  { %v8159_v9 = vpop.eup %8158  ;;  %6374 = vst [vmem:[#allocation17] sm:$0xff] %v8157_v1  ;;  %6170 = vmatpush1.bf16.msra.mxu1 %v8116_v19  ;;  %v3364_v19 = vrot.slane %v8757_v49, %v1145_v17 }
 0x5b1   :  { %v8161_v7 = vpop.eup %8160  ;;  %6376 = vst [vmem:[#allocation17 + $0x10] sm:$0xff] %v8159_v9  ;;  %6171 = vmatprep.subr.bf16.mxu1 %v8121_v0 }
 0x5b2   :  { %v8163_v12 = vpop.eup %8162  ;;  %6375 = vst [vmem:[#allocation17 + $0x8] sm:$0xff] %v8161_v7 }
 0x5b3   :  { %v8165_v15 = vpop.eup %8164  ;;  %6377 = vst [vmem:[#allocation17 + $0x18] sm:$0xff] %v8163_v12 }
 0x5b4   :  { %v8167_v20 = vpop.eup %8166  ;;  %6381 = vst [vmem:[#allocation17 + $0x38] sm:$0xff] %v8165_v15  ;;  %6172 = vmatpush1.bf16.msra.mxu1 %v8119_v10 }
 0x5b5   :  { %v8169_v24 = vpop.eup %8168  ;;  %6383 = vst [vmem:[#allocation17 + $0x48] sm:$0xff] %v8167_v20  ;;  %6173 = vmatprep.subr.bf16.mxu1 %v8124_v11 }
 0x5b6   :  { %v8171_v25 = vpop.eup %8170  ;;  %6382 = vst [vmem:[#allocation17 + $0x40] sm:$0xff] %v8169_v24  ;;  %v3368_v24 = vrot.slane %v8757_v49, %v1149_v16 }
 0x5b7   :  { %6384 = vst [vmem:[#allocation17 + $0x50] sm:$0xff] %v8171_v25 }
 0x5b8   :  { %6174 = vmatpush1.bf16.msra.mxu1 %v8122_v21 }
 0x5b9   :  { %6175 = vmatprep.subr.bf16.mxu1 %v8127_v29 }
 0x5bc   :  { %6176 = vmatpush1.bf16.msra.mxu1 %v8125_v26 }
 0x5bd   :  { %6177 = vmatprep.subr.bf16.mxu1 %v8130_v30 }
 0x5c0   :  { %6178 = vmatpush1.bf16.msra.mxu1 %v8128_v31 }
 0x5c1   :  { %6179 = vmatprep.subr.bf16.mxu1 %v8133_v35 }
 0x5c3   :  { %v7237_v4 = vpop.f32.mrb[24].mxu0 }
 0x5c4   :  { %v7238_v39 = vpop.f32.mrb[25].mxu0  ;;  %6180 = vmatpush1.bf16.msra.mxu1 %v8131_v36 }
 0x5c5   :  { %v8767_v28 = vadd.f32 %v7238_v39, %v7237_v4  ;;  %v7240_v42 = vpop.f32.mrb[26].mxu0  ;;  %6181 = vmatprep.subr.bf16.mxu1 %v8136_v38 }
 0x5c6   :  { %v7241_v45 = vpop.f32.mrb[27].mxu0 }
 0x5c7   :  { %v8769_v46 = vadd.f32 %v7241_v45, %v7240_v42 }
 0x5c8   :  { %6182 = vmatpush1.bf16.msra.mxu1 %v8134_v58 }
 0x5c9   :  { %6183 = vmatprep.subr.bf16.mxu1 %v8139_v44 }
 0x5cc   :  { %6184 = vmatpush1.bf16.msra.mxu1 %v8137_v47 }
 0x5cd   :  { %7199 = vmatprep.subr.bf16.mxu1 %v8140_v14 }
 0x5cf   :  { %6186 = vmatmul.mubr.bf16.vlgmr.msra.gmra.mrb[12].mxu1 %v8730_v18  ;;  %v8151_v18 = vld [vmem:[#allocation14 + $0x130] ss:$28 sps:$4 sm:$0xff]  }
 0x5d0   :  { %7200 = vmatpush3.bf16.msra.mxu1 %v8141_v23  ;;  %6228 = vmatprep.mubr.bf16.mxu1 %v8702_v6 }
 0x5d1   :  { %7201 = vmatprep.subr.bf16.mxu1 %v8142_v62 }
 0x5d4   :  { %7202 = vmatpush3.bf16.msra.mxu1 %v8143_v50 }
 0x5d5   :  { %7203 = vmatprep.subr.bf16.mxu1 %v8144_v27 }
 0x5d8   :  { %7204 = vmatpush3.bf16.msra.mxu1 %v8145_v52 }
 0x5d9   :  { %7205 = vmatprep.subr.bf16.mxu1 %v8146_v53 }
 0x5dc   :  { %7206 = vmatpush3.bf16.msra.mxu1 %v8147_v22 }
 0x5dd   :  { %7207 = vmatprep.subr.bf16.mxu1 %v8148_v32 }
 0x5e0   :  { %7208 = vmatpush3.bf16.msra.mxu1 %v8149_v33 }
 0x5e1   :  { %7209 = vmatprep.subr.bf16.mxu1 %v8150_v34 }
 0x5e3   :  { %v7259_v6 = vpop.f32.mrb[28].mxu0 }
 0x5e4   :  { %v7260_v40 = vpop.f32.mrb[29].mxu0  ;;  %7210 = vmatpush3.bf16.msra.mxu1 %v8151_v18 }
 0x5e5   :  { %v7261_v41 = vadd.f32 %v7260_v40, %v7259_v6  ;;  %v7262_v54 = vpop.f32.mrb[30].mxu0  ;;  %7211 = vmatprep.subr.bf16.mxu1 %v8152_v37 }
 0x5e6   :  { %v7263_v55 = vpop.f32.mrb[31].mxu0 }
 0x5e7   :  { %v7264_v51 = vadd.f32 %v7263_v55, %v7262_v54 }
 0x5e8   :  { %7212 = vmatpush3.bf16.msra.mxu1 %v8153_v48 }
 0x5e9   :  { %7213 = vmatprep.subr.bf16.mxu1 %v8154_v5 }
 0x5ec   :  { %7214 = vmatpush3.bf16.msra.mxu1 %v8155_v56 }
 0x5ef   :  { %6229 = vmatmul.mubr.bf16.vlgmr.msra.gmra.mrb[16].mxu1 %v8698_v2 }
 0x603   :  { %v7281_v57 = vpop.f32.mrb[32].mxu0 }
 0x604   :  { %v7282_v8 = vpop.f32.mrb[33].mxu0 }
 0x605   :  { %v7283_v59 = vadd.f32 %v7282_v8, %v7281_v57  ;;  %v7284_v60 = vpop.f32.mrb[34].mxu0 }
 0x606   :  { %v7285_v61 = vpop.f32.mrb[35].mxu0 }
 0x607   :  { %v7286_v3 = vadd.f32 %v7285_v61, %v7284_v60 }
 0x6a2   :  { %v6187_v0 = vpop.f32.mrb[12].mxu1 }
 0x6a3   :  { %v7311_v1 = vadd.f32 %v6187_v0, %v3360_v63  ;;  %v6189_v9 = vpop.f32.mrb[13].mxu1 }
 0x6a4   :  { %v7312_v10 = vadd.f32 %v6189_v9, %v3364_v19  ;;  %v6191_v7 = vpop.f32.mrb[14].mxu1 }
 0x6a5   :  { %8172 = vtanh.f32 %v7311_v1  ;;  %v7313_v2 = vadd.f32 %v6191_v7, %v3360_v63  ;;  %v6193_v11 = vpop.f32.mrb[15].mxu1 }
 0x6a6   :  { %8174 = vtanh.f32 %v7312_v10  ;;  %v7314_v12 = vadd.f32 %v6193_v11, %v3364_v19 }
 0x6a7   :  { %8176 = vtanh.f32 %v7313_v2 }
 0x6a8   :  { %8178 = vtanh.f32 %v7314_v12 }
 0x6af   :  { %v8173_v15 = vpop.eup %8172 }
 0x6b0   :  { %v8175_v20 = vpop.eup %8174  ;;  %6378 = vst [vmem:[#allocation17 + $0x20] sm:$0xff] %v8173_v15 }
 0x6b1   :  { %v8177_v13 = vpop.eup %8176  ;;  %6379 = vst [vmem:[#allocation17 + $0x28] sm:$0xff] %v8175_v20 }
 0x6b2   :  { %v8179_v21 = vpop.eup %8178  ;;  %6385 = vst [vmem:[#allocation17 + $0x58] sm:$0xff] %v8177_v13 }
 0x6b3   :  { %6386 = vst [vmem:[#allocation17 + $0x60] sm:$0xff] %v8179_v21 }
 0x6c2   :  { %v7215_v17 = vpop.f32.mrb[16].mxu1 }
 0x6c3   :  { %v7216_v29 = vpop.f32.mrb[17].mxu1 }
 0x6c4   :  { %v7217_v25 = vadd.f32 %v7216_v29, %v7215_v17  ;;  %v7218_v26 = vpop.f32.mrb[18].mxu1 }
 0x6c5   :  { %v7219_v30 = vpop.f32.mrb[19].mxu1 }
 0x6c6   :  { %v6231_v31 = vadd.f32 %v7217_v25, %v3368_v24  ;;  %v7220_v35 = vadd.f32 %v7219_v30, %v7218_v26 }
 0x6c8   :  { %v6272_v36 = vadd.f32 %v8767_v28, %v6231_v31  ;;  %v6234_v38 = vadd.f32 %v7220_v35, %v3368_v24 }
 0x6ca   :  { %v6313_v4 = vadd.f32 %v7261_v41, %v6272_v36  ;;  %v6275_v39 = vadd.f32 %v8769_v46, %v6234_v38 }
 0x6cc   :  { %v6354_v58 = vadd.f32 %v7283_v59, %v6313_v4  ;;  %v6316_v42 = vadd.f32 %v7264_v51, %v6275_v39 }
 0x6ce   :  { %8180 = vtanh.f32 %v6354_v58  ;;  %v6357_v44 = vadd.f32 %v7286_v3, %v6316_v42 }
 0x6d0   :  { %8182 = vtanh.f32 %v6357_v44 }
 0x6d8   :  { %v8181_v43 = vpop.eup %8180 }
 0x6d9   :  { %6380 = vst.msk [vmem:[#allocation17 + $0x30] sm:$0xff] %vm296_vm2, %v8181_v43 }
 0x6da   :  { %v8183_v16 = vpop.eup %8182 }
 0x6db   :  { %6387 = vst.msk [vmem:[#allocation17 + $0x68] sm:$0xff] %vm296_vm2, %v8183_v16 }
 0x6dc   :  { %8393 = shalt.err (!%p8390_p6)
}
 0x6dd   :  { %s8394_s18 = scalar_lea.hbm %s8809_s10, 1792 }
 0x6de   :  { %p8395_p7 = scmp.ne.s32.totalorder %s8809_s10, %s8394_s18  ;;  %p8398_p8 = scmp.lt.u32.totalorder %s8394_s18, %s8809_s10 }
 0x6e0   :  { %p8400_p9 = pnand %p8398_p8, %p8395_p7 }
 0x6e2   :  { %8403 = shalt.err (!%p8400_p9)
}
 0x6e3   :  { %s8438_s23 = smov 896   ;;  %s8439_s24 = smov 56  }
 0x6e4   :  { %6399 = dma.vmem_to_hbm [thread:$0]  %s6394_s9, 1792, %s8809_s10, [#allocation4], %s8438_s23, %s8438_s23, %s8439_s24  }
 0x6e5   :  { %8414 = dma.done.wait [#allocation4], 1792  }
 0x6e6   :  { %8415 = vsyncadd [#allocation4], 4294965504 }
 0x6e7   :  { %6403 = vsyncpa [#allocation3], 1 }
 0x6e8   :  { %6404 = vsyncpa [#allocation6], 1 }
 0x6e9   :  { %6405 = vsyncpa [#allocation9], 1 }
 0x6ea   :  { %6406 = vsyncpa [#allocation12], 1 }
 0x6eb   :  { %6407 = vsyncpa [#allocation15], 1 }
 0x6ec   :  { %6408 = vsyncpa [#allocation4], 1 }

</bundles_post_ra>
